<compile_context>
chip_gen: v7x
topology: tpu7x:2x2x1
jax: 0.10.0
libtpu: 0.0.40
codegen_flags: <defaults>
</compile_context>

<pallas_src>
import functools

import jax
import jax.numpy as jnp
from jax.experimental import pallas as pl
from jax.experimental.pallas import tpu as pltpu


def _round_up(n, m):
    return ((n + m - 1) // m) * m


def _feat_pad(n):
    # Wide feature dims stay multiples of 128 (lane width); narrow ones only need
    # the 8-sublane multiple -- avoids blowing the 32-wide bottleneck (and the
    # indim/outdim) up to 128 and shipping 4x the HBM bytes for those weights.
    return _round_up(n, 128) if n >= 128 else _round_up(n, 8)


def _pad2d(a, rows, cols):
    return jnp.zeros((rows, cols), a.dtype).at[: a.shape[0], : a.shape[1]].set(a)


def _make_kernel(widths):
    """widths[i] = padded output width of layer i (static Python ints), used to
    slice the packed bias array inside the fully fused 6-layer MLP kernel."""
    n1, n2, n3, n4, n5, n6 = widths

    def kernel(x_ref, w1, w2, w3, w4, w5, w6, b_ref, o_ref):
        def lin(h, w_ref, row, width):
            # bf16 x bf16 -> f32 accumulation on the MXU; bias added in f32.
            hb = h.astype(jnp.bfloat16)
            z = jnp.dot(hb, w_ref[...], preferred_element_type=jnp.float32)
            return z + b_ref[row : row + 1, 0:width]

        h = x_ref[...]                                                   # (Bp, in_p) f32
        z = lin(h, w1, 0, n1); h = z * jax.nn.sigmoid(z)                 # SiLU
        z = lin(h, w2, 1, n2); h = jnp.tanh(z)                           # Tanh
        z = lin(h, w3, 2, n3); h = jnp.where(z > 0, z, 0.01 * z)         # LeakyReLU
        z = lin(h, w4, 3, n4); h = jnp.where(z > 0, z, jnp.exp(z) - 1.0) # CELU(1.0)
        z = lin(h, w5, 4, n5); h = jnp.tanh(z)                           # Tanh
        z = lin(h, w6, 5, n6)                                            # final Linear
        o_ref[...] = z.astype(o_ref.dtype)

    return kernel


def init_generator_params(key, indim=2, middim=512, outdim=1):
    """Deterministic PyTorch-style init: U(-1/sqrt(fan_in), 1/sqrt(fan_in)).
    Weights stored as (in_features, out_features), all float32."""
    dims = [
        (indim, middim),
        (middim, middim * 4),
        (middim * 4, middim // 16),
        (middim // 16, middim * 4),
        (middim * 4, middim),
        (middim, outdim),
    ]
    params = []
    for (fin, fout) in dims:
        key, kw, kb = jax.random.split(key, 3)
        bound = 1.0 / jnp.sqrt(jnp.float32(fin))
        w = jax.random.uniform(kw, (fin, fout), jnp.float32, -bound, bound)
        b = jax.random.uniform(kb, (fout,), jnp.float32, -bound, bound)
        params.append((w, b))
    return params


def prepare_generator_params(params):
    """One-time packing (do NOT call per forward): cast weights to bf16, pad
    feature dims minimally, and fuse the six bias vectors into a single
    (6, max_width) f32 array (one DMA instead of six)."""
    in_p = [_feat_pad(w.shape[0]) for (w, _) in params]
    out_p = [_feat_pad(w.shape[1]) for (w, _) in params]

    ws = [
        _pad2d(w.astype(jnp.bfloat16), fi, fo)
        for (w, _), fi, fo in zip(params, in_p, out_p)
    ]

    bmax = max(out_p)
    b_all = jnp.zeros((len(params), bmax), jnp.float32)
    for i, (_, b) in enumerate(params):
        b_all = b_all.at[i, : b.shape[0]].set(b.astype(jnp.float32))

    return tuple(ws) + (b_all,)


@functools.partial(jax.jit, static_argnames=("outdim",))
def generator_forward(x, packed, outdim=1):
    """x: (B, indim) f32 -> (B, outdim) f32.  `packed` comes from
    prepare_generator_params (pre-padded bf16 weights + packed f32 biases)."""
    *ws, b_all = packed
    w1, w2, w3, w4, w5, w6 = ws
    B, _ = x.shape
    B_pad = _round_up(max(B, 8), 8)
    in_p = w1.shape[0]
    widths = tuple(w.shape[1] for w in ws)
    out_p = widths[-1]

    # Only x is padded inside the jitted path (tiny); weights are already packed.
    x_p = _pad2d(x.astype(jnp.float32), B_pad, in_p)

    flops = 2 * B_pad * sum(w.shape[0] * w.shape[1] for w in ws)
    transcendentals = B_pad * (widths[0] + widths[1] + widths[3] + widths[4])
    bytes_accessed = (
        x_p.size * x_p.dtype.itemsize
        + sum(w.size * w.dtype.itemsize for w in ws)
        + b_all.size * b_all.dtype.itemsize
        + B_pad * out_p * 4
    )

    vmem_spec = pl.BlockSpec(memory_space=pltpu.MemorySpace.VMEM)
    out = pl.pallas_call(
        _make_kernel(widths),
        out_shape=jax.ShapeDtypeStruct((B_pad, out_p), jnp.float32),
        in_specs=[vmem_spec] * 8,
        out_specs=vmem_spec,
        # ~4.5 MB of bf16 weights + tiny activations: 32 MiB is safe on
        # v5e/v6e (128 MiB VMEM) and on v7x (64 MiB VMEM per TensorCore).
        compiler_params=pltpu.CompilerParams(vmem_limit_bytes=32 * 1024 * 1024),
        cost_estimate=pl.CostEstimate(
            flops=flops,
            transcendentals=transcendentals,
            bytes_accessed=bytes_accessed,
        ),
    )(x_p, w1, w2, w3, w4, w5, w6, b_all)

    # TODO(synk): if batch grows beyond ~128, add a batch grid with
    # dimension_semantics=("parallel",) so v7x's second TensorCore is used.
    return out[:B, :outdim]


def generator_reference_f32(x, params):
    acts = [
        lambda v: v * jax.nn.sigmoid(v),                 # SiLU
        jnp.tanh,                                        # Tanh
        lambda v: jnp.where(v > 0, v, 0.01 * v),         # LeakyReLU
        lambda v: jnp.where(v > 0, v, jnp.exp(v) - 1.0), # CELU
        jnp.tanh,                                        # Tanh
        lambda v: v,                                     # final Linear
    ]
    h = x
    for (w, b), act in zip(params, acts):
        h = act(h @ w + b)
    return h


def generator_reference_matched(x, packed, outdim):
    """Mirrors the kernel's precision exactly (bf16 weights/acts, f32 accum)."""
    *ws, b_all = packed
    acts = [
        lambda v: v * jax.nn.sigmoid(v),
        jnp.tanh,
        lambda v: jnp.where(v > 0, v, 0.01 * v),
        lambda v: jnp.where(v > 0, v, jnp.exp(v) - 1.0),
        jnp.tanh,
        lambda v: v,
    ]
    h = x.astype(jnp.float32)
    h = jnp.pad(h, ((0, 0), (0, ws[0].shape[0] - h.shape[1])))
    for i, (w, act) in enumerate(zip(ws, acts)):
        z = jnp.dot(h.astype(jnp.bfloat16), w, preferred_element_type=jnp.float32)
        z = z + b_all[i, : w.shape[1]]
        h = act(z)
    return h[:, :outdim]


if __name__ == "__main__":
    key = jax.random.PRNGKey(0)
    k_param, k_x = jax.random.split(key)

    INDIM, MIDDIM, OUTDIM = 2, 512, 1
    BATCH = 8

    params = init_generator_params(k_param, INDIM, MIDDIM, OUTDIM)
    packed = prepare_generator_params(params)   # one-time packing, outside jit

    x = jax.random.normal(k_x, (BATCH, INDIM), jnp.float32)

    y = generator_forward(x, packed, outdim=OUTDIM)
    y = jax.block_until_ready(y)

    assert y.shape == (BATCH, OUTDIM)

    # Exact-precision reference (bf16 weights, f32 accumulation).
    y_matched = generator_reference_matched(x, packed, OUTDIM)
    assert jnp.allclose(y, y_matched, atol=1e-3, rtol=1e-3)

    # Full-f32 PyTorch-semantics reference (looser: weights shipped in bf16).
    y_f32 = generator_reference_f32(x, params)
    assert jnp.allclose(y, y_f32, atol=2e-2, rtol=2e-2)

    print("KERNEL_OK")
</pallas_src>

<mosaic_0001>
module attributes {stable_mosaic.version = 11 : i64} {
  func.func @kernel(%arg0: memref<8x8xf32, #tpu.memory_space<vmem>>, %arg1: memref<8x512xbf16, #tpu.memory_space<vmem>>, %arg2: memref<512x2048xbf16, #tpu.memory_space<vmem>>, %arg3: memref<2048x32xbf16, #tpu.memory_space<vmem>>, %arg4: memref<32x2048xbf16, #tpu.memory_space<vmem>>, %arg5: memref<2048x512xbf16, #tpu.memory_space<vmem>>, %arg6: memref<512x8xbf16, #tpu.memory_space<vmem>>, %arg7: memref<6x2048xf32, #tpu.memory_space<vmem>>, %arg8: memref<8x8xf32, #tpu.memory_space<vmem>>) attributes {dimension_semantics = [], scalar_prefetch = 0 : i64, scratch_operands = 0 : i64, tpu.core_type = #tpu.core_type<tc>} {
    %c0 = arith.constant 0 : index
    %c0_0 = arith.constant 0 : index
    %0 = vector.load %arg0[%c0, %c0_0] : memref<8x8xf32, #tpu.memory_space<vmem>>, vector<8x8xf32>
    %1 = arith.truncf %0 : vector<8x8xf32> to vector<8x8xbf16>
    %c0_1 = arith.constant 0 : index
    %c0_2 = arith.constant 0 : index
    %2 = vector.load %arg1[%c0_1, %c0_2] : memref<8x512xbf16, #tpu.memory_space<vmem>>, vector<8x512xbf16>
    %cst = arith.constant dense<0.000000e+00> : vector<8x512xf32>
    %3 = tpu.matmul %1, %2, %cst {dimension_numbers = #tpu.dot_dimension_numbers<[1], [0], [0], [1], [0, 0, 1, 1], [], []>} : vector<8x8xbf16>, vector<8x512xbf16>, vector<8x512xf32> -> vector<8x512xf32>
    %c0_3 = arith.constant 0 : index
    %c0_4 = arith.constant 0 : index
    %4 = vector.load %arg7[%c0_3, %c0_4] : memref<6x2048xf32, #tpu.memory_space<vmem>>, vector<1x512xf32>
    %5 = vector.broadcast %4 : vector<1x512xf32> to vector<8x512xf32>
    %6 = arith.addf %3, %5 : vector<8x512xf32>
    %7 = arith.negf %6 : vector<8x512xf32>
    %8 = math.exp %7 : vector<8x512xf32>
    %cst_5 = arith.constant 1.000000e+00 : f32
    %9 = vector.broadcast %cst_5 : f32 to vector<8x512xf32>
    %10 = arith.addf %9, %8 : vector<8x512xf32>
    %11 = arith.divf %9, %10 : vector<8x512xf32>
    %12 = arith.mulf %6, %11 : vector<8x512xf32>
    %13 = arith.truncf %12 : vector<8x512xf32> to vector<8x512xbf16>
    %c0_6 = arith.constant 0 : index
    %c0_7 = arith.constant 0 : index
    %14 = vector.load %arg2[%c0_6, %c0_7] : memref<512x2048xbf16, #tpu.memory_space<vmem>>, vector<512x2048xbf16>
    %cst_8 = arith.constant dense<0.000000e+00> : vector<8x2048xf32>
    %15 = tpu.matmul %13, %14, %cst_8 {dimension_numbers = #tpu.dot_dimension_numbers<[1], [0], [0], [1], [0, 0, 1, 1], [], []>} : vector<8x512xbf16>, vector<512x2048xbf16>, vector<8x2048xf32> -> vector<8x2048xf32>
    %c1 = arith.constant 1 : index
    %c0_9 = arith.constant 0 : index
    %16 = vector.load %arg7[%c1, %c0_9] : memref<6x2048xf32, #tpu.memory_space<vmem>>, vector<1x2048xf32>
    %17 = vector.broadcast %16 : vector<1x2048xf32> to vector<8x2048xf32>
    %18 = arith.addf %15, %17 : vector<8x2048xf32>
    %19 = math.tanh %18 : vector<8x2048xf32>
    %20 = arith.truncf %19 : vector<8x2048xf32> to vector<8x2048xbf16>
    %c0_10 = arith.constant 0 : index
    %c0_11 = arith.constant 0 : index
    %21 = vector.load %arg3[%c0_10, %c0_11] : memref<2048x32xbf16, #tpu.memory_space<vmem>>, vector<2048x32xbf16>
    %cst_12 = arith.constant dense<0.000000e+00> : vector<8x32xf32>
    %22 = tpu.matmul %20, %21, %cst_12 {dimension_numbers = #tpu.dot_dimension_numbers<[1], [0], [0], [1], [0, 0, 1, 1], [], []>} : vector<8x2048xbf16>, vector<2048x32xbf16>, vector<8x32xf32> -> vector<8x32xf32>
    %c2 = arith.constant 2 : index
    %c0_13 = arith.constant 0 : index
    %23 = vector.load %arg7[%c2, %c0_13] : memref<6x2048xf32, #tpu.memory_space<vmem>>, vector<1x32xf32>
    %24 = vector.broadcast %23 : vector<1x32xf32> to vector<8x32xf32>
    %25 = arith.addf %22, %24 : vector<8x32xf32>
    %cst_14 = arith.constant 0.000000e+00 : f32
    %26 = vector.broadcast %cst_14 : f32 to vector<8x32xf32>
    %27 = arith.cmpf ogt, %25, %26 : vector<8x32xf32>
    %cst_15 = arith.constant 0.00999999977 : f32
    %28 = vector.broadcast %cst_15 : f32 to vector<8x32xf32>
    %29 = arith.mulf %28, %25 : vector<8x32xf32>
    %30 = arith.select %27, %25, %29 : vector<8x32xi1>, vector<8x32xf32>
    %31 = arith.truncf %30 : vector<8x32xf32> to vector<8x32xbf16>
    %c0_16 = arith.constant 0 : index
    %c0_17 = arith.constant 0 : index
    %32 = vector.load %arg4[%c0_16, %c0_17] : memref<32x2048xbf16, #tpu.memory_space<vmem>>, vector<32x2048xbf16>
    %cst_18 = arith.constant dense<0.000000e+00> : vector<8x2048xf32>
    %33 = tpu.matmul %31, %32, %cst_18 {dimension_numbers = #tpu.dot_dimension_numbers<[1], [0], [0], [1], [0, 0, 1, 1], [], []>} : vector<8x32xbf16>, vector<32x2048xbf16>, vector<8x2048xf32> -> vector<8x2048xf32>
    %c3 = arith.constant 3 : index
    %c0_19 = arith.constant 0 : index
    %34 = vector.load %arg7[%c3, %c0_19] : memref<6x2048xf32, #tpu.memory_space<vmem>>, vector<1x2048xf32>
    %35 = vector.broadcast %34 : vector<1x2048xf32> to vector<8x2048xf32>
    %36 = arith.addf %33, %35 : vector<8x2048xf32>
    %cst_20 = arith.constant 0.000000e+00 : f32
    %37 = vector.broadcast %cst_20 : f32 to vector<8x2048xf32>
    %38 = arith.cmpf ogt, %36, %37 : vector<8x2048xf32>
    %39 = math.exp %36 : vector<8x2048xf32>
    %cst_21 = arith.constant 1.000000e+00 : f32
    %40 = vector.broadcast %cst_21 : f32 to vector<8x2048xf32>
    %41 = arith.subf %39, %40 : vector<8x2048xf32>
    %42 = arith.select %38, %36, %41 : vector<8x2048xi1>, vector<8x2048xf32>
    %43 = arith.truncf %42 : vector<8x2048xf32> to vector<8x2048xbf16>
    %c0_22 = arith.constant 0 : index
    %c0_23 = arith.constant 0 : index
    %44 = vector.load %arg5[%c0_22, %c0_23] : memref<2048x512xbf16, #tpu.memory_space<vmem>>, vector<2048x512xbf16>
    %cst_24 = arith.constant dense<0.000000e+00> : vector<8x512xf32>
    %45 = tpu.matmul %43, %44, %cst_24 {dimension_numbers = #tpu.dot_dimension_numbers<[1], [0], [0], [1], [0, 0, 1, 1], [], []>} : vector<8x2048xbf16>, vector<2048x512xbf16>, vector<8x512xf32> -> vector<8x512xf32>
    %c4 = arith.constant 4 : index
    %c0_25 = arith.constant 0 : index
    %46 = vector.load %arg7[%c4, %c0_25] : memref<6x2048xf32, #tpu.memory_space<vmem>>, vector<1x512xf32>
    %47 = vector.broadcast %46 : vector<1x512xf32> to vector<8x512xf32>
    %48 = arith.addf %45, %47 : vector<8x512xf32>
    %49 = math.tanh %48 : vector<8x512xf32>
    %50 = arith.truncf %49 : vector<8x512xf32> to vector<8x512xbf16>
    %c0_26 = arith.constant 0 : index
    %c0_27 = arith.constant 0 : index
    %51 = vector.load %arg6[%c0_26, %c0_27] : memref<512x8xbf16, #tpu.memory_space<vmem>>, vector<512x8xbf16>
    %cst_28 = arith.constant dense<0.000000e+00> : vector<8x8xf32>
    %52 = tpu.matmul %50, %51, %cst_28 {dimension_numbers = #tpu.dot_dimension_numbers<[1], [0], [0], [1], [0, 0, 1, 1], [], []>} : vector<8x512xbf16>, vector<512x8xbf16>, vector<8x8xf32> -> vector<8x8xf32>
    %c5 = arith.constant 5 : index
    %c0_29 = arith.constant 0 : index
    %53 = vector.load %arg7[%c5, %c0_29] : memref<6x2048xf32, #tpu.memory_space<vmem>>, vector<1x8xf32>
    %54 = vector.broadcast %53 : vector<1x8xf32> to vector<8x8xf32>
    %55 = arith.addf %52, %54 : vector<8x8xf32>
    %c0_30 = arith.constant 0 : index
    %c0_31 = arith.constant 0 : index
    %56 = vector.load %arg8[%c0_30, %c0_31] : memref<8x8xf32, #tpu.memory_space<vmem>>, vector<8x8xf32>
    tpu.vector_store %arg8[%c0_30, %c0_31], %55 {strides = array<i32>} : memref<8x8xf32, #tpu.memory_space<vmem>>, vector<8x8xf32>,
    return
  }
}

</mosaic_0001>

<bundles_post_ra>
// kernel: generator_forward.1
= control target key start
LH: loop header
LB: loop body
LE: loop exit
PB: predicated region body
PF: predicated region fallthrough
CT: control target
= control target key end

     0   :  { %13 = vsyncpa [#allocation3], 0  ;;  %s13929_s0 = inlined_call_operand.vmem [shape: f32[8,8], index: 0, kind: input, shape index: {}]   ;;  %s13930_s1 = inlined_call_operand.hbm [shape: bf16[8,512], index: 1, kind: input, shape index: {}]   ;;  %s13931_s2 = inlined_call_operand.hbm [shape: bf16[512,2048], index: 2, kind: input, shape index: {}]   ;;  %s13932_s3 = inlined_call_operand.vmem [shape: bf16[2048,32], index: 3, kind: input, shape index: {}]   ;;  %s13933_s4 = inlined_call_operand.hbm [shape: bf16[32,2048], index: 4, kind: input, shape index: {}]   ;;  %s13934_s5 = inlined_call_operand.hbm [shape: bf16[2048,512], index: 5, kind: input, shape index: {}]   ;;  %s13935_s6 = inlined_call_operand.vmem [shape: bf16[512,8], index: 6, kind: input, shape index: {}]   ;;  %s13936_s7 = inlined_call_operand.hbm [shape: f32[6,2048], index: 7, kind: input, shape index: {}]   ;;  %s13937_s8 = inlined_call_operand.vmem [shape: f32[8,8], index: 8, kind: output, shape index: {}]  }
   0x1   :  { %14 = vsyncpa [#allocation5], 0 }
   0x2   :  { %15 = vsyncpa [#allocation8], 0  ;;  %s13000_s27 = smov [#allocation4]   ;;  %s12884_s9 = scalar_lea.hbm %s13931_s2, 65536 }
   0x3   :  { %s33_s28 = sshll.u32 %s13000_s27, 4  ;;  %p12885_p0 = scmp.ne.s32.totalorder %s13931_s2, %s12884_s9  ;;  %s34_s28 = int_to_ptr.vmem [resolvable:$true] %s33_s28 }
   0x4   :  { %p12888_p1 = scmp.lt.u32.totalorder %s12884_s9, %s13931_s2 }
   0x6   :  { %p12890_p2 = pnand %p12888_p1, %p12885_p0 }
   0x8   :  { %12893 = shalt.err (!%p12890_p2)
}
   0x9   :  { %s12894_s14 = scalar_lea.vmem %s34_s28, 65536  ;;  %p12899_p4 = scmp.lt.s32.totalorder %s34_s28, %s34_s28 }
   0xa   :  { %p12895_p3 = scmp.ne.s32.totalorder %s34_s28, %s12894_s14  ;;  %p12900_p5 = scmp.lt.s32.totalorder %s12894_s14, %s12894_s14 }
   0xc   :  { %p12901_p6 = por %p12900_p5, %p12899_p4 }
   0xe   :  { %p12902_p7 = pnand %p12901_p6, %p12895_p3 }
  0x10   :  { %12905 = shalt.err (!%p12902_p7)
}
  0x11   :  { %s13001_s15 = smov 1024   ;;  %s13002_s16 = smov 64  }
  0x12   :  { %39 = dma.hbm_to_vmem [thread:$0]  %s13931_s2, 65536, %s34_s28, [#allocation5], %s13001_s15, %s13001_s15, %s13002_s16  }
  0x13   :  { %s13003_s19 = smov [#allocation7]   ;;  %s12906_s23 = scalar_lea.hbm %s13934_s5, 65536 }
  0x14   :  { %s59_s20 = sshll.u32 %s13003_s19, 4  ;;  %p12907_p8 = scmp.ne.s32.totalorder %s13934_s5, %s12906_s23  ;;  %s60_s20 = int_to_ptr.vmem [resolvable:$true] %s59_s20 }
  0x15   :  { %p12910_p9 = scmp.lt.u32.totalorder %s12906_s23, %s13934_s5 }
  0x17   :  { %p12912_p10 = pnand %p12910_p9, %p12907_p8 }
  0x19   :  { %12915 = shalt.err (!%p12912_p10)
}
  0x1a   :  { %s12916_s29 = scalar_lea.vmem %s60_s20, 65536  ;;  %p12921_p12 = scmp.lt.s32.totalorder %s60_s20, %s60_s20 }
  0x1b   :  { %p12917_p11 = scmp.ne.s32.totalorder %s60_s20, %s12916_s29  ;;  %p12922_p13 = scmp.lt.s32.totalorder %s12916_s29, %s12916_s29 }
  0x1d   :  { %p12923_p0 = por %p12922_p13, %p12921_p12 }
  0x1f   :  { %p12924_p1 = pnand %p12923_p0, %p12917_p11 }
  0x21   :  { %12927 = shalt.err (!%p12924_p1)
}
  0x22   :  { %s13004_s2 = smov 256   ;;  %s13005_s28 = smov 16  }
  0x23   :  { %65 = dma.hbm_to_vmem [thread:$0]  %s13934_s5, 65536, %s60_s20, [#allocation8], %s13004_s2, %s13004_s2, %s13005_s28  }
  0x24   :  { %s13006_s10 = smov [#allocation2]   ;;  %s13007_s12 = smov [#allocation6]  }
  0x25   :  { %s24_s11 = sshll.u32 %s13006_s10, 4  ;;  %s47_s13 = sshll.u32 %s13007_s12, 4  ;;  %s25_s11 = int_to_ptr.vmem [resolvable:$true] %s24_s11  ;;  %s13082_s13 = int_to_ptr.vmem [resolvable:$true] %s47_s13 }
  0x26   :  { %s12928_s18 = scalar_lea.hbm %s13930_s1, 256 }
  0x27   :  { %p12929_p2 = scmp.ne.s32.totalorder %s13930_s1, %s12928_s18  ;;  %p12932_p3 = scmp.lt.u32.totalorder %s12928_s18, %s13930_s1 }
  0x29   :  { %p12934_p4 = pnand %p12932_p3, %p12929_p2 }
  0x2b   :  { %12937 = shalt.err (!%p12934_p4)
}
  0x2c   :  { %s12938_s5 = scalar_lea.vmem %s25_s11, 256  ;;  %p12943_p6 = scmp.lt.s32.totalorder %s25_s11, %s25_s11 }
  0x2d   :  { %p12939_p5 = scmp.ne.s32.totalorder %s25_s11, %s12938_s5  ;;  %p12944_p7 = scmp.lt.s32.totalorder %s12938_s5, %s12938_s5 }
  0x2f   :  { %p12945_p8 = por %p12944_p7, %p12943_p6 }
  0x31   :  { %p12946_p9 = pnand %p12945_p8, %p12939_p5 }
  0x33   :  { %12949 = shalt.err (!%p12946_p9)
}
  0x34   :  { %27 = dma.hbm_to_vmem [thread:$0]  %s13930_s1, 256, %s25_s11, [#allocation3]  }
  0x35   :  { %s12950_s27 = scalar_lea.hbm %s13933_s4, 4096 }
  0x36   :  { %p12951_p10 = scmp.ne.s32.totalorder %s13933_s4, %s12950_s27  ;;  %p12954_p11 = scmp.lt.u32.totalorder %s12950_s27, %s13933_s4 }
  0x38   :  { %p12956_p12 = pnand %p12954_p11, %p12951_p10 }
  0x3a   :  { %12959 = shalt.err (!%p12956_p12)
}
  0x3b   :  { %s12960_s9 = scalar_lea.vmem %s13082_s13, 4096  ;;  %p12965_p0 = scmp.lt.s32.totalorder %s13082_s13, %s13082_s13 }
  0x3c   :  { %p12961_p13 = scmp.ne.s32.totalorder %s13082_s13, %s12960_s9  ;;  %p12966_p1 = scmp.lt.s32.totalorder %s12960_s9, %s12960_s9 }
  0x3e   :  { %p12967_p2 = por %p12966_p1, %p12965_p0 }
  0x40   :  { %p12968_p3 = pnand %p12967_p2, %p12961_p13 }
  0x42   :  { %12971 = shalt.err (!%p12968_p3)
}
  0x43   :  { %53 = dma.hbm_to_vmem [thread:$0]  %s13933_s4, 4096, %s13082_s13, [#allocation5], %s13001_s15, %s13001_s15, %s13002_s16  }
  0x44   :  { %s13008_s11 = smov [#allocation9]   ;;  %s12972_s18 = scalar_lea.hbm %s13936_s7, 2048 }
  0x45   :  { %s74_s12 = sshll.u32 %s13008_s11, 4  ;;  %p12973_p4 = scmp.ne.s32.totalorder %s13936_s7, %s12972_s18  ;;  %s75_s12 = int_to_ptr.vmem [resolvable:$true] %s74_s12 }
  0x46   :  { %p12976_p5 = scmp.lt.u32.totalorder %s12972_s18, %s13936_s7 }
  0x48   :  { %p12978_p6 = pnand %p12976_p5, %p12973_p4 }
  0x4a   :  { %12981 = shalt.err (!%p12978_p6)
}
  0x4b   :  { %s12982_s5 = scalar_lea.vmem %s75_s12, 2048  ;;  %p12987_p8 = scmp.lt.s32.totalorder %s75_s12, %s75_s12 }
  0x4c   :  { %p12983_p7 = scmp.ne.s32.totalorder %s75_s12, %s12982_s5  ;;  %p12988_p9 = scmp.lt.s32.totalorder %s12982_s5, %s12982_s5 }
  0x4e   :  { %p12989_p10 = por %p12988_p9, %p12987_p8 }
  0x50   :  { %p12990_p11 = pnand %p12989_p10, %p12983_p7 }
  0x52   :  { %12993 = shalt.err (!%p12990_p11)
}
  0x53   :  { %77 = dma.hbm_to_vmem [thread:$0]  %s13936_s7, 2048, %s75_s12, [#allocation8]  }
  0x54   :  { %12994 = dma.done.wait [#allocation3], 256  }
  0x55   :  { %12995 = vsyncadd [#allocation3], 4294967040 }
  0x56   :  { %12996 = dma.done.wait [#allocation5], 69632  }
  0x57   :  { %12997 = vsyncadd [#allocation5], 4294897664 }
  0x58   :  { %12998 = dma.done.wait [#allocation8], 67584  }
  0x59   :  { %12999 = vsyncadd [#allocation8], 4294899712  ;;  %v13009_v0 = vmov 0   ;;  %v96_v1 = vld [vmem:[#allocation2] sm:$0xff]  ;;  %vm134_vm0 = vcmask 1043456   ;;  %v97_v3 = vld [vmem:[#allocation2 + $0x8] sm:$0xff] }
  0x5a   :  { %179 = vmatprep.mubr.bf16.mxu0 %v13009_v0  ;;  %220 = vmatprep.mubr.bf16.mxu1 %v13009_v0  ;;  %v94_v2 = vld [vmem:[%s13929_s0] sm:$0xff]  ;;  %v10275_v4 = vcombine.high %v96_v1, %v96_v1  ;;  %v10274_v5 = vcombine.low %v96_v1, %v96_v1  ;;  %v10277_v6 = vcombine.high %v97_v3, %v97_v3  ;;  %v261_v7 = vld [vmem:[#allocation4] sm:$0xff]  ;;  %v262_v9 = vld [vmem:[#allocation4 + $0x8] sm:$0xff]  ;;  %vm130_vm1 = vcmask 64512  }
  0x5b   :  { %v269_v8 = vld [vmem:[#allocation4 + $0x40] sm:$0xff]  ;;  %v10276_v10 = vcombine.low %v97_v3, %v97_v3  ;;  %v270_v12 = vld [vmem:[#allocation4 + $0x48] sm:$0xff]  ;;  %v95_v16 = vpack.c.bf16 %v94_v2, %v94_v2  ;;  %vm5742_vm3 = vcmask 261120  }
  0x5c   :  { %v10287_v11 = vcombine.high %v261_v7, %v269_v8  ;;  %v277_v13 = vld [vmem:[#allocation4 + $0x80] sm:$0xff]  ;;  %10278 = vmatprep.subr.msk.bf16.mxu0 %vm134_vm0, %v10275_v4  ;;  %v136_v15 = vsel %vm134_vm0, %v10274_v5, 0  ;;  %10280 = vmatprep.subr.msk.bf16.mxu1 %vm134_vm0, %v10277_v6  ;;  %v10289_v17 = vcombine.high %v262_v9, %v270_v12  ;;  %v278_v18 = vld [vmem:[#allocation4 + $0x88] sm:$0xff]  ;;  %v10286_v21 = vcombine.low %v261_v7, %v269_v8 }
  0x5d   :  { %v285_v14 = vld [vmem:[#allocation4 + $0xc0] sm:$0xff]  ;;  %v286_v19 = vld [vmem:[#allocation4 + $0xc8] sm:$0xff]  ;;  %148 = vmatpush1.bf16.msra.mxu0 %v136_v15  ;;  %v142_v20 = vsel %vm134_vm0, %v10276_v10, 0  ;;  %v10288_v22 = vcombine.low %v262_v9, %v270_v12 }
  0x5e   :  { %189 = vmatpush1.bf16.msra.mxu1 %v142_v20  ;;  %3423 = vmatprep.subr.bf16.mxu0 %v10287_v11  ;;  %v10303_v23 = vcombine.high %v277_v13, %v285_v14  ;;  %v10305_v24 = vcombine.high %v278_v18, %v286_v19  ;;  %v293_v25 = vld [vmem:[#allocation4 + $0x100] sm:$0xff]  ;;  %v294_v27 = vld [vmem:[#allocation4 + $0x108] sm:$0xff]  ;;  %v10302_v29 = vcombine.low %v277_v13, %v285_v14 }
  0x5f   :  { %3505 = vmatprep.subr.bf16.mxu1 %v10289_v17  ;;  %v301_v26 = vld [vmem:[#allocation4 + $0x140] sm:$0xff]  ;;  %v302_v28 = vld [vmem:[#allocation4 + $0x148] sm:$0xff]  ;;  %v10304_v30 = vcombine.low %v278_v18, %v286_v19 }
  0x60   :  { %10279 = vmatmul.mubr.msk.bf16.vlgmr.msra.gmra.mrb[0].mxu0 %vm130_vm1, %v95_v16  ;;  %v10319_v31 = vcombine.high %v293_v25, %v301_v26  ;;  %v10321_v32 = vcombine.high %v294_v27, %v302_v28  ;;  %v309_v33 = vld [vmem:[#allocation4 + $0x180] sm:$0xff]  ;;  %v310_v35 = vld [vmem:[#allocation4 + $0x188] sm:$0xff]  ;;  %v10318_v37 = vcombine.low %v293_v25, %v301_v26  ;;  %v10320_v40 = vcombine.low %v294_v27, %v302_v28 }
  0x61   :  { %10281 = vmatmul.mubr.msk.bf16.vlgmr.msra.gmra.mrb[0].mxu1 %vm130_vm1, %v95_v16  ;;  %3424 = vmatpush1.bf16.msra.mxu0 %v10286_v21  ;;  %v317_v34 = vld [vmem:[#allocation4 + $0x1c0] sm:$0xff]  ;;  %v318_v36 = vld [vmem:[#allocation4 + $0x1c8] sm:$0xff] }
  0x62   :  { %3506 = vmatpush1.bf16.msra.mxu1 %v10288_v22  ;;  %3425 = vmatprep.subr.bf16.mxu0 %v10303_v23  ;;  %v325_v38 = vld [vmem:[#allocation4 + $0x200] sm:$0xff]  ;;  %v10335_v41 = vcombine.high %v309_v33, %v317_v34  ;;  %v326_v42 = vld [vmem:[#allocation4 + $0x208] sm:$0xff]  ;;  %v10337_v44 = vcombine.high %v310_v35, %v318_v36  ;;  %v10334_v45 = vcombine.low %v309_v33, %v317_v34 }
  0x63   :  { %3507 = vmatprep.subr.bf16.mxu1 %v10305_v24  ;;  %v333_v39 = vld [vmem:[#allocation4 + $0x240] sm:$0xff]  ;;  %v334_v43 = vld [vmem:[#allocation4 + $0x248] sm:$0xff]  ;;  %v10336_v48 = vcombine.low %v310_v35, %v318_v36 }
  0x64   :  { %v341_v46 = vld [vmem:[#allocation4 + $0x280] sm:$0xff]  ;;  %v10351_v49 = vcombine.high %v325_v38, %v333_v39  ;;  %v342_v50 = vld [vmem:[#allocation4 + $0x288] sm:$0xff]  ;;  %v10353_v52 = vcombine.high %v326_v42, %v334_v43  ;;  %v10350_v53 = vcombine.low %v325_v38, %v333_v39  ;;  %v10352_v56 = vcombine.low %v326_v42, %v334_v43 }
  0x65   :  { %3426 = vmatpush1.bf16.msra.mxu0 %v10302_v29  ;;  %v349_v47 = vld [vmem:[#allocation4 + $0x2c0] sm:$0xff]  ;;  %v350_v51 = vld [vmem:[#allocation4 + $0x2c8] sm:$0xff] }
  0x66   :  { %3508 = vmatpush1.bf16.msra.mxu1 %v10304_v30  ;;  %3427 = vmatprep.subr.bf16.mxu0 %v10319_v31  ;;  %v357_v54 = vld [vmem:[#allocation4 + $0x300] sm:$0xff]  ;;  %v10367_v57 = vcombine.high %v341_v46, %v349_v47  ;;  %v358_v58 = vld [vmem:[#allocation4 + $0x308] sm:$0xff]  ;;  %v10369_v60 = vcombine.high %v342_v50, %v350_v51  ;;  %v10366_v61 = vcombine.low %v341_v46, %v349_v47 }
  0x67   :  { %3509 = vmatprep.subr.bf16.mxu1 %v10321_v32  ;;  %v365_v55 = vld [vmem:[#allocation4 + $0x340] sm:$0xff]  ;;  %v366_v59 = vld [vmem:[#allocation4 + $0x348] sm:$0xff]  ;;  %v10368_v1 = vcombine.low %v342_v50, %v350_v51 }
  0x68   :  { %v373_v62 = vld [vmem:[#allocation4 + $0x380] sm:$0xff]  ;;  %v10383_v2 = vcombine.high %v357_v54, %v365_v55  ;;  %v374_v3 = vld [vmem:[#allocation4 + $0x388] sm:$0xff]  ;;  %v10385_v5 = vcombine.high %v358_v58, %v366_v59  ;;  %v10382_v6 = vcombine.low %v357_v54, %v365_v55  ;;  %v10384_v7 = vcombine.low %v358_v58, %v366_v59 }
  0x69   :  { %3428 = vmatpush1.bf16.msra.mxu0 %v10318_v37  ;;  %v381_v63 = vld [vmem:[#allocation4 + $0x3c0] sm:$0xff]  ;;  %v382_v4 = vld [vmem:[#allocation4 + $0x3c8] sm:$0xff] }
  0x6a   :  { %3510 = vmatpush1.bf16.msra.mxu1 %v10320_v40  ;;  %3429 = vmatprep.subr.bf16.mxu0 %v10335_v41  ;;  %v10399_v8 = vcombine.high %v373_v62, %v381_v63  ;;  %v10401_v9 = vcombine.high %v374_v3, %v382_v4  ;;  %v10398_v10 = vcombine.low %v373_v62, %v381_v63  ;;  %v389_v12 = vld [vmem:[#allocation4 + $0x400] sm:$0xff]  ;;  %v390_v14 = vld [vmem:[#allocation4 + $0x408] sm:$0xff] }
  0x6b   :  { %3511 = vmatprep.subr.bf16.mxu1 %v10337_v44  ;;  %v10400_v11 = vcombine.low %v374_v3, %v382_v4  ;;  %v397_v13 = vld [vmem:[#allocation4 + $0x440] sm:$0xff]  ;;  %v398_v16 = vld [vmem:[#allocation4 + $0x448] sm:$0xff] }
  0x6c   :  { %v10415_v15 = vcombine.high %v389_v12, %v397_v13  ;;  %v10414_v17 = vcombine.low %v389_v12, %v397_v13  ;;  %v10416_v18 = vcombine.low %v390_v14, %v398_v16  ;;  %v10417_v19 = vcombine.high %v390_v14, %v398_v16  ;;  %v405_v20 = vld [vmem:[#allocation4 + $0x480] sm:$0xff]  ;;  %v406_v22 = vld [vmem:[#allocation4 + $0x488] sm:$0xff] }
  0x6d   :  { %3430 = vmatpush1.bf16.msra.mxu0 %v10334_v45  ;;  %v413_v21 = vld [vmem:[#allocation4 + $0x4c0] sm:$0xff]  ;;  %v414_v24 = vld [vmem:[#allocation4 + $0x4c8] sm:$0xff] }
  0x6e   :  { %3512 = vmatpush1.bf16.msra.mxu1 %v10336_v48  ;;  %3431 = vmatprep.subr.bf16.mxu0 %v10351_v49  ;;  %v10431_v23 = vcombine.high %v405_v20, %v413_v21  ;;  %v10430_v25 = vcombine.low %v405_v20, %v413_v21  ;;  %v10432_v26 = vcombine.low %v406_v22, %v414_v24  ;;  %v421_v28 = vld [vmem:[#allocation4 + $0x500] sm:$0xff]  ;;  %v422_v30 = vld [vmem:[#allocation4 + $0x508] sm:$0xff]  ;;  %v100_v21 = vlaneseq }
  0x6f   :  { %3513 = vmatprep.subr.bf16.mxu1 %v10353_v52  ;;  %v10433_v27 = vcombine.high %v406_v22, %v414_v24  ;;  %v429_v29 = vld [vmem:[#allocation4 + $0x540] sm:$0xff]  ;;  %v430_v32 = vld [vmem:[#allocation4 + $0x548] sm:$0xff] }
  0x70   :  { %v10447_v31 = vcombine.high %v421_v28, %v429_v29  ;;  %v10446_v33 = vcombine.low %v421_v28, %v429_v29  ;;  %v10448_v34 = vcombine.low %v422_v30, %v430_v32  ;;  %v10449_v35 = vcombine.high %v422_v30, %v430_v32  ;;  %v437_v36 = vld [vmem:[#allocation4 + $0x580] sm:$0xff]  ;;  %v438_v38 = vld [vmem:[#allocation4 + $0x588] sm:$0xff] }
  0x71   :  { %3432 = vmatpush1.bf16.msra.mxu0 %v10350_v53  ;;  %v445_v37 = vld [vmem:[#allocation4 + $0x5c0] sm:$0xff]  ;;  %v446_v40 = vld [vmem:[#allocation4 + $0x5c8] sm:$0xff]  ;;  %v13155_v22 = vshrl.u32 %v100_v21, 7 }
  0x72   :  { %3514 = vmatpush1.bf16.msra.mxu1 %v10352_v56  ;;  %3433 = vmatprep.subr.bf16.mxu0 %v10367_v57  ;;  %v10463_v39 = vcombine.high %v437_v36, %v445_v37  ;;  %v10462_v41 = vcombine.low %v437_v36, %v445_v37  ;;  %v10464_v42 = vcombine.low %v438_v38, %v446_v40  ;;  %v453_v44 = vld [vmem:[#allocation4 + $0x600] sm:$0xff]  ;;  %v454_v46 = vld [vmem:[#allocation4 + $0x608] sm:$0xff] }
  0x73   :  { %3515 = vmatprep.subr.bf16.mxu1 %v10369_v60  ;;  %v10465_v43 = vcombine.high %v438_v38, %v446_v40  ;;  %v461_v45 = vld [vmem:[#allocation4 + $0x640] sm:$0xff]  ;;  %v462_v48 = vld [vmem:[#allocation4 + $0x648] sm:$0xff] }
  0x74   :  { %v10479_v47 = vcombine.high %v453_v44, %v461_v45  ;;  %v10478_v49 = vcombine.low %v453_v44, %v461_v45  ;;  %v10480_v50 = vcombine.low %v454_v46, %v462_v48  ;;  %v10481_v51 = vcombine.high %v454_v46, %v462_v48  ;;  %v469_v52 = vld [vmem:[#allocation4 + $0x680] sm:$0xff]  ;;  %v470_v54 = vld [vmem:[#allocation4 + $0x688] sm:$0xff] }
  0x75   :  { %3434 = vmatpush1.bf16.msra.mxu0 %v10366_v61  ;;  %v477_v53 = vld [vmem:[#allocation4 + $0x6c0] sm:$0xff]  ;;  %v478_v56 = vld [vmem:[#allocation4 + $0x6c8] sm:$0xff] }
  0x76   :  { %3516 = vmatpush1.bf16.msra.mxu1 %v10368_v1  ;;  %3435 = vmatprep.subr.bf16.mxu0 %v10383_v2  ;;  %v10495_v55 = vcombine.high %v469_v52, %v477_v53  ;;  %v10494_v57 = vcombine.low %v469_v52, %v477_v53  ;;  %v10496_v58 = vcombine.low %v470_v54, %v478_v56  ;;  %v485_v60 = vld [vmem:[#allocation4 + $0x700] sm:$0xff]  ;;  %v486_v62 = vld [vmem:[#allocation4 + $0x708] sm:$0xff] }
  0x77   :  { %3517 = vmatprep.subr.bf16.mxu1 %v10385_v5  ;;  %v10497_v59 = vcombine.high %v470_v54, %v478_v56  ;;  %v493_v61 = vld [vmem:[#allocation4 + $0x740] sm:$0xff]  ;;  %v494_v1 = vld [vmem:[#allocation4 + $0x748] sm:$0xff] }
  0x78   :  { %v10511_v63 = vcombine.high %v485_v60, %v493_v61  ;;  %v10510_v2 = vcombine.low %v485_v60, %v493_v61  ;;  %v10512_v3 = vcombine.low %v486_v62, %v494_v1  ;;  %v10513_v4 = vcombine.high %v486_v62, %v494_v1  ;;  %v501_v5 = vld [vmem:[#allocation4 + $0x780] sm:$0xff]  ;;  %v590_v21 = vld [vmem:[#allocation4 + $0xa48] sm:$0xff] }
  0x79   :  { %3436 = vmatpush1.bf16.msra.mxu0 %v10382_v6  ;;  %v509_v6 = vld [vmem:[#allocation4 + $0x7c0] sm:$0xff] }
  0x7a   :  { %3518 = vmatpush1.bf16.msra.mxu1 %v10384_v7  ;;  %3437 = vmatprep.subr.bf16.mxu0 %v10399_v8  ;;  %v502_v7 = vld [vmem:[#allocation4 + $0x788] sm:$0xff]  ;;  %v10527_v8 = vcombine.high %v501_v5, %v509_v6  ;;  %v13139_v13 = vld [vmem:[#allocation4 + $0x800] sm:$0xff] }
  0x7b   :  { %3519 = vmatprep.subr.bf16.mxu1 %v10401_v9  ;;  %v510_v9 = vld [vmem:[#allocation4 + $0x7c8] sm:$0xff]  ;;  %v13141_v14 = vld [vmem:[#allocation4 + $0x840] sm:$0xff] }
  0x7c   :  { %v10529_v12 = vcombine.high %v502_v7, %v510_v9  ;;  %v10543_v16 = vcombine.high %v13139_v13, %v13141_v14  ;;  %v13160_v24 = vld [vmem:[#allocation9] ss:$8 sm:$0xf] }
  0x7d   :  { %3438 = vmatpush1.bf16.msra.mxu0 %v10398_v10  ;;  %v10526_v10 = vcombine.low %v501_v5, %v509_v6  ;;  %v533_v53 = vld [vmem:[#allocation4 + $0x880] sm:$0xff]  ;;  %v558_v5 = vld [vmem:[#allocation4 + $0x948] sm:$0xff] }
  0x7e   :  { %3520 = vmatpush1.bf16.msra.mxu1 %v10400_v11  ;;  %3439 = vmatprep.subr.bf16.mxu0 %v10415_v15  ;;  %v10528_v11 = vcombine.low %v502_v7, %v510_v9  ;;  %v13143_v15 = vld [vmem:[#allocation4 + $0x808] sm:$0xff]  ;;  %v541_v54 = vld [vmem:[#allocation4 + $0x8c0] sm:$0xff] }
  0x7f   :  { %3521 = vmatprep.subr.bf16.mxu1 %v10417_v19  ;;  %v10559_v62 = vcombine.high %v533_v53, %v541_v54  ;;  %v549_v1 = vld [vmem:[#allocation4 + $0x900] sm:$0xff]  ;;  %v10558_v6 = vcombine.low %v533_v53, %v541_v54  ;;  %v638_v53 = vld [vmem:[#allocation4 + $0xbc8] sm:$0xff] }
  0x81   :  { %3440 = vmatpush1.bf16.msra.mxu0 %v10414_v17  ;;  %v13147_v17 = vld [vmem:[#allocation4 + $0x848] sm:$0xff] }
  0x82   :  { %3522 = vmatpush1.bf16.msra.mxu1 %v10416_v18  ;;  %3441 = vmatprep.subr.bf16.mxu0 %v10431_v23  ;;  %v10542_v18 = vcombine.low %v13139_v13, %v13141_v14  ;;  %v10544_v19 = vcombine.low %v13143_v15, %v13147_v17  ;;  %v10545_v20 = vcombine.high %v13143_v15, %v13147_v17  ;;  %v13158_v23 = vsub.s32 0, %v13155_v22  ;;  %v574_v13 = vld [vmem:[#allocation4 + $0x9c8] sm:$0xff] }
  0x83   :  { %3523 = vmatprep.subr.bf16.mxu1 %v10433_v27 }
  0x84   :  { %v103_v27 = vrot.slane %v13160_v24, %v13158_v23 }
  0x85   :  { %3442 = vmatpush1.bf16.msra.mxu0 %v10430_v25  ;;  %v13163_v25 = vsub.s32 1, %v13155_v22 }
  0x86   :  { %3524 = vmatpush1.bf16.msra.mxu1 %v10432_v26  ;;  %3443 = vmatprep.subr.bf16.mxu0 %v10447_v31  ;;  %v13166_v26 = vsub.s32 3, %v13155_v22 }
  0x87   :  { %3525 = vmatprep.subr.bf16.mxu1 %v10449_v35  ;;  %v107_v28 = vrot.slane %v13160_v24, %v13163_v25 }
  0x88   :  { %v115_v29 = vrot.slane %v13160_v24, %v13166_v26 }
  0x89   :  { %3444 = vmatpush1.bf16.msra.mxu0 %v10446_v33 }
  0x8a   :  { %3526 = vmatpush1.bf16.msra.mxu1 %v10448_v34  ;;  %3445 = vmatprep.subr.bf16.mxu0 %v10463_v39 }
  0x8b   :  { %3527 = vmatprep.subr.bf16.mxu1 %v10465_v43 }
  0x8d   :  { %3446 = vmatpush1.bf16.msra.mxu0 %v10462_v41 }
  0x8e   :  { %3528 = vmatpush1.bf16.msra.mxu1 %v10464_v42  ;;  %3447 = vmatprep.subr.bf16.mxu0 %v10479_v47 }
  0x8f   :  { %3529 = vmatprep.subr.bf16.mxu1 %v10481_v51 }
  0x91   :  { %3448 = vmatpush1.bf16.msra.mxu0 %v10478_v49 }
  0x92   :  { %3530 = vmatpush1.bf16.msra.mxu1 %v10480_v50  ;;  %3449 = vmatprep.subr.bf16.mxu0 %v10495_v55  ;;  %v534_v55 = vld [vmem:[#allocation4 + $0x888] sm:$0xff] }
  0x93   :  { %3531 = vmatprep.subr.bf16.mxu1 %v10497_v59 }
  0x95   :  { %3450 = vmatpush1.bf16.msra.mxu0 %v10494_v57  ;;  %v542_v57 = vld [vmem:[#allocation4 + $0x8c8] sm:$0xff] }
  0x96   :  { %3532 = vmatpush1.bf16.msra.mxu1 %v10496_v58  ;;  %3451 = vmatprep.subr.bf16.mxu0 %v10511_v63  ;;  %v10561_v63 = vcombine.high %v534_v55, %v542_v57  ;;  %v10560_v7 = vcombine.low %v534_v55, %v542_v57 }
  0x97   :  { %3533 = vmatprep.subr.bf16.mxu1 %v10513_v4 }
  0x99   :  { %3452 = vmatpush1.bf16.msra.mxu0 %v10510_v2  ;;  %v557_v2 = vld [vmem:[#allocation4 + $0x940] sm:$0xff] }
  0x9a   :  { %3534 = vmatpush1.bf16.msra.mxu1 %v10512_v3  ;;  %3453 = vmatprep.subr.bf16.mxu0 %v10527_v8  ;;  %v550_v3 = vld [vmem:[#allocation4 + $0x908] sm:$0xff]  ;;  %v565_v8 = vld [vmem:[#allocation4 + $0x980] sm:$0xff]  ;;  %v10575_v9 = vcombine.high %v549_v1, %v557_v2  ;;  %v10574_v14 = vcombine.low %v549_v1, %v557_v2 }
  0x9b   :  { %3535 = vmatprep.subr.bf16.mxu1 %v10529_v12  ;;  %v566_v12 = vld [vmem:[#allocation4 + $0x988] sm:$0xff]  ;;  %v10576_v15 = vcombine.low %v550_v3, %v558_v5 }
  0x9c   :  { %v10593_v17 = vcombine.high %v566_v12, %v574_v13 }
  0x9d   :  { %3454 = vmatpush1.bf16.msra.mxu0 %v10526_v10  ;;  %v10577_v10 = vcombine.high %v550_v3, %v558_v5 }
  0x9e   :  { %3536 = vmatpush1.bf16.msra.mxu1 %v10528_v11  ;;  %3464 = vmatprep.subr.bf16.mxu0 %v10543_v16  ;;  %v573_v11 = vld [vmem:[#allocation4 + $0x9c0] sm:$0xff] }
  0x9f   :  { %3546 = vmatprep.subr.bf16.mxu1 %v10545_v20  ;;  %v10591_v16 = vcombine.high %v565_v8, %v573_v11  ;;  %v582_v20 = vld [vmem:[#allocation4 + $0xa08] sm:$0xff] }
 0x133   :  { %v181_v30 = vpop.f32.mrb[0].mxu0 }
 0x134   :  { %v182_v31 = vadd.f32 %v181_v30, %v103_v27  ;;  %v183_v32 = vpop.f32.mrb[1].mxu0  ;;  %v13174_v33 = vpop.f32.mrb[0].mxu1  ;;  %v10590_v27 = vcombine.low %v565_v8, %v573_v11  ;;  %v10609_v30 = vcombine.high %v582_v20, %v590_v21  ;;  %v662_v8 = vld [vmem:[#allocation4 + $0xc88] sm:$0xff] }
 0x135   :  { %v184_v34 = vadd.f32 %v183_v32, %v107_v28  ;;  %v185_v35 = vpop.f32.mrb[2].mxu0  ;;  %v224_v36 = vpop.f32.mrb[1].mxu1  ;;  %v10592_v28 = vcombine.low %v566_v12, %v574_v13  ;;  %v605_v32 = vld [vmem:[#allocation4 + $0xac0] sm:$0xff] }
 0x136   :  { %v10282_v37 = vmul.f32 -1.442695, %v182_v31  ;;  %v186_v38 = vpop.f32.mrb[3].mxu0  ;;  %v225_v39 = vadd.f32 %v224_v36, %v115_v29  ;;  %v226_v40 = vpop.f32.mrb[2].mxu1  ;;  %v606_v35 = vld [vmem:[#allocation4 + $0xac8] sm:$0xff]  ;;  %v13189_v36 = vsub.s32 2, %v13155_v22 }
 0x137   :  { %v10283_v41 = vmul.f32 -1.442695, %v184_v34  ;;  %v227_v42 = vpop.f32.mrb[3].mxu1  ;;  %v10608_v38 = vcombine.low %v582_v20, %v590_v21 }
 0x138   :  { %12796 = vpow2.f32 %v10282_v37  ;;  %v10285_v43 = vmul.f32 -1.442695, %v225_v39  ;;  %v621_v42 = vld [vmem:[#allocation4 + $0xb40] sm:$0xff] }
 0x139   :  { %12798 = vpow2.f32 %v10283_v41  ;;  %v613_v41 = vld [vmem:[#allocation4 + $0xb00] sm:$0xff] }
 0x13a   :  { %12800 = vpow2.f32 %v10285_v43  ;;  %v614_v43 = vld [vmem:[#allocation4 + $0xb08] sm:$0xff]  ;;  %v10638_v55 = vcombine.low %v613_v41, %v621_v42 }
 0x142   :  { %v12797_v44 = vpop.eup %12796 }
 0x143   :  { %v12799_v45 = vpop.eup %12798  ;;  %v241_v46 = vadd.f32 1.0, %v12797_v44  ;;  %v622_v44 = vld [vmem:[#allocation4 + $0xb48] sm:$0xff] }
 0x144   :  { %v242_v47 = vadd.f32 1.0, %v12799_v45  ;;  %v12801_v48 = vpop.eup %12800  ;;  %v111_v45 = vrot.slane %v13160_v24, %v13189_v36 }
 0x145   :  { %12802 = vrcp.f32 %v241_v46  ;;  %v244_v49 = vadd.f32 1.0, %v12801_v48  ;;  %v10639_v48 = vcombine.high %v613_v41, %v621_v42  ;;  %v718_v41 = vld [vmem:[#allocation4 + $0xe48] sm:$0xff] }
 0x146   :  { %12804 = vrcp.f32 %v242_v47  ;;  %v13194_v54 = vadd.f32 %v13174_v33, %v111_v45 }
 0x147   :  { %12806 = vrcp.f32 %v244_v49  ;;  %v10641_v49 = vcombine.high %v614_v43, %v622_v44 }
 0x148   :  { %v10284_v1 = vmul.f32 -1.442695, %v13194_v54 }
 0x14a   :  { %12808 = vpow2.f32 %v10284_v1 }
 0x14f   :  { %v12803_v50 = vpop.eup %12802 }
 0x150   :  { %v12805_v51 = vpop.eup %12804  ;;  %v253_v52 = vmul.f32 %v12803_v50, %v182_v31  ;;  %v597_v31 = vld [vmem:[#allocation4 + $0xa80] sm:$0xff] }
 0x151   :  { %v254_v56 = vmul.f32 %v12805_v51, %v184_v34  ;;  %v12807_v58 = vpop.eup %12806  ;;  %v598_v34 = vld [vmem:[#allocation4 + $0xa88] sm:$0xff]  ;;  %v10622_v46 = vcombine.low %v597_v31, %v605_v32  ;;  %v629_v50 = vld [vmem:[#allocation4 + $0xb80] sm:$0xff] }
 0x152   :  { %v256_v60 = vmul.f32 %v12807_v58, %v225_v39  ;;  %v13178_v61 = vpack.c.bf16 %v253_v52, %v253_v52  ;;  %v10623_v39 = vcombine.high %v597_v31, %v605_v32  ;;  %v10625_v40 = vcombine.high %v598_v34, %v606_v35  ;;  %v637_v51 = vld [vmem:[#allocation4 + $0xbc0] sm:$0xff]  ;;  %v630_v52 = vld [vmem:[#allocation4 + $0xb88] sm:$0xff] }
 0x153   :  { %v13176_v59 = vpack.c.bf16 %v254_v56, %v254_v56  ;;  %v10624_v47 = vcombine.low %v598_v34, %v606_v35  ;;  %v10640_v56 = vcombine.low %v614_v43, %v622_v44  ;;  %v10655_v24 = vcombine.high %v629_v50, %v637_v51  ;;  %v645_v58 = vld [vmem:[#allocation4 + $0xc00] sm:$0xff] }
 0x154   :  { %v13182_v4 = vpack.c.bf16 %v256_v60, %v256_v60  ;;  %v10657_v57 = vcombine.high %v630_v52, %v638_v53  ;;  %v653_v60 = vld [vmem:[#allocation4 + $0xc40] sm:$0xff]  ;;  %v10654_v2 = vcombine.low %v629_v50, %v637_v51  ;;  %v10656_v3 = vcombine.low %v630_v52, %v638_v53  ;;  %v12809_v34 = vpop.eup %12808  ;;  %v734_v50 = vld [vmem:[#allocation4 + $0xec8] sm:$0xff] }
 0x155   :  { %3455 = vmatprep.mubr.bf16.mxu0 %v13176_v59  ;;  %3537 = vmatprep.mubr.bf16.mxu1 %v13176_v59  ;;  %v10671_v33 = vcombine.high %v645_v58, %v653_v60  ;;  %v243_v42 = vadd.f32 1.0, %v12809_v34 }
 0x156   :  { %3456 = vmatmul.mubr.bf16.vlgmr.msra.gmra.mrb[4].mxu0 %v13178_v61  ;;  %3538 = vmatmul.mubr.bf16.vlgmr.msra.gmra.mrb[4].mxu1 %v13178_v61 }
 0x157   :  { %3465 = vmatpush1.bf16.msra.mxu0 %v10542_v18  ;;  %3547 = vmatpush1.bf16.msra.mxu1 %v10544_v19  ;;  %v581_v18 = vld [vmem:[#allocation4 + $0xa00] sm:$0xff]  ;;  %12810 = vrcp.f32 %v243_v42 }
 0x158   :  { %3466 = vmatprep.subr.bf16.mxu0 %v10559_v62  ;;  %3548 = vmatprep.subr.bf16.mxu1 %v10561_v63  ;;  %v589_v19 = vld [vmem:[#allocation4 + $0xa40] sm:$0xff]  ;;  %v646_v62 = vld [vmem:[#allocation4 + $0xc08] sm:$0xff] }
 0x159   :  { %3496 = vmatprep.mubr.bf16.mxu0 %v13182_v4  ;;  %3578 = vmatprep.mubr.bf16.mxu1 %v13182_v4  ;;  %v10607_v29 = vcombine.high %v581_v18, %v589_v19  ;;  %v10606_v37 = vcombine.low %v581_v18, %v589_v19  ;;  %v654_v63 = vld [vmem:[#allocation4 + $0xc48] sm:$0xff] }
 0x15a   :  { %v10673_v5 = vcombine.high %v646_v62, %v654_v63  ;;  %v10672_v11 = vcombine.low %v646_v62, %v654_v63 }
 0x15b   :  { %3467 = vmatpush1.bf16.msra.mxu0 %v10558_v6  ;;  %3549 = vmatpush1.bf16.msra.mxu1 %v10560_v7  ;;  %v661_v6 = vld [vmem:[#allocation4 + $0xc80] sm:$0xff] }
 0x15c   :  { %3468 = vmatprep.subr.bf16.mxu0 %v10575_v9  ;;  %3550 = vmatprep.subr.bf16.mxu1 %v10577_v10  ;;  %v669_v7 = vld [vmem:[#allocation4 + $0xcc0] sm:$0xff]  ;;  %v670_v9 = vld [vmem:[#allocation4 + $0xcc8] sm:$0xff]  ;;  %v10670_v10 = vcombine.low %v645_v58, %v653_v60 }
 0x15d   :  { %v10687_v12 = vcombine.high %v661_v6, %v669_v7  ;;  %v10689_v13 = vcombine.high %v662_v8, %v670_v9  ;;  %v10686_v18 = vcombine.low %v661_v6, %v669_v7  ;;  %v10688_v19 = vcombine.low %v662_v8, %v670_v9  ;;  %v750_v58 = vld [vmem:[#allocation4 + $0xf48] sm:$0xff] }
 0x15f   :  { %3469 = vmatpush1.bf16.msra.mxu0 %v10574_v14  ;;  %3551 = vmatpush1.bf16.msra.mxu1 %v10576_v15  ;;  %v677_v14 = vld [vmem:[#allocation4 + $0xd00] sm:$0xff] }
 0x160   :  { %3470 = vmatprep.subr.bf16.mxu0 %v10591_v16  ;;  %3552 = vmatprep.subr.bf16.mxu1 %v10593_v17  ;;  %v685_v15 = vld [vmem:[#allocation4 + $0xd40] sm:$0xff]  ;;  %v678_v16 = vld [vmem:[#allocation4 + $0xd08] sm:$0xff] }
 0x161   :  { %v686_v17 = vld [vmem:[#allocation4 + $0xd48] sm:$0xff]  ;;  %v10703_v20 = vcombine.high %v677_v14, %v685_v15  ;;  %v10702_v31 = vcombine.low %v677_v14, %v685_v15  ;;  %v272_v14 = vld [vmem:[#allocation4 + $0x58] sm:$0xff] }
 0x162   :  { %v10705_v21 = vcombine.high %v678_v16, %v686_v17  ;;  %v10704_v32 = vcombine.low %v678_v16, %v686_v17 }
 0x163   :  { %3471 = vmatpush1.bf16.msra.mxu0 %v10590_v27  ;;  %3553 = vmatpush1.bf16.msra.mxu1 %v10592_v28  ;;  %v693_v27 = vld [vmem:[#allocation4 + $0xd80] sm:$0xff] }
 0x164   :  { %3472 = vmatprep.subr.bf16.mxu0 %v10607_v29  ;;  %3554 = vmatprep.subr.bf16.mxu1 %v10609_v30  ;;  %v701_v28 = vld [vmem:[#allocation4 + $0xdc0] sm:$0xff]  ;;  %v694_v29 = vld [vmem:[#allocation4 + $0xd88] sm:$0xff] }
 0x165   :  { %v702_v30 = vld [vmem:[#allocation4 + $0xdc8] sm:$0xff]  ;;  %v10719_v35 = vcombine.high %v693_v27, %v701_v28  ;;  %v10718_v43 = vcombine.low %v693_v27, %v701_v28  ;;  %v280_v27 = vld [vmem:[#allocation4 + $0x98] sm:$0xff] }
 0x166   :  { %v10720_v44 = vcombine.low %v694_v29, %v702_v30  ;;  %v288_v28 = vld [vmem:[#allocation4 + $0xd8] sm:$0xff] }
 0x167   :  { %3473 = vmatpush1.bf16.msra.mxu0 %v10606_v37  ;;  %3555 = vmatpush1.bf16.msra.mxu1 %v10608_v38  ;;  %v10721_v37 = vcombine.high %v694_v29, %v702_v30  ;;  %v709_v38 = vld [vmem:[#allocation4 + $0xe00] sm:$0xff]  ;;  %v10309_v34 = vcombine.high %v280_v27, %v288_v28 }
 0x168   :  { %3474 = vmatprep.subr.bf16.mxu0 %v10623_v39  ;;  %3556 = vmatprep.subr.bf16.mxu1 %v10625_v40  ;;  %v717_v39 = vld [vmem:[#allocation4 + $0xe40] sm:$0xff]  ;;  %v710_v40 = vld [vmem:[#allocation4 + $0xe08] sm:$0xff] }
 0x169   :  { %v10735_v45 = vcombine.high %v709_v38, %v717_v39  ;;  %v10734_v51 = vcombine.low %v709_v38, %v717_v39  ;;  %v10736_v52 = vcombine.low %v710_v40, %v718_v41  ;;  %v304_v38 = vld [vmem:[#allocation4 + $0x158] sm:$0xff] }
 0x16b   :  { %3475 = vmatpush1.bf16.msra.mxu0 %v10622_v46  ;;  %3557 = vmatpush1.bf16.msra.mxu1 %v10624_v47  ;;  %v10737_v46 = vcombine.high %v710_v40, %v718_v41  ;;  %v725_v47 = vld [vmem:[#allocation4 + $0xe80] sm:$0xff]  ;;  %v10308_v40 = vcombine.low %v280_v27, %v288_v28  ;;  %v399_v27 = vld [vmem:[#allocation4 + $0x450] sm:$0xff]  ;;  %v392_v28 = vld [vmem:[#allocation4 + $0x418] sm:$0xff] }
 0x16c   :  { %3476 = vmatprep.subr.bf16.mxu0 %v10639_v48  ;;  %3558 = vmatprep.subr.bf16.mxu1 %v10641_v49  ;;  %v733_v48 = vld [vmem:[#allocation4 + $0xec0] sm:$0xff]  ;;  %v726_v49 = vld [vmem:[#allocation4 + $0xe88] sm:$0xff] }
 0x16d   :  { %v10751_v53 = vcombine.high %v725_v47, %v733_v48  ;;  %v10750_v60 = vcombine.low %v725_v47, %v733_v48  ;;  %v10752_v62 = vcombine.low %v726_v49, %v734_v50 }
 0x16f   :  { %3477 = vmatpush1.bf16.msra.mxu0 %v10638_v55  ;;  %3559 = vmatpush1.bf16.msra.mxu1 %v10640_v56  ;;  %v10753_v55 = vcombine.high %v726_v49, %v734_v50  ;;  %v741_v56 = vld [vmem:[#allocation4 + $0xf00] sm:$0xff]  ;;  %v327_v50 = vld [vmem:[#allocation4 + $0x210] sm:$0xff] }
 0x170   :  { %3478 = vmatprep.subr.bf16.mxu0 %v10655_v24  ;;  %3560 = vmatprep.subr.bf16.mxu1 %v10657_v57  ;;  %v749_v24 = vld [vmem:[#allocation4 + $0xf40] sm:$0xff]  ;;  %v742_v57 = vld [vmem:[#allocation4 + $0xf08] sm:$0xff] }
 0x171   :  { %v10767_v63 = vcombine.high %v741_v56, %v749_v24  ;;  %v10769_v1 = vcombine.high %v742_v57, %v750_v58  ;;  %v10766_v6 = vcombine.low %v741_v56, %v749_v24  ;;  %v10768_v7 = vcombine.low %v742_v57, %v750_v58  ;;  %v343_v58 = vld [vmem:[#allocation4 + $0x290] sm:$0xff] }
 0x173   :  { %3479 = vmatpush1.bf16.msra.mxu0 %v10654_v2  ;;  %3561 = vmatpush1.bf16.msra.mxu1 %v10656_v3  ;;  %v757_v2 = vld [vmem:[#allocation4 + $0xf80] sm:$0xff] }
 0x174   :  { %3480 = vmatprep.subr.bf16.mxu0 %v10671_v33  ;;  %3562 = vmatprep.subr.bf16.mxu1 %v10673_v5  ;;  %v765_v3 = vld [vmem:[#allocation4 + $0xfc0] sm:$0xff]  ;;  %v758_v33 = vld [vmem:[#allocation4 + $0xf88] sm:$0xff] }
 0x175   :  { %v766_v5 = vld [vmem:[#allocation4 + $0xfc8] sm:$0xff]  ;;  %v10783_v8 = vcombine.high %v757_v2, %v765_v3  ;;  %v10782_v15 = vcombine.low %v757_v2, %v765_v3 }
 0x176   :  { %v10785_v9 = vcombine.high %v758_v33, %v766_v5  ;;  %v10784_v16 = vcombine.low %v758_v33, %v766_v5  ;;  %v359_v5 = vld [vmem:[#allocation4 + $0x310] sm:$0xff] }
 0x177   :  { %3481 = vmatpush1.bf16.msra.mxu0 %v10670_v10  ;;  %3563 = vmatpush1.bf16.msra.mxu1 %v10672_v11  ;;  %v263_v10 = vld [vmem:[#allocation4 + $0x10] sm:$0xff] }
 0x178   :  { %3482 = vmatprep.subr.bf16.mxu0 %v10687_v12  ;;  %3564 = vmatprep.subr.bf16.mxu1 %v10689_v13  ;;  %v271_v11 = vld [vmem:[#allocation4 + $0x50] sm:$0xff]  ;;  %v264_v12 = vld [vmem:[#allocation4 + $0x18] sm:$0xff]  ;;  %v12811_v13 = vpop.eup %12810 }
 0x179   :  { %v255_v17 = vmul.f32 %v12811_v13, %v13194_v54  ;;  %v10290_v29 = vcombine.low %v263_v10, %v271_v11  ;;  %v303_v54 = vld [vmem:[#allocation4 + $0x150] sm:$0xff] }
 0x17a   :  { %v375_v13 = vld [vmem:[#allocation4 + $0x390] sm:$0xff] }
 0x17b   :  { %3483 = vmatpush1.bf16.msra.mxu0 %v10686_v18  ;;  %3565 = vmatpush1.bf16.msra.mxu1 %v10688_v19  ;;  %v10291_v18 = vcombine.high %v263_v10, %v271_v11  ;;  %v10293_v19 = vcombine.high %v264_v12, %v272_v14  ;;  %v13198_v30 = vpack.c.bf16 %v255_v17, %v255_v17  ;;  %v384_v17 = vld [vmem:[#allocation4 + $0x3d8] sm:$0xff] }
 0x17c   :  { %3484 = vmatprep.subr.bf16.mxu0 %v10703_v20  ;;  %3566 = vmatprep.subr.bf16.mxu1 %v10705_v21  ;;  %v279_v20 = vld [vmem:[#allocation4 + $0x90] sm:$0xff] }
 0x17d   :  { %v287_v21 = vld [vmem:[#allocation4 + $0xd0] sm:$0xff] }
 0x17e   :  { %v10306_v39 = vcombine.low %v279_v20, %v287_v21 }
 0x17f   :  { %3485 = vmatpush1.bf16.msra.mxu0 %v10702_v31  ;;  %3567 = vmatpush1.bf16.msra.mxu1 %v10704_v32  ;;  %v10292_v31 = vcombine.low %v264_v12, %v272_v14  ;;  %v10307_v32 = vcombine.high %v279_v20, %v287_v21  ;;  %v383_v14 = vld [vmem:[#allocation4 + $0x3d0] sm:$0xff] }
 0x180   :  { %3486 = vmatprep.subr.bf16.mxu0 %v10719_v35  ;;  %3568 = vmatprep.subr.bf16.mxu1 %v10721_v37  ;;  %v295_v35 = vld [vmem:[#allocation4 + $0x110] sm:$0xff]  ;;  %v296_v37 = vld [vmem:[#allocation4 + $0x118] sm:$0xff]  ;;  %v10403_v20 = vcombine.high %v375_v13, %v383_v14 }
 0x181   :  { %v10323_v41 = vcombine.high %v295_v35, %v303_v54  ;;  %v10325_v42 = vcombine.high %v296_v37, %v304_v38  ;;  %v10322_v47 = vcombine.low %v295_v35, %v303_v54  ;;  %v10324_v48 = vcombine.low %v296_v37, %v304_v38  ;;  %v391_v21 = vld [vmem:[#allocation4 + $0x410] sm:$0xff]  ;;  %v408_v38 = vld [vmem:[#allocation4 + $0x498] sm:$0xff] }
 0x182   :  { %v10419_v35 = vcombine.high %v391_v21, %v399_v27  ;;  %v407_v54 = vld [vmem:[#allocation4 + $0x490] sm:$0xff] }
 0x183   :  { %3487 = vmatpush1.bf16.msra.mxu0 %v10718_v43  ;;  %3569 = vmatpush1.bf16.msra.mxu1 %v10720_v44  ;;  %v311_v43 = vld [vmem:[#allocation4 + $0x190] sm:$0xff] }
 0x184   :  { %3488 = vmatprep.subr.bf16.mxu0 %v10735_v45  ;;  %3570 = vmatprep.subr.bf16.mxu1 %v10737_v46  ;;  %v319_v44 = vld [vmem:[#allocation4 + $0x1d0] sm:$0xff]  ;;  %v312_v45 = vld [vmem:[#allocation4 + $0x198] sm:$0xff] }
 0x185   :  { %v320_v46 = vld [vmem:[#allocation4 + $0x1d8] sm:$0xff]  ;;  %v10339_v49 = vcombine.high %v311_v43, %v319_v44  ;;  %v10338_v56 = vcombine.low %v311_v43, %v319_v44  ;;  %v415_v37 = vld [vmem:[#allocation4 + $0x4d0] sm:$0xff] }
 0x186   :  { %v10340_v24 = vcombine.low %v312_v45, %v320_v46  ;;  %v10435_v43 = vcombine.high %v407_v54, %v415_v37  ;;  %v423_v44 = vld [vmem:[#allocation4 + $0x510] sm:$0xff] }
 0x187   :  { %3489 = vmatpush1.bf16.msra.mxu0 %v10734_v51  ;;  %3571 = vmatpush1.bf16.msra.mxu1 %v10736_v52  ;;  %v335_v51 = vld [vmem:[#allocation4 + $0x250] sm:$0xff]  ;;  %v328_v52 = vld [vmem:[#allocation4 + $0x218] sm:$0xff] }
 0x188   :  { %3490 = vmatprep.subr.bf16.mxu0 %v10751_v53  ;;  %3572 = vmatprep.subr.bf16.mxu1 %v10753_v55  ;;  %v10341_v53 = vcombine.high %v312_v45, %v320_v46  ;;  %v336_v55 = vld [vmem:[#allocation4 + $0x258] sm:$0xff]  ;;  %v10355_v57 = vcombine.high %v327_v50, %v335_v51  ;;  %v10354_v2 = vcombine.low %v327_v50, %v335_v51  ;;  %v431_v45 = vld [vmem:[#allocation4 + $0x550] sm:$0xff] }
 0x189   :  { %v10356_v3 = vcombine.low %v328_v52, %v336_v55  ;;  %v424_v46 = vld [vmem:[#allocation4 + $0x518] sm:$0xff]  ;;  %v10451_v51 = vcombine.high %v423_v44, %v431_v45 }
 0x18b   :  { %3491 = vmatpush1.bf16.msra.mxu0 %v10750_v60  ;;  %3573 = vmatpush1.bf16.msra.mxu1 %v10752_v62  ;;  %v351_v60 = vld [vmem:[#allocation4 + $0x2d0] sm:$0xff]  ;;  %v344_v62 = vld [vmem:[#allocation4 + $0x298] sm:$0xff] }
 0x18c   :  { %3492 = vmatprep.subr.bf16.mxu0 %v10767_v63  ;;  %3574 = vmatprep.subr.bf16.mxu1 %v10769_v1  ;;  %v10357_v63 = vcombine.high %v328_v52, %v336_v55  ;;  %v352_v1 = vld [vmem:[#allocation4 + $0x2d8] sm:$0xff]  ;;  %v10371_v33 = vcombine.high %v343_v58, %v351_v60  ;;  %v10370_v10 = vcombine.low %v343_v58, %v351_v60  ;;  %v439_v52 = vld [vmem:[#allocation4 + $0x590] sm:$0xff] }
 0x18d   :  { %v10372_v11 = vcombine.low %v344_v62, %v352_v1  ;;  %v440_v55 = vld [vmem:[#allocation4 + $0x598] sm:$0xff] }
 0x18f   :  { %3493 = vmatpush1.bf16.msra.mxu0 %v10766_v6  ;;  %3575 = vmatpush1.bf16.msra.mxu1 %v10768_v7  ;;  %v367_v6 = vld [vmem:[#allocation4 + $0x350] sm:$0xff]  ;;  %v360_v7 = vld [vmem:[#allocation4 + $0x318] sm:$0xff] }
 0x190   :  { %3494 = vmatprep.subr.bf16.mxu0 %v10783_v8  ;;  %3576 = vmatprep.subr.bf16.mxu1 %v10785_v9  ;;  %v10373_v8 = vcombine.high %v344_v62, %v352_v1  ;;  %v368_v9 = vld [vmem:[#allocation4 + $0x358] sm:$0xff]  ;;  %v10387_v12 = vcombine.high %v359_v5, %v367_v6  ;;  %v455_v62 = vld [vmem:[#allocation4 + $0x610] sm:$0xff] }
 0x191   :  { %v456_v1 = vld [vmem:[#allocation4 + $0x618] sm:$0xff] }
 0x193   :  { %3495 = vmatpush1.bf16.msra.mxu0 %v10782_v15  ;;  %3577 = vmatpush1.bf16.msra.mxu1 %v10784_v16  ;;  %v376_v15 = vld [vmem:[#allocation4 + $0x398] sm:$0xff]  ;;  %v10389_v16 = vcombine.high %v360_v7, %v368_v9 }
 0x194   :  { %3587 = vmatprep.subr.bf16.mxu0 %v10291_v18  ;;  %3669 = vmatprep.subr.bf16.mxu1 %v10293_v19  ;;  %v10386_v18 = vcombine.low %v359_v5, %v367_v6  ;;  %v10388_v19 = vcombine.low %v360_v7, %v368_v9  ;;  %v471_v7 = vld [vmem:[#allocation4 + $0x690] sm:$0xff]  ;;  %v472_v9 = vld [vmem:[#allocation4 + $0x698] sm:$0xff] }
 0x196   :  { %3497 = vmatmul.mubr.bf16.vlgmr.msra.gmra.mrb[4].mxu0 %v13198_v30  ;;  %3579 = vmatmul.mubr.bf16.vlgmr.msra.gmra.mrb[4].mxu1 %v13198_v30 }
 0x197   :  { %3588 = vmatpush1.bf16.msra.mxu0 %v10290_v29  ;;  %3619 = vmatprep.mubr.bf16.mxu0 %v13176_v59  ;;  %v10405_v29 = vcombine.high %v376_v15, %v384_v17 }
 0x198   :  { %3670 = vmatpush1.bf16.msra.mxu1 %v10292_v31  ;;  %3701 = vmatprep.mubr.bf16.mxu1 %v13176_v59  ;;  %v400_v31 = vld [vmem:[#allocation4 + $0x458] sm:$0xff] }
 0x199   :  { %3589 = vmatprep.subr.bf16.mxu0 %v10307_v32  ;;  %3671 = vmatprep.subr.bf16.mxu1 %v10309_v34  ;;  %v10402_v32 = vcombine.low %v375_v13, %v383_v14  ;;  %v10404_v34 = vcombine.low %v376_v15, %v384_v17  ;;  %v487_v15 = vld [vmem:[#allocation4 + $0x710] sm:$0xff]  ;;  %v488_v17 = vld [vmem:[#allocation4 + $0x718] sm:$0xff] }
 0x19b   :  { %3590 = vmatpush1.bf16.msra.mxu0 %v10306_v39  ;;  %v10421_v39 = vcombine.high %v392_v28, %v400_v31 }
 0x19c   :  { %3672 = vmatpush1.bf16.msra.mxu1 %v10308_v40  ;;  %3591 = vmatprep.subr.bf16.mxu0 %v10323_v41  ;;  %v416_v40 = vld [vmem:[#allocation4 + $0x4d8] sm:$0xff]  ;;  %v10418_v41 = vcombine.low %v391_v21, %v399_v27 }
 0x19d   :  { %3673 = vmatprep.subr.bf16.mxu1 %v10325_v42  ;;  %v10420_v42 = vcombine.low %v392_v28, %v400_v31  ;;  %v10436_v50 = vcombine.low %v408_v38, %v416_v40  ;;  %v503_v28 = vld [vmem:[#allocation4 + $0x790] sm:$0xff]  ;;  %v504_v31 = vld [vmem:[#allocation4 + $0x798] sm:$0xff] }
 0x19f   :  { %3592 = vmatpush1.bf16.msra.mxu0 %v10322_v47  ;;  %v10437_v47 = vcombine.high %v408_v38, %v416_v40  ;;  %v519_v38 = vld [vmem:[#allocation4 + $0x810] sm:$0xff]  ;;  %v520_v40 = vld [vmem:[#allocation4 + $0x818] sm:$0xff] }
 0x1a0   :  { %3674 = vmatpush1.bf16.msra.mxu1 %v10324_v48  ;;  %3593 = vmatprep.subr.bf16.mxu0 %v10339_v49  ;;  %v432_v48 = vld [vmem:[#allocation4 + $0x558] sm:$0xff]  ;;  %v10434_v49 = vcombine.low %v407_v54, %v415_v37 }
 0x1a1   :  { %3675 = vmatprep.subr.bf16.mxu1 %v10341_v53  ;;  %v447_v53 = vld [vmem:[#allocation4 + $0x5d0] sm:$0xff]  ;;  %v10452_v58 = vcombine.low %v424_v46, %v432_v48 }
 0x1a2   :  { %v10467_v60 = vcombine.high %v439_v52, %v447_v53 }
 0x1a3   :  { %3594 = vmatpush1.bf16.msra.mxu0 %v10338_v56  ;;  %v10453_v56 = vcombine.high %v424_v46, %v432_v48  ;;  %v535_v46 = vld [vmem:[#allocation4 + $0x890] sm:$0xff] }
 0x1a4   :  { %3676 = vmatpush1.bf16.msra.mxu1 %v10340_v24  ;;  %3595 = vmatprep.subr.bf16.mxu0 %v10355_v57  ;;  %v448_v24 = vld [vmem:[#allocation4 + $0x5d8] sm:$0xff]  ;;  %v10450_v57 = vcombine.low %v423_v44, %v431_v45 }
 0x1a5   :  { %3677 = vmatprep.subr.bf16.mxu1 %v10357_v63  ;;  %v463_v63 = vld [vmem:[#allocation4 + $0x650] sm:$0xff]  ;;  %v10468_v5 = vcombine.low %v440_v55, %v448_v24 }
 0x1a6   :  { %v10483_v6 = vcombine.high %v455_v62, %v463_v63 }
 0x1a7   :  { %3596 = vmatpush1.bf16.msra.mxu0 %v10354_v2  ;;  %v10469_v2 = vcombine.high %v440_v55, %v448_v24  ;;  %v551_v55 = vld [vmem:[#allocation4 + $0x910] sm:$0xff]  ;;  %v552_v24 = vld [vmem:[#allocation4 + $0x918] sm:$0xff] }
 0x1a8   :  { %3678 = vmatpush1.bf16.msra.mxu1 %v10356_v3  ;;  %3597 = vmatprep.subr.bf16.mxu0 %v10371_v33  ;;  %v464_v3 = vld [vmem:[#allocation4 + $0x658] sm:$0xff]  ;;  %v10466_v33 = vcombine.low %v439_v52, %v447_v53 }
 0x1a9   :  { %3679 = vmatprep.subr.bf16.mxu1 %v10373_v8  ;;  %v479_v8 = vld [vmem:[#allocation4 + $0x6d0] sm:$0xff]  ;;  %v10484_v13 = vcombine.low %v456_v1, %v464_v3 }
 0x1aa   :  { %v10499_v14 = vcombine.high %v471_v7, %v479_v8 }
 0x1ab   :  { %3598 = vmatpush1.bf16.msra.mxu0 %v10370_v10  ;;  %v10485_v10 = vcombine.high %v456_v1, %v464_v3  ;;  %v575_v3 = vld [vmem:[#allocation4 + $0x9d0] sm:$0xff] }
 0x1ac   :  { %3680 = vmatpush1.bf16.msra.mxu1 %v10372_v11  ;;  %3599 = vmatprep.subr.bf16.mxu0 %v10387_v12  ;;  %v480_v11 = vld [vmem:[#allocation4 + $0x6d8] sm:$0xff]  ;;  %v10482_v12 = vcombine.low %v455_v62, %v463_v63 }
 0x1ad   :  { %3681 = vmatprep.subr.bf16.mxu1 %v10389_v16  ;;  %v495_v16 = vld [vmem:[#allocation4 + $0x750] sm:$0xff]  ;;  %v10500_v21 = vcombine.low %v472_v9, %v480_v11 }
 0x1ae   :  { %v10515_v27 = vcombine.high %v487_v15, %v495_v16 }
 0x1af   :  { %3600 = vmatpush1.bf16.msra.mxu0 %v10386_v18  ;;  %v10501_v18 = vcombine.high %v472_v9, %v480_v11  ;;  %v583_v9 = vld [vmem:[#allocation4 + $0xa10] sm:$0xff]  ;;  %v584_v11 = vld [vmem:[#allocation4 + $0xa18] sm:$0xff] }
 0x1b0   :  { %3682 = vmatpush1.bf16.msra.mxu1 %v10388_v19  ;;  %3601 = vmatprep.subr.bf16.mxu0 %v10403_v20  ;;  %v496_v19 = vld [vmem:[#allocation4 + $0x758] sm:$0xff]  ;;  %v10498_v20 = vcombine.low %v471_v7, %v479_v8 }
 0x1b1   :  { %3683 = vmatprep.subr.bf16.mxu1 %v10405_v29  ;;  %v511_v29 = vld [vmem:[#allocation4 + $0x7d0] sm:$0xff]  ;;  %v10516_v54 = vcombine.low %v488_v17, %v496_v19 }
 0x1b2   :  { %v10531_v37 = vcombine.high %v503_v28, %v511_v29 }
 0x1b3   :  { %3602 = vmatpush1.bf16.msra.mxu0 %v10402_v32  ;;  %v10517_v32 = vcombine.high %v488_v17, %v496_v19  ;;  %v607_v19 = vld [vmem:[#allocation4 + $0xad0] sm:$0xff] }
 0x1b4   :  { %3684 = vmatpush1.bf16.msra.mxu1 %v10404_v34  ;;  %3603 = vmatprep.subr.bf16.mxu0 %v10419_v35  ;;  %v512_v34 = vld [vmem:[#allocation4 + $0x7d8] sm:$0xff]  ;;  %v10514_v35 = vcombine.low %v487_v15, %v495_v16 }
 0x1b5   :  { %3685 = vmatprep.subr.bf16.mxu1 %v10421_v39  ;;  %v527_v39 = vld [vmem:[#allocation4 + $0x850] sm:$0xff]  ;;  %v10532_v44 = vcombine.low %v504_v31, %v512_v34 }
 0x1b6   :  { %v10547_v45 = vcombine.high %v519_v38, %v527_v39 }
 0x1b7   :  { %3604 = vmatpush1.bf16.msra.mxu0 %v10418_v41  ;;  %v10533_v41 = vcombine.high %v504_v31, %v512_v34  ;;  %v623_v34 = vld [vmem:[#allocation4 + $0xb50] sm:$0xff] }
 0x1b8   :  { %3686 = vmatpush1.bf16.msra.mxu1 %v10420_v42  ;;  %3605 = vmatprep.subr.bf16.mxu0 %v10435_v43  ;;  %v528_v42 = vld [vmem:[#allocation4 + $0x858] sm:$0xff]  ;;  %v10530_v43 = vcombine.low %v503_v28, %v511_v29 }
 0x1b9   :  { %3687 = vmatprep.subr.bf16.mxu1 %v10437_v47  ;;  %v543_v47 = vld [vmem:[#allocation4 + $0x8d0] sm:$0xff]  ;;  %v10549_v48 = vcombine.high %v520_v40, %v528_v42  ;;  %v10548_v52 = vcombine.low %v520_v40, %v528_v42 }
 0x1ba   :  { %v10563_v53 = vcombine.high %v535_v46, %v543_v47  ;;  %v639_v42 = vld [vmem:[#allocation4 + $0xbd0] sm:$0xff] }
 0x1bb   :  { %3606 = vmatpush1.bf16.msra.mxu0 %v10434_v49  ;;  %v536_v49 = vld [vmem:[#allocation4 + $0x898] sm:$0xff] }
 0x1bc   :  { %3688 = vmatpush1.bf16.msra.mxu1 %v10436_v50  ;;  %3607 = vmatprep.subr.bf16.mxu0 %v10451_v51  ;;  %v544_v50 = vld [vmem:[#allocation4 + $0x8d8] sm:$0xff]  ;;  %v10546_v51 = vcombine.low %v519_v38, %v527_v39 }
 0x1bd   :  { %3689 = vmatprep.subr.bf16.mxu1 %v10453_v56  ;;  %v559_v56 = vld [vmem:[#allocation4 + $0x950] sm:$0xff]  ;;  %v10564_v62 = vcombine.low %v536_v49, %v544_v50 }
 0x1be   :  { %v10579_v63 = vcombine.high %v551_v55, %v559_v56 }
 0x1bf   :  { %3608 = vmatpush1.bf16.msra.mxu0 %v10450_v57  ;;  %v10565_v57 = vcombine.high %v536_v49, %v544_v50  ;;  %v647_v49 = vld [vmem:[#allocation4 + $0xc10] sm:$0xff] }
 0x1c0   :  { %3690 = vmatpush1.bf16.msra.mxu1 %v10452_v58  ;;  %3609 = vmatprep.subr.bf16.mxu0 %v10467_v60  ;;  %v560_v58 = vld [vmem:[#allocation4 + $0x958] sm:$0xff]  ;;  %v10562_v60 = vcombine.low %v535_v46, %v543_v47  ;;  %v655_v50 = vld [vmem:[#allocation4 + $0xc50] sm:$0xff] }
 0x1c1   :  { %3691 = vmatprep.subr.bf16.mxu1 %v10469_v2  ;;  %v10581_v1 = vcombine.high %v552_v24, %v560_v58  ;;  %v567_v2 = vld [vmem:[#allocation4 + $0x990] sm:$0xff]  ;;  %v10580_v7 = vcombine.low %v552_v24, %v560_v58 }
 0x1c2   :  { %v10595_v8 = vcombine.high %v567_v2, %v575_v3  ;;  %v671_v58 = vld [vmem:[#allocation4 + $0xcd0] sm:$0xff] }
 0x1c3   :  { %3610 = vmatpush1.bf16.msra.mxu0 %v10466_v33  ;;  %v568_v33 = vld [vmem:[#allocation4 + $0x998] sm:$0xff] }
 0x1c4   :  { %3692 = vmatpush1.bf16.msra.mxu1 %v10468_v5  ;;  %3611 = vmatprep.subr.bf16.mxu0 %v10483_v6  ;;  %v576_v5 = vld [vmem:[#allocation4 + $0x9d8] sm:$0xff]  ;;  %v10578_v6 = vcombine.low %v551_v55, %v559_v56  ;;  %v10675_v56 = vcombine.high %v647_v49, %v655_v50 }
 0x1c5   :  { %3693 = vmatprep.subr.bf16.mxu1 %v10485_v10  ;;  %v591_v10 = vld [vmem:[#allocation4 + $0xa50] sm:$0xff]  ;;  %v10596_v15 = vcombine.low %v568_v33, %v576_v5 }
 0x1c6   :  { %v10611_v16 = vcombine.high %v583_v9, %v591_v10 }
 0x1c7   :  { %3612 = vmatpush1.bf16.msra.mxu0 %v10482_v12  ;;  %v10597_v12 = vcombine.high %v568_v33, %v576_v5  ;;  %v679_v33 = vld [vmem:[#allocation4 + $0xd10] sm:$0xff] }
 0x1c8   :  { %3694 = vmatpush1.bf16.msra.mxu1 %v10484_v13  ;;  %3613 = vmatprep.subr.bf16.mxu0 %v10499_v14  ;;  %v592_v13 = vld [vmem:[#allocation4 + $0xa58] sm:$0xff]  ;;  %v10594_v14 = vcombine.low %v567_v2, %v575_v3  ;;  %v687_v5 = vld [vmem:[#allocation4 + $0xd50] sm:$0xff] }
 0x1c9   :  { %3695 = vmatprep.subr.bf16.mxu1 %v10501_v18  ;;  %v10613_v17 = vcombine.high %v584_v11, %v592_v13  ;;  %v599_v18 = vld [vmem:[#allocation4 + $0xa90] sm:$0xff]  ;;  %v10612_v28 = vcombine.low %v584_v11, %v592_v13 }
 0x1ca   :  { %v10627_v29 = vcombine.high %v599_v18, %v607_v19  ;;  %v703_v13 = vld [vmem:[#allocation4 + $0xdd0] sm:$0xff] }
 0x1cb   :  { %3614 = vmatpush1.bf16.msra.mxu0 %v10498_v20  ;;  %v600_v20 = vld [vmem:[#allocation4 + $0xa98] sm:$0xff] }
 0x1cc   :  { %3696 = vmatpush1.bf16.msra.mxu1 %v10500_v21  ;;  %3615 = vmatprep.subr.bf16.mxu0 %v10515_v27  ;;  %v608_v21 = vld [vmem:[#allocation4 + $0xad8] sm:$0xff]  ;;  %v10610_v27 = vcombine.low %v583_v9, %v591_v10  ;;  %v10707_v10 = vcombine.high %v679_v33, %v687_v5 }
 0x1cd   :  { %3697 = vmatprep.subr.bf16.mxu1 %v10517_v32  ;;  %v10629_v31 = vcombine.high %v600_v20, %v608_v21  ;;  %v615_v32 = vld [vmem:[#allocation4 + $0xb10] sm:$0xff]  ;;  %v10628_v38 = vcombine.low %v600_v20, %v608_v21 }
 0x1ce   :  { %v10643_v39 = vcombine.high %v615_v32, %v623_v34  ;;  %v711_v20 = vld [vmem:[#allocation4 + $0xe10] sm:$0xff] }
 0x1cf   :  { %3616 = vmatpush1.bf16.msra.mxu0 %v10514_v35  ;;  %v616_v35 = vld [vmem:[#allocation4 + $0xb18] sm:$0xff]  ;;  %v719_v21 = vld [vmem:[#allocation4 + $0xe50] sm:$0xff] }
 0x1d0   :  { %3698 = vmatpush1.bf16.msra.mxu1 %v10516_v54  ;;  %3617 = vmatprep.subr.bf16.mxu0 %v10531_v37  ;;  %v624_v54 = vld [vmem:[#allocation4 + $0xb58] sm:$0xff]  ;;  %v10626_v37 = vcombine.low %v599_v18, %v607_v19 }
 0x1d1   :  { %3699 = vmatprep.subr.bf16.mxu1 %v10533_v41  ;;  %v10645_v40 = vcombine.high %v616_v35, %v624_v54  ;;  %v631_v41 = vld [vmem:[#allocation4 + $0xb90] sm:$0xff]  ;;  %v10644_v46 = vcombine.low %v616_v35, %v624_v54 }
 0x1d2   :  { %v10659_v47 = vcombine.high %v631_v41, %v639_v42  ;;  %v727_v35 = vld [vmem:[#allocation4 + $0xe90] sm:$0xff] }
 0x1d3   :  { %3618 = vmatpush1.bf16.msra.mxu0 %v10530_v43  ;;  %v632_v43 = vld [vmem:[#allocation4 + $0xb98] sm:$0xff]  ;;  %v735_v54 = vld [vmem:[#allocation4 + $0xed0] sm:$0xff] }
 0x1d4   :  { %3700 = vmatpush1.bf16.msra.mxu1 %v10532_v44  ;;  %3628 = vmatprep.subr.bf16.mxu0 %v10547_v45  ;;  %v640_v44 = vld [vmem:[#allocation4 + $0xbd8] sm:$0xff]  ;;  %v10642_v45 = vcombine.low %v615_v32, %v623_v34  ;;  %v10739_v32 = vcombine.high %v711_v20, %v719_v21 }
 0x1d5   :  { %3710 = vmatprep.subr.bf16.mxu1 %v10549_v48  ;;  %v10661_v48 = vcombine.high %v632_v43, %v640_v44  ;;  %v10660_v55 = vcombine.low %v632_v43, %v640_v44  ;;  %v743_v43 = vld [vmem:[#allocation4 + $0xf10] sm:$0xff] }
 0x1d6   :  { %3620 = vmatmul.mubr.bf16.vlgmr.msra.gmra.mrb[8].mxu0 %v13178_v61  ;;  %v751_v44 = vld [vmem:[#allocation4 + $0xf50] sm:$0xff] }
 0x1d7   :  { %3702 = vmatmul.mubr.bf16.vlgmr.msra.gmra.mrb[8].mxu1 %v13178_v61  ;;  %3629 = vmatpush1.bf16.msra.mxu0 %v10546_v51  ;;  %v648_v51 = vld [vmem:[#allocation4 + $0xc18] sm:$0xff] }
 0x1d8   :  { %3660 = vmatprep.mubr.bf16.mxu0 %v13182_v4  ;;  %3711 = vmatpush1.bf16.msra.mxu1 %v10548_v52  ;;  %v656_v52 = vld [vmem:[#allocation4 + $0xc58] sm:$0xff] }
 0x1d9   :  { %3742 = vmatprep.mubr.bf16.mxu1 %v13182_v4  ;;  %3630 = vmatprep.subr.bf16.mxu0 %v10563_v53  ;;  %v10658_v53 = vcombine.low %v631_v41, %v639_v42  ;;  %v10677_v24 = vcombine.high %v648_v51, %v656_v52  ;;  %v10755_v41 = vcombine.high %v727_v35, %v735_v54 }
 0x1da   :  { %3712 = vmatprep.subr.bf16.mxu1 %v10565_v57  ;;  %v663_v57 = vld [vmem:[#allocation4 + $0xc90] sm:$0xff] }
 0x1db   :  { %3631 = vmatpush1.bf16.msra.mxu0 %v10562_v60  ;;  %v664_v60 = vld [vmem:[#allocation4 + $0xc98] sm:$0xff]  ;;  %v10691_v2 = vcombine.high %v663_v57, %v671_v58 }
 0x1dc   :  { %3713 = vmatpush1.bf16.msra.mxu1 %v10564_v62  ;;  %3632 = vmatprep.subr.bf16.mxu0 %v10579_v63  ;;  %v672_v62 = vld [vmem:[#allocation4 + $0xcd8] sm:$0xff]  ;;  %v10674_v63 = vcombine.low %v647_v49, %v655_v50  ;;  %v10771_v49 = vcombine.high %v743_v43, %v751_v44 }
 0x1dd   :  { %3714 = vmatprep.subr.bf16.mxu1 %v10581_v1  ;;  %v10676_v1 = vcombine.low %v648_v51, %v656_v52  ;;  %v10693_v3 = vcombine.high %v664_v60, %v672_v62  ;;  %v10692_v9 = vcombine.low %v664_v60, %v672_v62  ;;  %v759_v51 = vld [vmem:[#allocation4 + $0xf90] sm:$0xff]  ;;  %v265_v60 = vld [vmem:[#allocation4 + $0x20] sm:$0xff] }
 0x1de   :  { %v767_v52 = vld [vmem:[#allocation4 + $0xfd0] sm:$0xff]  ;;  %v273_v62 = vld [vmem:[#allocation4 + $0x60] sm:$0xff] }
 0x1df   :  { %3633 = vmatpush1.bf16.msra.mxu0 %v10578_v6  ;;  %v680_v6 = vld [vmem:[#allocation4 + $0xd18] sm:$0xff] }
 0x1e0   :  { %3715 = vmatpush1.bf16.msra.mxu1 %v10580_v7  ;;  %3634 = vmatprep.subr.bf16.mxu0 %v10595_v8  ;;  %v688_v7 = vld [vmem:[#allocation4 + $0xd58] sm:$0xff]  ;;  %v10690_v8 = vcombine.low %v663_v57, %v671_v58  ;;  %v10787_v57 = vcombine.high %v759_v51, %v767_v52 }
 0x1e1   :  { %3716 = vmatprep.subr.bf16.mxu1 %v10597_v12  ;;  %v10709_v11 = vcombine.high %v680_v6, %v688_v7  ;;  %v695_v12 = vld [vmem:[#allocation4 + $0xd90] sm:$0xff] }
 0x1e2   :  { %v10723_v18 = vcombine.high %v695_v12, %v703_v13 }
 0x1e3   :  { %3635 = vmatpush1.bf16.msra.mxu0 %v10594_v14  ;;  %v696_v14 = vld [vmem:[#allocation4 + $0xd98] sm:$0xff] }
 0x1e4   :  { %3717 = vmatpush1.bf16.msra.mxu1 %v10596_v15  ;;  %3636 = vmatprep.subr.bf16.mxu0 %v10611_v16  ;;  %v704_v15 = vld [vmem:[#allocation4 + $0xdd8] sm:$0xff]  ;;  %v10706_v16 = vcombine.low %v679_v33, %v687_v5  ;;  %v10295_v33 = vcombine.high %v265_v60, %v273_v62 }
 0x1e5   :  { %3718 = vmatprep.subr.bf16.mxu1 %v10613_v17  ;;  %v10708_v17 = vcombine.low %v680_v6, %v688_v7  ;;  %v10725_v19 = vcombine.high %v696_v14, %v704_v15  ;;  %v281_v6 = vld [vmem:[#allocation4 + $0xa0] sm:$0xff] }
 0x1e6   :  { %v289_v7 = vld [vmem:[#allocation4 + $0xe0] sm:$0xff] }
 0x1e7   :  { %3637 = vmatpush1.bf16.msra.mxu0 %v10610_v27  ;;  %v712_v27 = vld [vmem:[#allocation4 + $0xe18] sm:$0xff] }
 0x1e8   :  { %3719 = vmatpush1.bf16.msra.mxu1 %v10612_v28  ;;  %3638 = vmatprep.subr.bf16.mxu0 %v10627_v29  ;;  %v720_v28 = vld [vmem:[#allocation4 + $0xe58] sm:$0xff]  ;;  %v10722_v29 = vcombine.low %v695_v12, %v703_v13  ;;  %v10311_v12 = vcombine.high %v281_v6, %v289_v7  ;;  %v297_v13 = vld [vmem:[#allocation4 + $0x120] sm:$0xff] }
 0x1e9   :  { %3720 = vmatprep.subr.bf16.mxu1 %v10629_v31  ;;  %v10724_v31 = vcombine.low %v696_v14, %v704_v15  ;;  %v10741_v34 = vcombine.high %v712_v27, %v720_v28  ;;  %v305_v14 = vld [vmem:[#allocation4 + $0x160] sm:$0xff] }
 0x1eb   :  { %3639 = vmatpush1.bf16.msra.mxu0 %v10626_v37  ;;  %v728_v37 = vld [vmem:[#allocation4 + $0xe98] sm:$0xff] }
 0x1ec   :  { %3721 = vmatpush1.bf16.msra.mxu1 %v10628_v38  ;;  %3640 = vmatprep.subr.bf16.mxu0 %v10643_v39  ;;  %v736_v38 = vld [vmem:[#allocation4 + $0xed8] sm:$0xff]  ;;  %v10738_v39 = vcombine.low %v711_v20, %v719_v21  ;;  %v10327_v20 = vcombine.high %v297_v13, %v305_v14 }
 0x1ed   :  { %3722 = vmatprep.subr.bf16.mxu1 %v10645_v40  ;;  %v10740_v40 = vcombine.low %v712_v27, %v720_v28  ;;  %v10757_v42 = vcombine.high %v728_v37, %v736_v38  ;;  %v313_v27 = vld [vmem:[#allocation4 + $0x1a0] sm:$0xff] }
 0x1ee   :  { %v321_v28 = vld [vmem:[#allocation4 + $0x1e0] sm:$0xff] }
 0x1ef   :  { %3641 = vmatpush1.bf16.msra.mxu0 %v10642_v45  ;;  %v744_v45 = vld [vmem:[#allocation4 + $0xf18] sm:$0xff] }
 0x1f0   :  { %3723 = vmatpush1.bf16.msra.mxu1 %v10644_v46  ;;  %3642 = vmatprep.subr.bf16.mxu0 %v10659_v47  ;;  %v752_v46 = vld [vmem:[#allocation4 + $0xf58] sm:$0xff]  ;;  %v10754_v47 = vcombine.low %v727_v35, %v735_v54  ;;  %v10343_v35 = vcombine.high %v313_v27, %v321_v28 }
 0x1f1   :  { %3724 = vmatprep.subr.bf16.mxu1 %v10661_v48  ;;  %v10756_v48 = vcombine.low %v728_v37, %v736_v38  ;;  %v10773_v50 = vcombine.high %v744_v45, %v752_v46  ;;  %v329_v37 = vld [vmem:[#allocation4 + $0x220] sm:$0xff] }
 0x1f2   :  { %v337_v38 = vld [vmem:[#allocation4 + $0x260] sm:$0xff] }
 0x1f3   :  { %3643 = vmatpush1.bf16.msra.mxu0 %v10658_v53  ;;  %v760_v53 = vld [vmem:[#allocation4 + $0xf98] sm:$0xff] }
 0x1f4   :  { %3725 = vmatpush1.bf16.msra.mxu1 %v10660_v55  ;;  %3644 = vmatprep.subr.bf16.mxu0 %v10675_v56  ;;  %v768_v55 = vld [vmem:[#allocation4 + $0xfd8] sm:$0xff]  ;;  %v10770_v56 = vcombine.low %v743_v43, %v751_v44  ;;  %v10359_v43 = vcombine.high %v329_v37, %v337_v38 }
 0x1f5   :  { %3726 = vmatprep.subr.bf16.mxu1 %v10677_v24  ;;  %v10772_v24 = vcombine.low %v744_v45, %v752_v46  ;;  %v10789_v58 = vcombine.high %v760_v53, %v768_v55  ;;  %v345_v45 = vld [vmem:[#allocation4 + $0x2a0] sm:$0xff] }
 0x1f6   :  { %v353_v46 = vld [vmem:[#allocation4 + $0x2e0] sm:$0xff] }
 0x1f7   :  { %3645 = vmatpush1.bf16.msra.mxu0 %v10674_v63  ;;  %v266_v63 = vld [vmem:[#allocation4 + $0x28] sm:$0xff] }
 0x1f8   :  { %3727 = vmatpush1.bf16.msra.mxu1 %v10676_v1  ;;  %3646 = vmatprep.subr.bf16.mxu0 %v10691_v2  ;;  %v274_v1 = vld [vmem:[#allocation4 + $0x68] sm:$0xff]  ;;  %v10786_v2 = vcombine.low %v759_v51, %v767_v52  ;;  %v10375_v51 = vcombine.high %v345_v45, %v353_v46 }
 0x1f9   :  { %3728 = vmatprep.subr.bf16.mxu1 %v10693_v3  ;;  %v10788_v3 = vcombine.low %v760_v53, %v768_v55  ;;  %v10297_v5 = vcombine.high %v266_v63, %v274_v1  ;;  %v361_v53 = vld [vmem:[#allocation4 + $0x320] sm:$0xff] }
 0x1fa   :  { %v369_v55 = vld [vmem:[#allocation4 + $0x360] sm:$0xff] }
 0x1fb   :  { %3647 = vmatpush1.bf16.msra.mxu0 %v10690_v8  ;;  %v10294_v8 = vcombine.low %v265_v60, %v273_v62  ;;  %v10391_v60 = vcombine.high %v361_v53, %v369_v55 }
 0x1fc   :  { %3729 = vmatpush1.bf16.msra.mxu1 %v10692_v9  ;;  %3648 = vmatprep.subr.bf16.mxu0 %v10707_v10  ;;  %v282_v9 = vld [vmem:[#allocation4 + $0xa8] sm:$0xff] }
 0x1fd   :  { %3730 = vmatprep.subr.bf16.mxu1 %v10709_v11  ;;  %v290_v10 = vld [vmem:[#allocation4 + $0xe8] sm:$0xff]  ;;  %v10296_v11 = vcombine.low %v266_v63, %v274_v1  ;;  %v377_v63 = vld [vmem:[#allocation4 + $0x3a0] sm:$0xff] }
 0x1fe   :  { %v10313_v15 = vcombine.high %v282_v9, %v290_v10  ;;  %v385_v1 = vld [vmem:[#allocation4 + $0x3e0] sm:$0xff] }
 0x1ff   :  { %3649 = vmatpush1.bf16.msra.mxu0 %v10706_v16  ;;  %v298_v16 = vld [vmem:[#allocation4 + $0x128] sm:$0xff] }
 0x200   :  { %3731 = vmatpush1.bf16.msra.mxu1 %v10708_v17  ;;  %3650 = vmatprep.subr.bf16.mxu0 %v10723_v18  ;;  %v306_v17 = vld [vmem:[#allocation4 + $0x168] sm:$0xff]  ;;  %v10310_v18 = vcombine.low %v281_v6, %v289_v7  ;;  %v10407_v6 = vcombine.high %v377_v63, %v385_v1 }
 0x201   :  { %3732 = vmatprep.subr.bf16.mxu1 %v10725_v19  ;;  %v10312_v19 = vcombine.low %v282_v9, %v290_v10  ;;  %v10329_v21 = vcombine.high %v298_v16, %v306_v17  ;;  %v401_v9 = vld [vmem:[#allocation4 + $0x460] sm:$0xff]  ;;  %v394_v10 = vld [vmem:[#allocation4 + $0x428] sm:$0xff] }
 0x203   :  { %3651 = vmatpush1.bf16.msra.mxu0 %v10722_v29  ;;  %v314_v29 = vld [vmem:[#allocation4 + $0x1a8] sm:$0xff] }
 0x204   :  { %3733 = vmatpush1.bf16.msra.mxu1 %v10724_v31  ;;  %3652 = vmatprep.subr.bf16.mxu0 %v10739_v32  ;;  %v322_v31 = vld [vmem:[#allocation4 + $0x1e8] sm:$0xff]  ;;  %v10326_v32 = vcombine.low %v297_v13, %v305_v14 }
 0x205   :  { %3734 = vmatprep.subr.bf16.mxu1 %v10741_v34  ;;  %v10328_v34 = vcombine.low %v298_v16, %v306_v17  ;;  %v10345_v54 = vcombine.high %v314_v29, %v322_v31  ;;  %v409_v16 = vld [vmem:[#allocation4 + $0x4a0] sm:$0xff] }
 0x206   :  { %v417_v17 = vld [vmem:[#allocation4 + $0x4e0] sm:$0xff] }
 0x207   :  { %3653 = vmatpush1.bf16.msra.mxu0 %v10738_v39  ;;  %v330_v39 = vld [vmem:[#allocation4 + $0x228] sm:$0xff] }
 0x208   :  { %3735 = vmatpush1.bf16.msra.mxu1 %v10740_v40  ;;  %3654 = vmatprep.subr.bf16.mxu0 %v10755_v41  ;;  %v338_v40 = vld [vmem:[#allocation4 + $0x268] sm:$0xff]  ;;  %v10342_v41 = vcombine.low %v313_v27, %v321_v28  ;;  %v10439_v27 = vcombine.high %v409_v16, %v417_v17 }
 0x209   :  { %3736 = vmatprep.subr.bf16.mxu1 %v10757_v42  ;;  %v10344_v42 = vcombine.low %v314_v29, %v322_v31  ;;  %v10361_v44 = vcombine.high %v330_v39, %v338_v40  ;;  %v425_v29 = vld [vmem:[#allocation4 + $0x520] sm:$0xff] }
 0x20a   :  { %v433_v31 = vld [vmem:[#allocation4 + $0x560] sm:$0xff] }
 0x20b   :  { %3655 = vmatpush1.bf16.msra.mxu0 %v10754_v47  ;;  %v346_v47 = vld [vmem:[#allocation4 + $0x2a8] sm:$0xff] }
 0x20c   :  { %3737 = vmatpush1.bf16.msra.mxu1 %v10756_v48  ;;  %3656 = vmatprep.subr.bf16.mxu0 %v10771_v49  ;;  %v354_v48 = vld [vmem:[#allocation4 + $0x2e8] sm:$0xff]  ;;  %v10358_v49 = vcombine.low %v329_v37, %v337_v38  ;;  %v10455_v37 = vcombine.high %v425_v29, %v433_v31 }
 0x20d   :  { %3738 = vmatprep.subr.bf16.mxu1 %v10773_v50  ;;  %v10360_v50 = vcombine.low %v330_v39, %v338_v40  ;;  %v10377_v52 = vcombine.high %v346_v47, %v354_v48  ;;  %v441_v39 = vld [vmem:[#allocation4 + $0x5a0] sm:$0xff] }
 0x20e   :  { %v449_v40 = vld [vmem:[#allocation4 + $0x5e0] sm:$0xff] }
 0x20f   :  { %3657 = vmatpush1.bf16.msra.mxu0 %v10770_v56  ;;  %v362_v56 = vld [vmem:[#allocation4 + $0x328] sm:$0xff] }
 0x210   :  { %3739 = vmatpush1.bf16.msra.mxu1 %v10772_v24  ;;  %3658 = vmatprep.subr.bf16.mxu0 %v10787_v57  ;;  %v370_v24 = vld [vmem:[#allocation4 + $0x368] sm:$0xff]  ;;  %v10374_v57 = vcombine.low %v345_v45, %v353_v46  ;;  %v10471_v45 = vcombine.high %v441_v39, %v449_v40 }
 0x211   :  { %3740 = vmatprep.subr.bf16.mxu1 %v10789_v58  ;;  %v10376_v58 = vcombine.low %v346_v47, %v354_v48  ;;  %v10393_v62 = vcombine.high %v362_v56, %v370_v24  ;;  %v457_v47 = vld [vmem:[#allocation4 + $0x620] sm:$0xff] }
 0x212   :  { %v465_v48 = vld [vmem:[#allocation4 + $0x660] sm:$0xff] }
 0x213   :  { %3659 = vmatpush1.bf16.msra.mxu0 %v10786_v2  ;;  %v378_v2 = vld [vmem:[#allocation4 + $0x3a8] sm:$0xff] }
 0x214   :  { %3741 = vmatpush1.bf16.msra.mxu1 %v10788_v3  ;;  %3751 = vmatprep.subr.bf16.mxu0 %v10295_v33  ;;  %v386_v3 = vld [vmem:[#allocation4 + $0x3e8] sm:$0xff]  ;;  %v10390_v33 = vcombine.low %v361_v53, %v369_v55  ;;  %v10487_v53 = vcombine.high %v457_v47, %v465_v48 }
 0x215   :  { %3833 = vmatprep.subr.bf16.mxu1 %v10297_v5  ;;  %v10392_v5 = vcombine.low %v362_v56, %v370_v24  ;;  %v10409_v7 = vcombine.high %v378_v2, %v386_v3  ;;  %v10408_v13 = vcombine.low %v378_v2, %v386_v3  ;;  %v473_v56 = vld [vmem:[#allocation4 + $0x6a0] sm:$0xff] }
 0x216   :  { %3661 = vmatmul.mubr.bf16.vlgmr.msra.gmra.mrb[8].mxu0 %v13198_v30  ;;  %v481_v24 = vld [vmem:[#allocation4 + $0x6e0] sm:$0xff] }
 0x217   :  { %3743 = vmatmul.mubr.bf16.vlgmr.msra.gmra.mrb[8].mxu1 %v13198_v30  ;;  %3752 = vmatpush1.bf16.msra.mxu0 %v10294_v8  ;;  %v393_v8 = vld [vmem:[#allocation4 + $0x420] sm:$0xff] }
 0x218   :  { %3783 = vmatprep.mubr.bf16.mxu0 %v13176_v59  ;;  %3834 = vmatpush1.bf16.msra.mxu1 %v10296_v11  ;;  %v402_v11 = vld [vmem:[#allocation4 + $0x468] sm:$0xff]  ;;  %v10423_v14 = vcombine.high %v393_v8, %v401_v9  ;;  %v489_v2 = vld [vmem:[#allocation4 + $0x720] sm:$0xff] }
 0x219   :  { %3865 = vmatprep.mubr.bf16.mxu1 %v13176_v59  ;;  %3753 = vmatprep.subr.bf16.mxu0 %v10311_v12  ;;  %v10406_v12 = vcombine.low %v377_v63, %v385_v1  ;;  %v10503_v63 = vcombine.high %v473_v56, %v481_v24  ;;  %v497_v3 = vld [vmem:[#allocation4 + $0x760] sm:$0xff] }
 0x21a   :  { %3835 = vmatprep.subr.bf16.mxu1 %v10313_v15  ;;  %v10425_v15 = vcombine.high %v394_v10, %v402_v11 }
 0x21b   :  { %3754 = vmatpush1.bf16.msra.mxu0 %v10310_v18  ;;  %v410_v18 = vld [vmem:[#allocation4 + $0x4a8] sm:$0xff] }
 0x21c   :  { %3836 = vmatpush1.bf16.msra.mxu1 %v10312_v19  ;;  %3755 = vmatprep.subr.bf16.mxu0 %v10327_v20  ;;  %v418_v19 = vld [vmem:[#allocation4 + $0x4e8] sm:$0xff]  ;;  %v10422_v20 = vcombine.low %v393_v8, %v401_v9  ;;  %v10519_v8 = vcombine.high %v489_v2, %v497_v3 }
 0x21d   :  { %3837 = vmatprep.subr.bf16.mxu1 %v10329_v21  ;;  %v10424_v21 = vcombine.low %v394_v10, %v402_v11  ;;  %v10441_v28 = vcombine.high %v410_v18, %v418_v19  ;;  %v505_v10 = vld [vmem:[#allocation4 + $0x7a0] sm:$0xff] }
 0x21e   :  { %v513_v11 = vld [vmem:[#allocation4 + $0x7e0] sm:$0xff] }
 0x21f   :  { %3756 = vmatpush1.bf16.msra.mxu0 %v10326_v32  ;;  %v426_v32 = vld [vmem:[#allocation4 + $0x528] sm:$0xff] }
 0x220   :  { %3838 = vmatpush1.bf16.msra.mxu1 %v10328_v34  ;;  %3757 = vmatprep.subr.bf16.mxu0 %v10343_v35  ;;  %v434_v34 = vld [vmem:[#allocation4 + $0x568] sm:$0xff]  ;;  %v10438_v35 = vcombine.low %v409_v16, %v417_v17  ;;  %v10535_v16 = vcombine.high %v505_v10, %v513_v11 }
 0x221   :  { %3839 = vmatprep.subr.bf16.mxu1 %v10345_v54  ;;  %v10440_v54 = vcombine.low %v410_v18, %v418_v19  ;;  %v10457_v38 = vcombine.high %v426_v32, %v434_v34  ;;  %v521_v18 = vld [vmem:[#allocation4 + $0x820] sm:$0xff] }
 0x222   :  { %v529_v19 = vld [vmem:[#allocation4 + $0x860] sm:$0xff] }
 0x223   :  { %3758 = vmatpush1.bf16.msra.mxu0 %v10342_v41  ;;  %v442_v41 = vld [vmem:[#allocation4 + $0x5a8] sm:$0xff] }
 0x224   :  { %3840 = vmatpush1.bf16.msra.mxu1 %v10344_v42  ;;  %3759 = vmatprep.subr.bf16.mxu0 %v10359_v43  ;;  %v450_v42 = vld [vmem:[#allocation4 + $0x5e8] sm:$0xff]  ;;  %v10454_v43 = vcombine.low %v425_v29, %v433_v31  ;;  %v10551_v29 = vcombine.high %v521_v18, %v529_v19 }
 0x225   :  { %3841 = vmatprep.subr.bf16.mxu1 %v10361_v44  ;;  %v10456_v44 = vcombine.low %v426_v32, %v434_v34  ;;  %v10473_v46 = vcombine.high %v442_v41, %v450_v42  ;;  %v537_v32 = vld [vmem:[#allocation4 + $0x8a0] sm:$0xff] }
 0x226   :  { %v545_v34 = vld [vmem:[#allocation4 + $0x8e0] sm:$0xff] }
 0x227   :  { %3760 = vmatpush1.bf16.msra.mxu0 %v10358_v49  ;;  %v458_v49 = vld [vmem:[#allocation4 + $0x628] sm:$0xff] }
 0x228   :  { %3842 = vmatpush1.bf16.msra.mxu1 %v10360_v50  ;;  %3761 = vmatprep.subr.bf16.mxu0 %v10375_v51  ;;  %v466_v50 = vld [vmem:[#allocation4 + $0x668] sm:$0xff]  ;;  %v10470_v51 = vcombine.low %v441_v39, %v449_v40  ;;  %v10567_v39 = vcombine.high %v537_v32, %v545_v34  ;;  %v553_v40 = vld [vmem:[#allocation4 + $0x920] sm:$0xff] }
 0x229   :  { %3843 = vmatprep.subr.bf16.mxu1 %v10377_v52  ;;  %v10472_v52 = vcombine.low %v442_v41, %v450_v42  ;;  %v10489_v55 = vcombine.high %v458_v49, %v466_v50  ;;  %v561_v41 = vld [vmem:[#allocation4 + $0x960] sm:$0xff] }
 0x22b   :  { %3762 = vmatpush1.bf16.msra.mxu0 %v10374_v57  ;;  %v474_v57 = vld [vmem:[#allocation4 + $0x6a8] sm:$0xff] }
 0x22c   :  { %3844 = vmatpush1.bf16.msra.mxu1 %v10376_v58  ;;  %3763 = vmatprep.subr.bf16.mxu0 %v10391_v60  ;;  %v482_v58 = vld [vmem:[#allocation4 + $0x6e8] sm:$0xff]  ;;  %v10486_v60 = vcombine.low %v457_v47, %v465_v48  ;;  %v10583_v47 = vcombine.high %v553_v40, %v561_v41 }
 0x22d   :  { %3845 = vmatprep.subr.bf16.mxu1 %v10393_v62  ;;  %v10488_v62 = vcombine.low %v458_v49, %v466_v50  ;;  %v10505_v1 = vcombine.high %v474_v57, %v482_v58  ;;  %v569_v49 = vld [vmem:[#allocation4 + $0x9a0] sm:$0xff] }
 0x22e   :  { %v577_v50 = vld [vmem:[#allocation4 + $0x9e0] sm:$0xff] }
 0x22f   :  { %3764 = vmatpush1.bf16.msra.mxu0 %v10390_v33  ;;  %v490_v33 = vld [vmem:[#allocation4 + $0x728] sm:$0xff] }
 0x230   :  { %3846 = vmatpush1.bf16.msra.mxu1 %v10392_v5  ;;  %3765 = vmatprep.subr.bf16.mxu0 %v10407_v6  ;;  %v498_v5 = vld [vmem:[#allocation4 + $0x768] sm:$0xff]  ;;  %v10502_v6 = vcombine.low %v473_v56, %v481_v24  ;;  %v10599_v56 = vcombine.high %v569_v49, %v577_v50 }
 0x231   :  { %3847 = vmatprep.subr.bf16.mxu1 %v10409_v7  ;;  %v10504_v7 = vcombine.low %v474_v57, %v482_v58  ;;  %v10521_v9 = vcombine.high %v490_v33, %v498_v5  ;;  %v585_v57 = vld [vmem:[#allocation4 + $0xa20] sm:$0xff] }
 0x232   :  { %v593_v58 = vld [vmem:[#allocation4 + $0xa60] sm:$0xff] }
 0x233   :  { %3766 = vmatpush1.bf16.msra.mxu0 %v10406_v12  ;;  %v506_v12 = vld [vmem:[#allocation4 + $0x7a8] sm:$0xff] }
 0x234   :  { %3848 = vmatpush1.bf16.msra.mxu1 %v10408_v13  ;;  %3767 = vmatprep.subr.bf16.mxu0 %v10423_v14  ;;  %v514_v13 = vld [vmem:[#allocation4 + $0x7e8] sm:$0xff]  ;;  %v10518_v14 = vcombine.low %v489_v2, %v497_v3  ;;  %v10615_v2 = vcombine.high %v585_v57, %v593_v58 }
 0x235   :  { %3849 = vmatprep.subr.bf16.mxu1 %v10425_v15  ;;  %v10520_v15 = vcombine.low %v490_v33, %v498_v5  ;;  %v10537_v17 = vcombine.high %v506_v12, %v514_v13  ;;  %v601_v33 = vld [vmem:[#allocation4 + $0xaa0] sm:$0xff] }
 0x236   :  { %v609_v5 = vld [vmem:[#allocation4 + $0xae0] sm:$0xff] }
 0x237   :  { %3768 = vmatpush1.bf16.msra.mxu0 %v10422_v20  ;;  %v522_v20 = vld [vmem:[#allocation4 + $0x828] sm:$0xff] }
 0x238   :  { %3850 = vmatpush1.bf16.msra.mxu1 %v10424_v21  ;;  %3769 = vmatprep.subr.bf16.mxu0 %v10439_v27  ;;  %v530_v21 = vld [vmem:[#allocation4 + $0x868] sm:$0xff]  ;;  %v10534_v27 = vcombine.low %v505_v10, %v513_v11  ;;  %v10631_v10 = vcombine.high %v601_v33, %v609_v5 }
 0x239   :  { %3851 = vmatprep.subr.bf16.mxu1 %v10441_v28  ;;  %v10536_v28 = vcombine.low %v506_v12, %v514_v13  ;;  %v10553_v31 = vcombine.high %v522_v20, %v530_v21  ;;  %v617_v12 = vld [vmem:[#allocation4 + $0xb20] sm:$0xff] }
 0x23a   :  { %v625_v13 = vld [vmem:[#allocation4 + $0xb60] sm:$0xff] }
 0x23b   :  { %3770 = vmatpush1.bf16.msra.mxu0 %v10438_v35  ;;  %v10550_v35 = vcombine.low %v521_v18, %v529_v19  ;;  %v10647_v18 = vcombine.high %v617_v12, %v625_v13 }
 0x23c   :  { %3852 = vmatpush1.bf16.msra.mxu1 %v10440_v54  ;;  %3771 = vmatprep.subr.bf16.mxu0 %v10455_v37  ;;  %v538_v54 = vld [vmem:[#allocation4 + $0x8a8] sm:$0xff] }
 0x23d   :  { %3853 = vmatprep.subr.bf16.mxu1 %v10457_v38  ;;  %v546_v37 = vld [vmem:[#allocation4 + $0x8e8] sm:$0xff]  ;;  %v10552_v38 = vcombine.low %v522_v20, %v530_v21 }
 0x23e   :  { %v10569_v42 = vcombine.high %v538_v54, %v546_v37 }
 0x23f   :  { %3772 = vmatpush1.bf16.msra.mxu0 %v10454_v43  ;;  %v554_v43 = vld [vmem:[#allocation4 + $0x928] sm:$0xff] }
 0x240   :  { %3854 = vmatpush1.bf16.msra.mxu1 %v10456_v44  ;;  %3773 = vmatprep.subr.bf16.mxu0 %v10471_v45  ;;  %v562_v44 = vld [vmem:[#allocation4 + $0x968] sm:$0xff]  ;;  %v10566_v45 = vcombine.low %v537_v32, %v545_v34 }
 0x241   :  { %3855 = vmatprep.subr.bf16.mxu1 %v10473_v46  ;;  %v10568_v46 = vcombine.low %v538_v54, %v546_v37  ;;  %v10585_v48 = vcombine.high %v554_v43, %v562_v44  ;;  %v634_v32 = vld [vmem:[#allocation4 + $0xba8] sm:$0xff]  ;;  %v10646_v37 = vcombine.low %v617_v12, %v625_v13 }
 0x242   :  { %v642_v34 = vld [vmem:[#allocation4 + $0xbe8] sm:$0xff] }
 0x243   :  { %3774 = vmatpush1.bf16.msra.mxu0 %v10470_v51  ;;  %v570_v51 = vld [vmem:[#allocation4 + $0x9a8] sm:$0xff] }
 0x244   :  { %3856 = vmatpush1.bf16.msra.mxu1 %v10472_v52  ;;  %3775 = vmatprep.subr.bf16.mxu0 %v10487_v53  ;;  %v578_v52 = vld [vmem:[#allocation4 + $0x9e8] sm:$0xff]  ;;  %v10582_v53 = vcombine.low %v553_v40, %v561_v41 }
 0x245   :  { %3857 = vmatprep.subr.bf16.mxu1 %v10489_v55  ;;  %v10584_v55 = vcombine.low %v554_v43, %v562_v44  ;;  %v10601_v24 = vcombine.high %v570_v51, %v578_v52  ;;  %v649_v43 = vld [vmem:[#allocation4 + $0xc20] sm:$0xff] }
 0x246   :  { %v657_v44 = vld [vmem:[#allocation4 + $0xc60] sm:$0xff] }
 0x247   :  { %3776 = vmatpush1.bf16.msra.mxu0 %v10486_v60  ;;  %v586_v60 = vld [vmem:[#allocation4 + $0xa28] sm:$0xff] }
 0x248   :  { %3858 = vmatpush1.bf16.msra.mxu1 %v10488_v62  ;;  %3777 = vmatprep.subr.bf16.mxu0 %v10503_v63  ;;  %v594_v62 = vld [vmem:[#allocation4 + $0xa68] sm:$0xff]  ;;  %v10598_v63 = vcombine.low %v569_v49, %v577_v50  ;;  %v10679_v49 = vcombine.high %v649_v43, %v657_v44 }
 0x249   :  { %3859 = vmatprep.subr.bf16.mxu1 %v10505_v1  ;;  %v10600_v1 = vcombine.low %v570_v51, %v578_v52  ;;  %v10617_v3 = vcombine.high %v586_v60, %v594_v62  ;;  %v665_v51 = vld [vmem:[#allocation4 + $0xca0] sm:$0xff] }
 0x24a   :  { %v673_v52 = vld [vmem:[#allocation4 + $0xce0] sm:$0xff] }
 0x24b   :  { %3778 = vmatpush1.bf16.msra.mxu0 %v10502_v6  ;;  %v602_v6 = vld [vmem:[#allocation4 + $0xaa8] sm:$0xff] }
 0x24c   :  { %3860 = vmatpush1.bf16.msra.mxu1 %v10504_v7  ;;  %3779 = vmatprep.subr.bf16.mxu0 %v10519_v8  ;;  %v610_v7 = vld [vmem:[#allocation4 + $0xae8] sm:$0xff]  ;;  %v10614_v8 = vcombine.low %v585_v57, %v593_v58  ;;  %v10695_v57 = vcombine.high %v665_v51, %v673_v52 }
 0x24d   :  { %3861 = vmatprep.subr.bf16.mxu1 %v10521_v9  ;;  %v10616_v9 = vcombine.low %v586_v60, %v594_v62  ;;  %v10633_v11 = vcombine.high %v602_v6, %v610_v7  ;;  %v681_v60 = vld [vmem:[#allocation4 + $0xd20] sm:$0xff] }
 0x24e   :  { %v689_v62 = vld [vmem:[#allocation4 + $0xd60] sm:$0xff] }
 0x24f   :  { %3780 = vmatpush1.bf16.msra.mxu0 %v10518_v14  ;;  %v618_v14 = vld [vmem:[#allocation4 + $0xb28] sm:$0xff] }
 0x250   :  { %3862 = vmatpush1.bf16.msra.mxu1 %v10520_v15  ;;  %3781 = vmatprep.subr.bf16.mxu0 %v10535_v16  ;;  %v626_v15 = vld [vmem:[#allocation4 + $0xb68] sm:$0xff]  ;;  %v10630_v16 = vcombine.low %v601_v33, %v609_v5  ;;  %v10711_v33 = vcombine.high %v681_v60, %v689_v62 }
 0x251   :  { %3863 = vmatprep.subr.bf16.mxu1 %v10537_v17  ;;  %v10632_v17 = vcombine.low %v602_v6, %v610_v7  ;;  %v10649_v21 = vcombine.high %v618_v14, %v626_v15  ;;  %v10648_v40 = vcombine.low %v618_v14, %v626_v15  ;;  %v697_v6 = vld [vmem:[#allocation4 + $0xda0] sm:$0xff] }
 0x252   :  { %v705_v7 = vld [vmem:[#allocation4 + $0xde0] sm:$0xff] }
 0x253   :  { %3782 = vmatpush1.bf16.msra.mxu0 %v10534_v27  ;;  %v633_v27 = vld [vmem:[#allocation4 + $0xba0] sm:$0xff]  ;;  %v10727_v12 = vcombine.high %v697_v6, %v705_v7 }
 0x254   :  { %3864 = vmatpush1.bf16.msra.mxu1 %v10536_v28  ;;  %3792 = vmatprep.subr.bf16.mxu0 %v10551_v29  ;;  %v641_v28 = vld [vmem:[#allocation4 + $0xbe0] sm:$0xff] }
 0x255   :  { %3874 = vmatprep.subr.bf16.mxu1 %v10553_v31  ;;  %v10663_v41 = vcombine.high %v633_v27, %v641_v28  ;;  %v713_v14 = vld [vmem:[#allocation4 + $0xe20] sm:$0xff] }
 0x256   :  { %3784 = vmatmul.mubr.bf16.vlgmr.msra.gmra.mrb[12].mxu0 %v13178_v61  ;;  %v721_v15 = vld [vmem:[#allocation4 + $0xe60] sm:$0xff] }
 0x257   :  { %3866 = vmatmul.mubr.bf16.vlgmr.msra.gmra.mrb[12].mxu1 %v13178_v61  ;;  %3793 = vmatpush1.bf16.msra.mxu0 %v10550_v35 }
 0x258   :  { %3824 = vmatprep.mubr.bf16.mxu0 %v13182_v4  ;;  %3875 = vmatpush1.bf16.msra.mxu1 %v10552_v38 }
 0x259   :  { %3906 = vmatprep.mubr.bf16.mxu1 %v13182_v4  ;;  %3794 = vmatprep.subr.bf16.mxu0 %v10567_v39 }
 0x25a   :  { %3876 = vmatprep.subr.bf16.mxu1 %v10569_v42  ;;  %v10665_v42 = vcombine.high %v634_v32, %v642_v34 }
 0x25b   :  { %3795 = vmatpush1.bf16.msra.mxu0 %v10566_v45  ;;  %v650_v45 = vld [vmem:[#allocation4 + $0xc28] sm:$0xff] }
 0x25c   :  { %3877 = vmatpush1.bf16.msra.mxu1 %v10568_v46  ;;  %3796 = vmatprep.subr.bf16.mxu0 %v10583_v47  ;;  %v658_v46 = vld [vmem:[#allocation4 + $0xc68] sm:$0xff]  ;;  %v10662_v47 = vcombine.low %v633_v27, %v641_v28  ;;  %v10743_v27 = vcombine.high %v713_v14, %v721_v15 }
 0x25d   :  { %3878 = vmatprep.subr.bf16.mxu1 %v10585_v48  ;;  %v10664_v48 = vcombine.low %v634_v32, %v642_v34  ;;  %v10681_v50 = vcombine.high %v650_v45, %v658_v46  ;;  %v729_v32 = vld [vmem:[#allocation4 + $0xea0] sm:$0xff] }
 0x25e   :  { %v737_v34 = vld [vmem:[#allocation4 + $0xee0] sm:$0xff] }
 0x25f   :  { %3797 = vmatpush1.bf16.msra.mxu0 %v10582_v53  ;;  %v666_v53 = vld [vmem:[#allocation4 + $0xca8] sm:$0xff] }
 0x260   :  { %3879 = vmatpush1.bf16.msra.mxu1 %v10584_v55  ;;  %3798 = vmatprep.subr.bf16.mxu0 %v10599_v56  ;;  %v674_v55 = vld [vmem:[#allocation4 + $0xce8] sm:$0xff]  ;;  %v10678_v56 = vcombine.low %v649_v43, %v657_v44 }
 0x261   :  { %3880 = vmatprep.subr.bf16.mxu1 %v10601_v24  ;;  %v10680_v24 = vcombine.low %v650_v45, %v658_v46  ;;  %v10697_v58 = vcombine.high %v666_v53, %v674_v55  ;;  %v746_v43 = vld [vmem:[#allocation4 + $0xf28] sm:$0xff]  ;;  %v10758_v45 = vcombine.low %v729_v32, %v737_v34 }
 0x262   :  { %v754_v44 = vld [vmem:[#allocation4 + $0xf68] sm:$0xff] }
 0x263   :  { %3799 = vmatpush1.bf16.msra.mxu0 %v10598_v63  ;;  %v682_v63 = vld [vmem:[#allocation4 + $0xd28] sm:$0xff] }
 0x264   :  { %3881 = vmatpush1.bf16.msra.mxu1 %v10600_v1  ;;  %3800 = vmatprep.subr.bf16.mxu0 %v10615_v2  ;;  %v690_v1 = vld [vmem:[#allocation4 + $0xd68] sm:$0xff]  ;;  %v10694_v2 = vcombine.low %v665_v51, %v673_v52 }
 0x265   :  { %3882 = vmatprep.subr.bf16.mxu1 %v10617_v3  ;;  %v10696_v3 = vcombine.low %v666_v53, %v674_v55  ;;  %v10713_v5 = vcombine.high %v682_v63, %v690_v1  ;;  %v762_v51 = vld [vmem:[#allocation4 + $0xfa8] sm:$0xff]  ;;  %v10776_v55 = vcombine.low %v746_v43, %v754_v44 }
 0x266   :  { %v770_v52 = vld [vmem:[#allocation4 + $0xfe8] sm:$0xff] }
 0x267   :  { %3801 = vmatpush1.bf16.msra.mxu0 %v10614_v8  ;;  %v698_v8 = vld [vmem:[#allocation4 + $0xda8] sm:$0xff] }
 0x268   :  { %3883 = vmatpush1.bf16.msra.mxu1 %v10616_v9  ;;  %3802 = vmatprep.subr.bf16.mxu0 %v10631_v10  ;;  %v706_v9 = vld [vmem:[#allocation4 + $0xde8] sm:$0xff]  ;;  %v10710_v10 = vcombine.low %v681_v60, %v689_v62  ;;  %v268_v60 = vld [vmem:[#allocation4 + $0x38] sm:$0xff] }
 0x269   :  { %v13216_v19 = vpop.f32.mrb[4].mxu0  ;;  %v13218_v20 = vpop.f32.mrb[4].mxu1  ;;  %3884 = vmatprep.subr.bf16.mxu1 %v10633_v11  ;;  %v10712_v11 = vcombine.low %v682_v63, %v690_v1  ;;  %v10729_v13 = vcombine.high %v698_v8, %v706_v9  ;;  %v276_v62 = vld [vmem:[#allocation4 + $0x78] sm:$0xff]  ;;  %v10792_v1 = vcombine.low %v762_v51, %v770_v52 }
 0x26a   :  { %v13220_v29 = vpop.f32.mrb[5].mxu0  ;;  %v13222_v31 = vpop.f32.mrb[5].mxu1 }
 0x26b   :  { %v3502_v35 = vpop.f32.mrb[6].mxu0  ;;  %v3584_v54 = vpop.f32.mrb[6].mxu1  ;;  %3803 = vmatpush1.bf16.msra.mxu0 %v10630_v16  ;;  %v714_v16 = vld [vmem:[#allocation4 + $0xe28] sm:$0xff] }
 0x26c   :  { %3885 = vmatpush1.bf16.msra.mxu1 %v10632_v17  ;;  %v3503_v38 = vpop.f32.mrb[7].mxu0  ;;  %v3585_v39 = vpop.f32.mrb[7].mxu1  ;;  %3804 = vmatprep.subr.bf16.mxu0 %v10647_v18  ;;  %v722_v17 = vld [vmem:[#allocation4 + $0xe68] sm:$0xff]  ;;  %v10726_v18 = vcombine.low %v697_v6, %v705_v7  ;;  %v284_v7 = vld [vmem:[#allocation4 + $0xb8] sm:$0xff] }
 0x26d   :  { %3886 = vmatprep.subr.bf16.mxu1 %v10649_v21  ;;  %v10728_v21 = vcombine.low %v698_v8, %v706_v9  ;;  %v10745_v28 = vcombine.high %v714_v16, %v722_v17  ;;  %v730_v35 = vld [vmem:[#allocation4 + $0xea8] sm:$0xff]  ;;  %v10744_v38 = vcombine.low %v714_v16, %v722_v17  ;;  %v10759_v39 = vcombine.high %v729_v32, %v737_v34  ;;  %v292_v8 = vld [vmem:[#allocation4 + $0xf8] sm:$0xff] }
 0x26e   :  { %v738_v54 = vld [vmem:[#allocation4 + $0xee8] sm:$0xff]  ;;  %v10300_v9 = vcombine.low %v268_v60, %v276_v62  ;;  %v10316_v17 = vcombine.low %v284_v7, %v292_v8  ;;  %v316_v32 = vld [vmem:[#allocation4 + $0x1b8] sm:$0xff] }
 0x26f   :  { %3805 = vmatpush1.bf16.msra.mxu0 %v10646_v37  ;;  %v10742_v37 = vcombine.low %v713_v14, %v721_v15  ;;  %v10760_v46 = vcombine.low %v730_v35, %v738_v54  ;;  %v300_v14 = vld [vmem:[#allocation4 + $0x138] sm:$0xff] }
 0x270   :  { %3887 = vmatpush1.bf16.msra.mxu1 %v10648_v40  ;;  %3806 = vmatprep.subr.bf16.mxu0 %v10663_v41  ;;  %v10761_v40 = vcombine.high %v730_v35, %v738_v54  ;;  %v745_v41 = vld [vmem:[#allocation4 + $0xf20] sm:$0xff]  ;;  %v308_v15 = vld [vmem:[#allocation4 + $0x178] sm:$0xff] }
 0x271   :  { %3888 = vmatprep.subr.bf16.mxu1 %v10665_v42  ;;  %v753_v42 = vld [vmem:[#allocation4 + $0xf60] sm:$0xff]  ;;  %v324_v34 = vld [vmem:[#allocation4 + $0x1f8] sm:$0xff]  ;;  %v10332_v54 = vcombine.low %v300_v14, %v308_v15 }
 0x272   :  { %v10774_v53 = vcombine.low %v745_v41, %v753_v42 }
 0x273   :  { %3807 = vmatpush1.bf16.msra.mxu0 %v10662_v47  ;;  %v10775_v47 = vcombine.high %v745_v41, %v753_v42  ;;  %v332_v41 = vld [vmem:[#allocation4 + $0x238] sm:$0xff] }
 0x274   :  { %3889 = vmatpush1.bf16.msra.mxu1 %v10664_v48  ;;  %3808 = vmatprep.subr.bf16.mxu0 %v10679_v49  ;;  %v10777_v48 = vcombine.high %v746_v43, %v754_v44  ;;  %v761_v49 = vld [vmem:[#allocation4 + $0xfa0] sm:$0xff]  ;;  %v340_v42 = vld [vmem:[#allocation4 + $0x278] sm:$0xff]  ;;  %v10348_v43 = vcombine.low %v316_v32, %v324_v34 }
 0x275   :  { %3890 = vmatprep.subr.bf16.mxu1 %v10681_v50  ;;  %v769_v50 = vld [vmem:[#allocation4 + $0xfe0] sm:$0xff] }
 0x276   :  { %v10790_v63 = vcombine.low %v761_v49, %v769_v50 }
 0x277   :  { %3809 = vmatpush1.bf16.msra.mxu0 %v10678_v56  ;;  %v10791_v56 = vcombine.high %v761_v49, %v769_v50  ;;  %v356_v49 = vld [vmem:[#allocation4 + $0x2f8] sm:$0xff] }
 0x278   :  { %3891 = vmatpush1.bf16.msra.mxu1 %v10680_v24  ;;  %3810 = vmatprep.subr.bf16.mxu0 %v10695_v57  ;;  %v10793_v24 = vcombine.high %v762_v51, %v770_v52  ;;  %v267_v57 = vld [vmem:[#allocation4 + $0x30] sm:$0xff]  ;;  %v10364_v51 = vcombine.low %v332_v41, %v340_v42 }
 0x279   :  { %3892 = vmatprep.subr.bf16.mxu1 %v10697_v58  ;;  %v275_v58 = vld [vmem:[#allocation4 + $0x70] sm:$0xff] }
 0x27a   :  { %v10298_v6 = vcombine.low %v267_v57, %v275_v58 }
 0x27b   :  { %3811 = vmatpush1.bf16.msra.mxu0 %v10694_v2  ;;  %v10299_v2 = vcombine.high %v267_v57, %v275_v58  ;;  %v372_v57 = vld [vmem:[#allocation4 + $0x378] sm:$0xff] }
 0x27c   :  { %3893 = vmatpush1.bf16.msra.mxu1 %v10696_v3  ;;  %3812 = vmatprep.subr.bf16.mxu0 %v10711_v33  ;;  %v10301_v3 = vcombine.high %v268_v60, %v276_v62  ;;  %v283_v33 = vld [vmem:[#allocation4 + $0xb0] sm:$0xff] }
 0x27d   :  { %3894 = vmatprep.subr.bf16.mxu1 %v10713_v5  ;;  %v291_v5 = vld [vmem:[#allocation4 + $0xf0] sm:$0xff] }
 0x27e   :  { %v10314_v16 = vcombine.low %v283_v33, %v291_v5 }
 0x27f   :  { %3813 = vmatpush1.bf16.msra.mxu0 %v10710_v10  ;;  %v10315_v10 = vcombine.high %v283_v33, %v291_v5  ;;  %v388_v33 = vld [vmem:[#allocation4 + $0x3f8] sm:$0xff] }
 0x280   :  { %3895 = vmatpush1.bf16.msra.mxu1 %v10712_v11  ;;  %3814 = vmatprep.subr.bf16.mxu0 %v10727_v12  ;;  %v299_v11 = vld [vmem:[#allocation4 + $0x130] sm:$0xff] }
 0x281   :  { %3896 = vmatprep.subr.bf16.mxu1 %v10729_v13  ;;  %v307_v12 = vld [vmem:[#allocation4 + $0x170] sm:$0xff]  ;;  %v10317_v13 = vcombine.high %v284_v7, %v292_v8 }
 0x282   :  { %v10330_v35 = vcombine.low %v299_v11, %v307_v12 }
 0x283   :  { %3815 = vmatpush1.bf16.msra.mxu0 %v10726_v18  ;;  %v10331_v18 = vcombine.high %v299_v11, %v307_v12  ;;  %v396_v11 = vld [vmem:[#allocation4 + $0x438] sm:$0xff] }
 0x284   :  { %3897 = vmatpush1.bf16.msra.mxu1 %v10728_v21  ;;  %3816 = vmatprep.subr.bf16.mxu0 %v10743_v27  ;;  %v10333_v21 = vcombine.high %v300_v14, %v308_v15  ;;  %v315_v27 = vld [vmem:[#allocation4 + $0x1b0] sm:$0xff]  ;;  %v404_v12 = vld [vmem:[#allocation4 + $0x478] sm:$0xff] }
 0x285   :  { %3898 = vmatprep.subr.bf16.mxu1 %v10745_v28  ;;  %v323_v28 = vld [vmem:[#allocation4 + $0x1f0] sm:$0xff] }
 0x287   :  { %3817 = vmatpush1.bf16.msra.mxu0 %v10742_v37  ;;  %v10347_v37 = vcombine.high %v315_v27, %v323_v28 }
 0x288   :  { %3899 = vmatpush1.bf16.msra.mxu1 %v10744_v38  ;;  %3818 = vmatprep.subr.bf16.mxu0 %v10759_v39  ;;  %v10349_v38 = vcombine.high %v316_v32, %v324_v34  ;;  %v331_v39 = vld [vmem:[#allocation4 + $0x230] sm:$0xff]  ;;  %v10428_v32 = vcombine.low %v396_v11, %v404_v12 }
 0x289   :  { %3900 = vmatprep.subr.bf16.mxu1 %v10761_v40  ;;  %v339_v40 = vld [vmem:[#allocation4 + $0x270] sm:$0xff] }
 0x28a   :  { %v10363_v44 = vcombine.high %v331_v39, %v339_v40  ;;  %v10362_v50 = vcombine.low %v331_v39, %v339_v40  ;;  %v436_v39 = vld [vmem:[#allocation4 + $0x578] sm:$0xff] }
 0x28b   :  { %3819 = vmatpush1.bf16.msra.mxu0 %v10758_v45  ;;  %v10365_v45 = vcombine.high %v332_v41, %v340_v42 }
 0x28c   :  { %3901 = vmatpush1.bf16.msra.mxu1 %v10760_v46  ;;  %3820 = vmatprep.subr.bf16.mxu0 %v10775_v47  ;;  %v347_v46 = vld [vmem:[#allocation4 + $0x2b0] sm:$0xff] }
 0x28d   :  { %3902 = vmatprep.subr.bf16.mxu1 %v10777_v48  ;;  %v355_v47 = vld [vmem:[#allocation4 + $0x2f0] sm:$0xff]  ;;  %v348_v48 = vld [vmem:[#allocation4 + $0x2b8] sm:$0xff] }
 0x28e   :  { %v10379_v52 = vcombine.high %v347_v46, %v355_v47  ;;  %v10378_v58 = vcombine.low %v347_v46, %v355_v47  ;;  %v10380_v60 = vcombine.low %v348_v48, %v356_v49  ;;  %v452_v46 = vld [vmem:[#allocation4 + $0x5f8] sm:$0xff] }
 0x28f   :  { %3821 = vmatpush1.bf16.msra.mxu0 %v10774_v53  ;;  %v10381_v53 = vcombine.high %v348_v48, %v356_v49 }
 0x290   :  { %3903 = vmatpush1.bf16.msra.mxu1 %v10776_v55  ;;  %3822 = vmatprep.subr.bf16.mxu0 %v10791_v56  ;;  %v363_v55 = vld [vmem:[#allocation4 + $0x330] sm:$0xff] }
 0x291   :  { %3904 = vmatprep.subr.bf16.mxu1 %v10793_v24  ;;  %v371_v56 = vld [vmem:[#allocation4 + $0x370] sm:$0xff]  ;;  %v364_v24 = vld [vmem:[#allocation4 + $0x338] sm:$0xff] }
 0x292   :  { %v10395_v62 = vcombine.high %v363_v55, %v371_v56  ;;  %v10394_v5 = vcombine.low %v363_v55, %v371_v56  ;;  %v468_v55 = vld [vmem:[#allocation4 + $0x678] sm:$0xff] }
 0x293   :  { %3823 = vmatpush1.bf16.msra.mxu0 %v10790_v63  ;;  %v10397_v63 = vcombine.high %v364_v24, %v372_v57 }
 0x294   :  { %3905 = vmatpush1.bf16.msra.mxu1 %v10792_v1  ;;  %3915 = vmatprep.subr.bf16.mxu0 %v10299_v2  ;;  %v379_v1 = vld [vmem:[#allocation4 + $0x3b0] sm:$0xff] }
 0x295   :  { %3997 = vmatprep.subr.bf16.mxu1 %v10301_v3  ;;  %v387_v2 = vld [vmem:[#allocation4 + $0x3f0] sm:$0xff]  ;;  %v380_v3 = vld [vmem:[#allocation4 + $0x3b8] sm:$0xff] }
 0x296   :  { %3825 = vmatmul.mubr.bf16.vlgmr.msra.gmra.mrb[12].mxu0 %v13198_v30  ;;  %v10411_v7 = vcombine.high %v379_v1, %v387_v2  ;;  %v10413_v8 = vcombine.high %v380_v3, %v388_v33  ;;  %v10412_v14 = vcombine.low %v380_v3, %v388_v33 }
 0x297   :  { %3907 = vmatmul.mubr.bf16.vlgmr.msra.gmra.mrb[12].mxu1 %v13198_v30  ;;  %3916 = vmatpush1.bf16.msra.mxu0 %v10298_v6  ;;  %v10396_v6 = vcombine.low %v364_v24, %v372_v57 }
 0x298   :  { %3947 = vmatprep.mubr.bf16.mxu0 %v13176_v59  ;;  %3998 = vmatpush1.bf16.msra.mxu1 %v10300_v9  ;;  %v395_v9 = vld [vmem:[#allocation4 + $0x430] sm:$0xff] }
 0x299   :  { %4029 = vmatprep.mubr.bf16.mxu1 %v13176_v59  ;;  %3917 = vmatprep.subr.bf16.mxu0 %v10315_v10  ;;  %v10346_v59 = vcombine.low %v315_v27, %v323_v28  ;;  %v403_v10 = vld [vmem:[#allocation4 + $0x470] sm:$0xff]  ;;  %v420_v27 = vld [vmem:[#allocation4 + $0x4f8] sm:$0xff] }
 0x29a   :  { %3999 = vmatprep.subr.bf16.mxu1 %v10317_v13  ;;  %v10410_v13 = vcombine.low %v379_v1, %v387_v2  ;;  %v10427_v15 = vcombine.high %v395_v9, %v403_v10  ;;  %v10426_v28 = vcombine.low %v395_v9, %v403_v10  ;;  %v484_v1 = vld [vmem:[#allocation4 + $0x6f8] sm:$0xff] }
 0x29b   :  { %3918 = vmatpush1.bf16.msra.mxu0 %v10314_v16  ;;  %v10429_v16 = vcombine.high %v396_v11, %v404_v12  ;;  %v500_v9 = vld [vmem:[#allocation4 + $0x778] sm:$0xff] }
 0x29c   :  { %4000 = vmatpush1.bf16.msra.mxu1 %v10316_v17  ;;  %3919 = vmatprep.subr.bf16.mxu0 %v10331_v18  ;;  %v411_v17 = vld [vmem:[#allocation4 + $0x4b0] sm:$0xff] }
 0x29d   :  { %4001 = vmatprep.subr.bf16.mxu1 %v10333_v21  ;;  %v419_v18 = vld [vmem:[#allocation4 + $0x4f0] sm:$0xff]  ;;  %v412_v21 = vld [vmem:[#allocation4 + $0x4b8] sm:$0xff] }
 0x29e   :  { %v10443_v34 = vcombine.high %v411_v17, %v419_v18  ;;  %v10442_v40 = vcombine.low %v411_v17, %v419_v18  ;;  %v10444_v41 = vcombine.low %v412_v21, %v420_v27  ;;  %v516_v17 = vld [vmem:[#allocation4 + $0x7f8] sm:$0xff] }
 0x29f   :  { %3920 = vmatpush1.bf16.msra.mxu0 %v10330_v35  ;;  %v10445_v35 = vcombine.high %v412_v21, %v420_v27 }
 0x2a0   :  { %4002 = vmatpush1.bf16.msra.mxu1 %v10332_v54  ;;  %3921 = vmatprep.subr.bf16.mxu0 %v10347_v37  ;;  %v427_v54 = vld [vmem:[#allocation4 + $0x530] sm:$0xff] }
 0x2a1   :  { %4003 = vmatprep.subr.bf16.mxu1 %v10349_v38  ;;  %v435_v37 = vld [vmem:[#allocation4 + $0x570] sm:$0xff]  ;;  %v428_v38 = vld [vmem:[#allocation4 + $0x538] sm:$0xff] }
 0x2a2   :  { %v10459_v42 = vcombine.high %v427_v54, %v435_v37  ;;  %v10458_v47 = vcombine.low %v427_v54, %v435_v37  ;;  %v10460_v48 = vcombine.low %v428_v38, %v436_v39  ;;  %v532_v54 = vld [vmem:[#allocation4 + $0x878] sm:$0xff] }
 0x2a3   :  { %3922 = vmatpush1.bf16.msra.mxu0 %v10346_v59  ;;  %v10461_v59 = vcombine.high %v428_v38, %v436_v39 }
 0x2a4   :  { %4004 = vmatpush1.bf16.msra.mxu1 %v10348_v43  ;;  %3923 = vmatprep.subr.bf16.mxu0 %v10363_v44  ;;  %v443_v43 = vld [vmem:[#allocation4 + $0x5b0] sm:$0xff] }
 0x2a5   :  { %4005 = vmatprep.subr.bf16.mxu1 %v10365_v45  ;;  %v451_v44 = vld [vmem:[#allocation4 + $0x5f0] sm:$0xff]  ;;  %v444_v45 = vld [vmem:[#allocation4 + $0x5b8] sm:$0xff] }
 0x2a6   :  { %v10475_v49 = vcombine.high %v443_v43, %v451_v44  ;;  %v10474_v56 = vcombine.low %v443_v43, %v451_v44  ;;  %v10476_v24 = vcombine.low %v444_v45, %v452_v46  ;;  %v540_v43 = vld [vmem:[#allocation4 + $0x8b8] sm:$0xff] }
 0x2a7   :  { %3924 = vmatpush1.bf16.msra.mxu0 %v10362_v50  ;;  %v10477_v50 = vcombine.high %v444_v45, %v452_v46  ;;  %v548_v44 = vld [vmem:[#allocation4 + $0x8f8] sm:$0xff] }
 0x2a8   :  { %4006 = vmatpush1.bf16.msra.mxu1 %v10364_v51  ;;  %3925 = vmatprep.subr.bf16.mxu0 %v10379_v52  ;;  %v459_v51 = vld [vmem:[#allocation4 + $0x630] sm:$0xff] }
 0x2a9   :  { %4007 = vmatprep.subr.bf16.mxu1 %v10381_v53  ;;  %v467_v52 = vld [vmem:[#allocation4 + $0x670] sm:$0xff]  ;;  %v460_v53 = vld [vmem:[#allocation4 + $0x638] sm:$0xff] }
 0x2aa   :  { %v10491_v57 = vcombine.high %v459_v51, %v467_v52  ;;  %v10490_v2 = vcombine.low %v459_v51, %v467_v52  ;;  %v10492_v3 = vcombine.low %v460_v53, %v468_v55  ;;  %v564_v51 = vld [vmem:[#allocation4 + $0x978] sm:$0xff] }
 0x2ab   :  { %3926 = vmatpush1.bf16.msra.mxu0 %v10378_v58  ;;  %v10493_v58 = vcombine.high %v460_v53, %v468_v55  ;;  %v10572_v53 = vcombine.low %v540_v43, %v548_v44 }
 0x2ac   :  { %4008 = vmatpush1.bf16.msra.mxu1 %v10380_v60  ;;  %3927 = vmatprep.subr.bf16.mxu0 %v10395_v62  ;;  %v475_v60 = vld [vmem:[#allocation4 + $0x6b0] sm:$0xff] }
 0x2ad   :  { %4009 = vmatprep.subr.bf16.mxu1 %v10397_v63  ;;  %v483_v62 = vld [vmem:[#allocation4 + $0x6f0] sm:$0xff]  ;;  %v476_v63 = vld [vmem:[#allocation4 + $0x6b8] sm:$0xff] }
 0x2ae   :  { %v10507_v33 = vcombine.high %v475_v60, %v483_v62  ;;  %v10506_v10 = vcombine.low %v475_v60, %v483_v62  ;;  %v10508_v11 = vcombine.low %v476_v63, %v484_v1  ;;  %v580_v60 = vld [vmem:[#allocation4 + $0x9f8] sm:$0xff] }
 0x2af   :  { %3928 = vmatpush1.bf16.msra.mxu0 %v10394_v5  ;;  %v10509_v5 = vcombine.high %v476_v63, %v484_v1 }
 0x2b0   :  { %4010 = vmatpush1.bf16.msra.mxu1 %v10396_v6  ;;  %3929 = vmatprep.subr.bf16.mxu0 %v10411_v7  ;;  %v491_v6 = vld [vmem:[#allocation4 + $0x730] sm:$0xff] }
 0x2b1   :  { %4011 = vmatprep.subr.bf16.mxu1 %v10413_v8  ;;  %v499_v7 = vld [vmem:[#allocation4 + $0x770] sm:$0xff]  ;;  %v492_v8 = vld [vmem:[#allocation4 + $0x738] sm:$0xff] }
 0x2b2   :  { %v10523_v12 = vcombine.high %v491_v6, %v499_v7  ;;  %v10522_v18 = vcombine.low %v491_v6, %v499_v7  ;;  %v10524_v21 = vcombine.low %v492_v8, %v500_v9 }
 0x2b3   :  { %3930 = vmatpush1.bf16.msra.mxu0 %v10410_v13  ;;  %v10525_v13 = vcombine.high %v492_v8, %v500_v9  ;;  %v774_v8 = vld [vmem:[#allocation9 + $0x1] ss:$8 sm:$0xf] }
 0x2b4   :  { %4012 = vmatpush1.bf16.msra.mxu1 %v10412_v14  ;;  %3931 = vmatprep.subr.bf16.mxu0 %v10427_v15  ;;  %v507_v14 = vld [vmem:[#allocation4 + $0x7b0] sm:$0xff] }
 0x2b5   :  { %4013 = vmatprep.subr.bf16.mxu1 %v10429_v16  ;;  %v515_v15 = vld [vmem:[#allocation4 + $0x7f0] sm:$0xff]  ;;  %v508_v16 = vld [vmem:[#allocation4 + $0x7b8] sm:$0xff] }
 0x2b6   :  { %v10539_v27 = vcombine.high %v507_v14, %v515_v15  ;;  %v10538_v37 = vcombine.low %v507_v14, %v515_v15  ;;  %v10540_v38 = vcombine.low %v508_v16, %v516_v17  ;;  %v612_v14 = vld [vmem:[#allocation4 + $0xaf8] sm:$0xff] }
 0x2b7   :  { %3932 = vmatpush1.bf16.msra.mxu0 %v10426_v28  ;;  %v10541_v28 = vcombine.high %v508_v16, %v516_v17  ;;  %v13233_v16 = vsub.s32 6, %v13155_v22 }
 0x2b8   :  { %4014 = vmatpush1.bf16.msra.mxu1 %v10428_v32  ;;  %3933 = vmatprep.subr.bf16.mxu0 %v10443_v34  ;;  %v523_v32 = vld [vmem:[#allocation4 + $0x830] sm:$0xff] }
 0x2b9   :  { %4015 = vmatprep.subr.bf16.mxu1 %v10445_v35  ;;  %v531_v34 = vld [vmem:[#allocation4 + $0x870] sm:$0xff]  ;;  %v524_v35 = vld [vmem:[#allocation4 + $0x838] sm:$0xff] }
 0x2ba   :  { %v10555_v39 = vcombine.high %v523_v32, %v531_v34  ;;  %v10556_v45 = vcombine.low %v524_v35, %v532_v54 }
 0x2bb   :  { %3934 = vmatpush1.bf16.msra.mxu0 %v10442_v40  ;;  %v10557_v40 = vcombine.high %v524_v35, %v532_v54  ;;  %v628_v35 = vld [vmem:[#allocation4 + $0xb78] sm:$0xff] }
 0x2bc   :  { %4016 = vmatpush1.bf16.msra.mxu1 %v10444_v41  ;;  %3935 = vmatprep.subr.bf16.mxu0 %v10459_v42  ;;  %v539_v41 = vld [vmem:[#allocation4 + $0x8b0] sm:$0xff] }
 0x2bd   :  { %4017 = vmatprep.subr.bf16.mxu1 %v10461_v59  ;;  %v547_v42 = vld [vmem:[#allocation4 + $0x8f0] sm:$0xff]  ;;  %v10554_v59 = vcombine.low %v523_v32, %v531_v34  ;;  %v620_v34 = vld [vmem:[#allocation4 + $0xb38] sm:$0xff] }
 0x2be   :  { %v10571_v46 = vcombine.high %v539_v41, %v547_v42  ;;  %v10570_v52 = vcombine.low %v539_v41, %v547_v42  ;;  %v627_v32 = vld [vmem:[#allocation4 + $0xb70] sm:$0xff]  ;;  %v10653_v41 = vcombine.high %v620_v34, %v628_v35 }
 0x2bf   :  { %3936 = vmatpush1.bf16.msra.mxu0 %v10458_v47  ;;  %v555_v47 = vld [vmem:[#allocation4 + $0x930] sm:$0xff] }
 0x2c0   :  { %4018 = vmatpush1.bf16.msra.mxu1 %v10460_v48  ;;  %3937 = vmatprep.subr.bf16.mxu0 %v10475_v49  ;;  %v563_v48 = vld [vmem:[#allocation4 + $0x970] sm:$0xff]  ;;  %v10573_v49 = vcombine.high %v540_v43, %v548_v44 }
 0x2c1   :  { %4019 = vmatprep.subr.bf16.mxu1 %v10477_v50  ;;  %v556_v50 = vld [vmem:[#allocation4 + $0x938] sm:$0xff]  ;;  %v10587_v55 = vcombine.high %v555_v47, %v563_v48  ;;  %v10586_v62 = vcombine.low %v555_v47, %v563_v48  ;;  %v635_v42 = vld [vmem:[#allocation4 + $0xbb0] sm:$0xff] }
 0x2c3   :  { %3938 = vmatpush1.bf16.msra.mxu0 %v10474_v56  ;;  %v10589_v56 = vcombine.high %v556_v50, %v564_v51 }
 0x2c4   :  { %4020 = vmatpush1.bf16.msra.mxu1 %v10476_v24  ;;  %3939 = vmatprep.subr.bf16.mxu0 %v10491_v57  ;;  %v571_v24 = vld [vmem:[#allocation4 + $0x9b0] sm:$0xff] }
 0x2c5   :  { %4021 = vmatprep.subr.bf16.mxu1 %v10493_v58  ;;  %v579_v57 = vld [vmem:[#allocation4 + $0x9f0] sm:$0xff]  ;;  %v572_v58 = vld [vmem:[#allocation4 + $0x9b8] sm:$0xff] }
 0x2c6   :  { %v10603_v63 = vcombine.high %v571_v24, %v579_v57  ;;  %v10605_v1 = vcombine.high %v572_v58, %v580_v60  ;;  %v10604_v6 = vcombine.low %v572_v58, %v580_v60  ;;  %v659_v58 = vld [vmem:[#allocation4 + $0xc70] sm:$0xff]  ;;  %v652_v60 = vld [vmem:[#allocation4 + $0xc38] sm:$0xff] }
 0x2c7   :  { %3940 = vmatpush1.bf16.msra.mxu0 %v10490_v2  ;;  %v587_v2 = vld [vmem:[#allocation4 + $0xa30] sm:$0xff] }
 0x2c8   :  { %4022 = vmatpush1.bf16.msra.mxu1 %v10492_v3  ;;  %3941 = vmatprep.subr.bf16.mxu0 %v10507_v33  ;;  %v595_v3 = vld [vmem:[#allocation4 + $0xa70] sm:$0xff]  ;;  %v588_v33 = vld [vmem:[#allocation4 + $0xa38] sm:$0xff] }
 0x2c9   :  { %4023 = vmatprep.subr.bf16.mxu1 %v10509_v5  ;;  %v596_v5 = vld [vmem:[#allocation4 + $0xa78] sm:$0xff]  ;;  %v10619_v7 = vcombine.high %v587_v2, %v595_v3  ;;  %v10618_v15 = vcombine.low %v587_v2, %v595_v3  ;;  %v667_v3 = vld [vmem:[#allocation4 + $0xcb0] sm:$0xff] }
 0x2ca   :  { %v10621_v9 = vcombine.high %v588_v33, %v596_v5  ;;  %v10620_v17 = vcombine.low %v588_v33, %v596_v5  ;;  %v675_v33 = vld [vmem:[#allocation4 + $0xcf0] sm:$0xff]  ;;  %v668_v5 = vld [vmem:[#allocation4 + $0xcb8] sm:$0xff] }
 0x2cb   :  { %3942 = vmatpush1.bf16.msra.mxu0 %v10506_v10  ;;  %v603_v10 = vld [vmem:[#allocation4 + $0xab0] sm:$0xff] }
 0x2cc   :  { %4024 = vmatpush1.bf16.msra.mxu1 %v10508_v11  ;;  %3943 = vmatprep.subr.bf16.mxu0 %v10523_v12  ;;  %v611_v11 = vld [vmem:[#allocation4 + $0xaf0] sm:$0xff] }
 0x2cd   :  { %4025 = vmatprep.subr.bf16.mxu1 %v10525_v13  ;;  %v775_v12 = vld [vmem:[#allocation9 + $0x1] ss:$8 sm:$0xf0] }
 0x2ce   :  { %v604_v13 = vld [vmem:[#allocation4 + $0xab8] sm:$0xff] }
 0x2cf   :  { %3944 = vmatpush1.bf16.msra.mxu0 %v10522_v18  ;;  %v10635_v18 = vcombine.high %v603_v10, %v611_v11 }
 0x2d0   :  { %4026 = vmatpush1.bf16.msra.mxu1 %v10524_v21  ;;  %3945 = vmatprep.subr.bf16.mxu0 %v10539_v27  ;;  %v13235_v21 = vor.u32 %v775_v12, %v774_v8  ;;  %v10637_v27 = vcombine.high %v604_v13, %v612_v14  ;;  %v10699_v8 = vcombine.high %v667_v3, %v675_v33  ;;  %v684_v12 = vld [vmem:[#allocation4 + $0xd38] sm:$0xff] }
 0x2d1   :  { %4027 = vmatprep.subr.bf16.mxu1 %v10541_v28  ;;  %v619_v28 = vld [vmem:[#allocation4 + $0xb30] sm:$0xff] }
 0x2d2   :  { %v810_v54 = vrot.slane %v13235_v21, %v13233_v16 }
 0x2d3   :  { %3946 = vmatpush1.bf16.msra.mxu0 %v10538_v37  ;;  %v10634_v37 = vcombine.low %v603_v10, %v611_v11  ;;  %v683_v10 = vld [vmem:[#allocation4 + $0xd30] sm:$0xff] }
 0x2d4   :  { %4028 = vmatpush1.bf16.msra.mxu1 %v10540_v38  ;;  %3956 = vmatprep.subr.bf16.mxu0 %v10555_v39  ;;  %v10636_v38 = vcombine.low %v604_v13, %v612_v14  ;;  %v10651_v39 = vcombine.high %v619_v28, %v627_v32  ;;  %v691_v11 = vld [vmem:[#allocation4 + $0xd70] sm:$0xff]  ;;  %v692_v13 = vld [vmem:[#allocation4 + $0xd78] sm:$0xff]  ;;  %v10698_v14 = vcombine.low %v667_v3, %v675_v33 }
 0x2d5   :  { %4038 = vmatprep.subr.bf16.mxu1 %v10557_v40  ;;  %v756_v3 = vld [vmem:[#allocation4 + $0xf78] sm:$0xff] }
 0x2d6   :  { %3948 = vmatmul.mubr.bf16.vlgmr.msra.gmra.mrb[16].mxu0 %v13178_v61 }
 0x2d7   :  { %4030 = vmatmul.mubr.bf16.vlgmr.msra.gmra.mrb[16].mxu1 %v13178_v61  ;;  %3957 = vmatpush1.bf16.msra.mxu0 %v10554_v59  ;;  %v10588_v61 = vcombine.low %v556_v50, %v564_v51  ;;  %v643_v59 = vld [vmem:[#allocation4 + $0xbf0] sm:$0xff]  ;;  %v10650_v50 = vcombine.low %v619_v28, %v627_v32  ;;  %v700_v32 = vld [vmem:[#allocation4 + $0xdb8] sm:$0xff] }
 0x2d8   :  { %3988 = vmatprep.mubr.bf16.mxu0 %v13182_v4  ;;  %4039 = vmatpush1.bf16.msra.mxu1 %v10556_v45  ;;  %v636_v45 = vld [vmem:[#allocation4 + $0xbb8] sm:$0xff]  ;;  %v707_v28 = vld [vmem:[#allocation4 + $0xdf0] sm:$0xff] }
 0x2d9   :  { %4070 = vmatprep.mubr.bf16.mxu1 %v13182_v4  ;;  %3958 = vmatprep.subr.bf16.mxu0 %v10571_v46  ;;  %v10602_v4 = vcombine.low %v571_v24, %v579_v57  ;;  %v644_v46 = vld [vmem:[#allocation4 + $0xbf8] sm:$0xff]  ;;  %v651_v57 = vld [vmem:[#allocation4 + $0xc30] sm:$0xff] }
 0x2da   :  { %4040 = vmatprep.subr.bf16.mxu1 %v10573_v49  ;;  %v10669_v24 = vcombine.high %v636_v45, %v644_v46 }
 0x2db   :  { %3959 = vmatpush1.bf16.msra.mxu0 %v10570_v52 }
 0x2dc   :  { %4041 = vmatpush1.bf16.msra.mxu1 %v10572_v53  ;;  %3960 = vmatprep.subr.bf16.mxu0 %v10587_v55  ;;  %v10652_v53 = vcombine.low %v620_v34, %v628_v35  ;;  %v10667_v55 = vcombine.high %v635_v42, %v643_v59  ;;  %v708_v34 = vld [vmem:[#allocation4 + $0xdf8] sm:$0xff]  ;;  %v10714_v35 = vcombine.low %v683_v10, %v691_v11 }
 0x2dd   :  { %4042 = vmatprep.subr.bf16.mxu1 %v10589_v56 }
 0x2df   :  { %3961 = vmatpush1.bf16.msra.mxu0 %v10586_v62  ;;  %v660_v62 = vld [vmem:[#allocation4 + $0xc78] sm:$0xff] }
 0x2e0   :  { %4043 = vmatpush1.bf16.msra.mxu1 %v10588_v61  ;;  %3962 = vmatprep.subr.bf16.mxu0 %v10603_v63  ;;  %v10666_v61 = vcombine.low %v635_v42, %v643_v59  ;;  %v10668_v63 = vcombine.low %v636_v45, %v644_v46  ;;  %v10685_v2 = vcombine.high %v652_v60, %v660_v62  ;;  %v716_v42 = vld [vmem:[#allocation4 + $0xe38] sm:$0xff] }
 0x2e1   :  { %4044 = vmatprep.subr.bf16.mxu1 %v10605_v1  ;;  %v10683_v1 = vcombine.high %v651_v57, %v659_v58  ;;  %v724_v59 = vld [vmem:[#allocation4 + $0xe78] sm:$0xff]  ;;  %v10732_v45 = vcombine.low %v700_v32, %v708_v34 }
 0x2e3   :  { %3963 = vmatpush1.bf16.msra.mxu0 %v10602_v4  ;;  %v676_v4 = vld [vmem:[#allocation4 + $0xcf8] sm:$0xff] }
 0x2e4   :  { %4045 = vmatpush1.bf16.msra.mxu1 %v10604_v6  ;;  %3964 = vmatprep.subr.bf16.mxu0 %v10619_v7  ;;  %v10682_v6 = vcombine.low %v651_v57, %v659_v58  ;;  %v10684_v7 = vcombine.low %v652_v60, %v660_v62  ;;  %v10748_v57 = vcombine.low %v716_v42, %v724_v59 }
 0x2e5   :  { %4046 = vmatprep.subr.bf16.mxu1 %v10621_v9  ;;  %v10701_v9 = vcombine.high %v668_v5, %v676_v4 }
 0x2e7   :  { %3965 = vmatpush1.bf16.msra.mxu0 %v10618_v15  ;;  %v10700_v15 = vcombine.low %v668_v5, %v676_v4 }
 0x2e8   :  { %4047 = vmatpush1.bf16.msra.mxu1 %v10620_v17  ;;  %3966 = vmatprep.subr.bf16.mxu0 %v10635_v18  ;;  %v10715_v17 = vcombine.high %v683_v10, %v691_v11  ;;  %v10717_v18 = vcombine.high %v684_v12, %v692_v13 }
 0x2e9   :  { %v13239_v40 = vpop.f32.mrb[8].mxu0  ;;  %4048 = vmatprep.subr.bf16.mxu1 %v10637_v27  ;;  %v699_v27 = vld [vmem:[#allocation4 + $0xdb0] sm:$0xff] }
 0x2ea   :  { %v3744_v43 = vpop.f32.mrb[8].mxu1  ;;  %v13241_v44 = vpop.f32.mrb[9].mxu0 }
 0x2eb   :  { %v13243_v47 = vadd.f32 %v3744_v43, %v810_v54  ;;  %v13245_v48 = vpop.f32.mrb[9].mxu1  ;;  %v3666_v49 = vpop.f32.mrb[10].mxu0  ;;  %3967 = vmatpush1.bf16.msra.mxu0 %v10634_v37  ;;  %v10716_v54 = vcombine.low %v684_v12, %v692_v13  ;;  %v10731_v37 = vcombine.high %v699_v27, %v707_v28  ;;  %v10730_v43 = vcombine.low %v699_v27, %v707_v28  ;;  %v11870_v27 = vld [vmem:[%s13932_s3] sm:$0xff]  }
 0x2ec   :  { %v3748_v51 = vpop.f32.mrb[10].mxu1  ;;  %4049 = vmatpush1.bf16.msra.mxu1 %v10636_v38  ;;  %v3667_v52 = vpop.f32.mrb[11].mxu0  ;;  %3968 = vmatprep.subr.bf16.mxu0 %v10651_v39  ;;  %v10733_v38 = vcombine.high %v700_v32, %v708_v34  ;;  %v715_v39 = vld [vmem:[#allocation4 + $0xe30] sm:$0xff]  ;;  %v790_v49 = vrot.slane %v13235_v21, %v13163_v25  ;;  %v11872_v34 = vld [vmem:[%s13932_s3 + $0x48] sm:$0xff]  }
 0x2ed   :  { %v3749_v56 = vpop.f32.mrb[11].mxu1  ;;  %4050 = vmatprep.subr.bf16.mxu1 %v10653_v41  ;;  %v723_v41 = vld [vmem:[#allocation4 + $0xe70] sm:$0xff] }
 0x2ee   :  { %v10747_v46 = vcombine.high %v715_v39, %v723_v41  ;;  %v731_v51 = vld [vmem:[#allocation4 + $0xeb0] sm:$0xff]  ;;  %v740_v56 = vld [vmem:[#allocation4 + $0xef8] sm:$0xff]  ;;  %v11747_v60 = vadd.f32 %v13220_v29, %v790_v49  ;;  %v13301_v49 = vsub.s32 7, %v13155_v22 }
 0x2ef   :  { %3969 = vmatpush1.bf16.msra.mxu0 %v10650_v50  ;;  %v10749_v50 = vcombine.high %v716_v42, %v724_v59  ;;  %v739_v52 = vld [vmem:[#allocation4 + $0xef0] sm:$0xff]  ;;  %v764_v29 = vld [vmem:[#allocation4 + $0xfb8] sm:$0xff]  ;;  %v11878_v42 = vld [vmem:[%s13932_s3 + $0x10] sm:$0xff]  }
 0x2f0   :  { %4051 = vmatpush1.bf16.msra.mxu1 %v10652_v53  ;;  %3970 = vmatprep.subr.bf16.mxu0 %v10667_v55  ;;  %v798_v53 = vrot.slane %v13235_v21, %v13166_v26  ;;  %v732_v55 = vld [vmem:[#allocation4 + $0xeb8] sm:$0xff]  ;;  %v10763_v58 = vcombine.high %v731_v51, %v739_v52  ;;  %v10762_v33 = vcombine.low %v731_v51, %v739_v52  ;;  %12812 = vtanh.f32 %v11747_v60  ;;  %v11871_v32 = vld [vmem:[%s13932_s3 + $0x80] sm:$0xff]   ;;  %v11879_v59 = vld [vmem:[%s13932_s3 + $0x90] sm:$0xff]  }
 0x2f1   :  { %4052 = vmatprep.subr.bf16.mxu1 %v10669_v24  ;;  %v10746_v24 = vcombine.low %v715_v39, %v723_v41  ;;  %v10765_v62 = vcombine.high %v732_v55, %v740_v56  ;;  %v10764_v5 = vcombine.low %v732_v55, %v740_v56  ;;  %v11875_v39 = vld [vmem:[%s13932_s3 + $0x88] sm:$0xff]   ;;  %v11876_v41 = vld [vmem:[%s13932_s3 + $0x50] sm:$0xff]   ;;  %v11882_v51 = vld [vmem:[%s13932_s3 + $0x18] sm:$0xff]   ;;  %v794_v52 = vrot.slane %v13235_v21, %v13189_v36 }
 0x2f2   :  { %v11884_v55 = vld [vmem:[%s13932_s3 + $0x60] sm:$0xff]  }
 0x2f3   :  { %3971 = vmatpush1.bf16.msra.mxu0 %v10666_v61  ;;  %v747_v61 = vld [vmem:[#allocation4 + $0xf30] sm:$0xff] }
 0x2f4   :  { %4053 = vmatpush1.bf16.msra.mxu1 %v10668_v63  ;;  %3972 = vmatprep.subr.bf16.mxu0 %v10683_v1  ;;  %v755_v63 = vld [vmem:[#allocation4 + $0xf70] sm:$0xff]  ;;  %v11749_v1 = vadd.f32 %v13222_v31, %v798_v53  ;;  %v11883_v53 = vld [vmem:[%s13932_s3 + $0x98] sm:$0xff]  }
 0x2f5   :  { %4054 = vmatprep.subr.bf16.mxu1 %v10685_v2  ;;  %v748_v2 = vld [vmem:[#allocation4 + $0xf38] sm:$0xff]  ;;  %v10779_v4 = vcombine.high %v747_v61, %v755_v63  ;;  %v10778_v10 = vcombine.low %v747_v61, %v755_v63  ;;  %v11886_v60 = vld [vmem:[%s13932_s3 + $0x20] sm:$0xff]  }
 0x2f6   :  { %12814 = vtanh.f32 %v11749_v1  ;;  %v10780_v31 = vcombine.low %v748_v2, %v756_v3  ;;  %v11887_v61 = vld [vmem:[%s13932_s3 + $0xa0] sm:$0xff]   ;;  %v11888_v63 = vld [vmem:[%s13932_s3 + $0x68] sm:$0xff]  }
 0x2f7   :  { %3973 = vmatpush1.bf16.msra.mxu0 %v10682_v6  ;;  %v10781_v6 = vcombine.high %v748_v2, %v756_v3  ;;  %v11892_v3 = vld [vmem:[%s13932_s3 + $0x70] sm:$0xff]  }
 0x2f8   :  { %4055 = vmatpush1.bf16.msra.mxu1 %v10684_v7  ;;  %3974 = vmatprep.subr.bf16.mxu0 %v10699_v8  ;;  %v763_v7 = vld [vmem:[#allocation4 + $0xfb0] sm:$0xff] }
 0x2f9   :  { %4056 = vmatprep.subr.bf16.mxu1 %v10701_v9  ;;  %v771_v8 = vld [vmem:[#allocation4 + $0xff0] sm:$0xff]  ;;  %v772_v9 = vld [vmem:[#allocation4 + $0xff8] sm:$0xff] }
 0x2fa   :  { %v10795_v11 = vcombine.high %v763_v7, %v771_v8  ;;  %v10797_v12 = vcombine.high %v764_v29, %v772_v9  ;;  %v10794_v13 = vcombine.low %v763_v7, %v771_v8  ;;  %v11898_v7 = vld [vmem:[%s13932_s3 + $0x38] sm:$0xff]  }
 0x2fb   :  { %3975 = vmatpush1.bf16.msra.mxu0 %v10698_v14  ;;  %v10796_v14 = vcombine.low %v764_v29, %v772_v9  ;;  %v11899_v8 = vld [vmem:[%s13932_s3 + $0xb8] sm:$0xff]   ;;  %v11900_v29 = vld [vmem:[%s13932_s3 + $0x140] sm:$0xff]  }
 0x2fc   :  { %4057 = vmatpush1.bf16.msra.mxu1 %v10700_v15  ;;  %3976 = vmatprep.subr.bf16.mxu0 %v10715_v17  ;;  %v11868_v15 = vld [vmem:[%s13932_s3 + $0x40] sm:$0xff]  }
 0x2fd   :  { %4058 = vmatprep.subr.bf16.mxu1 %v10717_v18  ;;  %v11869_v17 = vld [vmem:[%s13932_s3 + $0xc0] sm:$0xff]   ;;  %v12813_v18 = vpop.eup %12812 }
 0x2ff   :  { %3977 = vmatpush1.bf16.msra.mxu0 %v10714_v35  ;;  %v4096_v35 = vpack.c.bf16 %v12813_v18, %v12813_v18  ;;  %v11904_v18 = vld [vmem:[%s13932_s3 + $0x148] sm:$0xff]  }
 0x300   :  { %4059 = vmatpush1.bf16.msra.mxu1 %v10716_v54  ;;  %3978 = vmatprep.subr.bf16.mxu0 %v10731_v37  ;;  %v12815_v28 = vpop.eup %12814  ;;  %v11873_v54 = vld [vmem:[%s13932_s3 + $0xc8] sm:$0xff]  }
 0x301   :  { %4060 = vmatprep.subr.bf16.mxu1 %v10733_v38  ;;  %v4098_v37 = vpack.c.bf16 %v12815_v28, %v12815_v28  ;;  %v11874_v38 = vld [vmem:[%s13932_s3 + $0x8] sm:$0xff]  }
 0x302   :  { %v11905_v28 = vld [vmem:[%s13932_s3 + $0x1c8] sm:$0xff]  }
 0x303   :  { %3979 = vmatpush1.bf16.msra.mxu0 %v10730_v43  ;;  %v11880_v43 = vld [vmem:[%s13932_s3 + $0x58] sm:$0xff]  }
 0x304   :  { %4061 = vmatpush1.bf16.msra.mxu1 %v10732_v45  ;;  %3980 = vmatprep.subr.bf16.mxu0 %v10747_v46  ;;  %v13295_v45 = vsub.s32 5, %v13155_v22  ;;  %v11881_v46 = vld [vmem:[%s13932_s3 + $0xd8] sm:$0xff]  }
 0x305   :  { %4062 = vmatprep.subr.bf16.mxu1 %v10749_v50  ;;  %v786_v50 = vrot.slane %v13235_v21, %v13158_v23 }
 0x306   :  { %v806_v56 = vrot.slane %v13235_v21, %v13295_v45 }
 0x307   :  { %3981 = vmatpush1.bf16.msra.mxu0 %v10746_v24  ;;  %v11885_v24 = vld [vmem:[%s13932_s3 + $0xe0] sm:$0xff]  }
 0x308   :  { %4063 = vmatpush1.bf16.msra.mxu1 %v10748_v57  ;;  %3982 = vmatprep.subr.bf16.mxu0 %v10763_v58  ;;  %v814_v57 = vrot.slane %v13235_v21, %v13301_v49  ;;  %v11746_v58 = vadd.f32 %v13216_v19, %v786_v50  ;;  %v11751_v1 = vadd.f32 %v13241_v44, %v806_v56  ;;  %v11889_v19 = vld [vmem:[%s13932_s3 + $0xe8] sm:$0xff]  }
 0x309   :  { %4064 = vmatprep.subr.bf16.mxu1 %v10765_v62  ;;  %v11748_v62 = vadd.f32 %v13218_v20, %v794_v52  ;;  %v11890_v20 = vld [vmem:[%s13932_s3 + $0x28] sm:$0xff]   ;;  %v11919_v52 = vld [vmem:[%s13932_s3 + $0x1a0] sm:$0xff]  }
 0x30a   :  { %v11753_v2 = vadd.f32 %v13245_v48, %v814_v57  ;;  %12816 = vtanh.f32 %v11746_v58  ;;  %v11891_v44 = vld [vmem:[%s13932_s3 + $0xa8] sm:$0xff]   ;;  %v11893_v48 = vld [vmem:[%s13932_s3 + $0xf0] sm:$0xff]  }
 0x30b   :  { %3983 = vmatpush1.bf16.msra.mxu0 %v10762_v33  ;;  %12818 = vtanh.f32 %v11748_v62  ;;  %v11894_v33 = vld [vmem:[%s13932_s3 + $0x30] sm:$0xff]   ;;  %v11923_v56 = vld [vmem:[%s13932_s3 + $0x1a8] sm:$0xff]   ;;  %v11929_v62 = vld [vmem:[%s13932_s3 + $0x1f8] sm:$0xff]  }
 0x30c   :  { %4065 = vmatpush1.bf16.msra.mxu1 %v10764_v5  ;;  %3984 = vmatprep.subr.bf16.mxu0 %v10779_v4  ;;  %12820 = vtanh.f32 %v11751_v1  ;;  %v11895_v5 = vld [vmem:[%s13932_s3 + $0xb0] sm:$0xff]   ;;  %v11896_v4 = vld [vmem:[%s13932_s3 + $0x78] sm:$0xff]   ;;  %v11932_v1 = vld [vmem:[%s13932_s3 + $0x240] sm:$0xff]  }
 0x30d   :  { %4066 = vmatprep.subr.bf16.mxu1 %v10781_v6  ;;  %12822 = vtanh.f32 %v11753_v2  ;;  %v11897_v6 = vld [vmem:[%s13932_s3 + $0xf8] sm:$0xff]   ;;  %v11925_v57 = vld [vmem:[%s13932_s3 + $0x1f0] sm:$0xff]   ;;  %v11933_v2 = vld [vmem:[%s13932_s3 + $0x2c0] sm:$0xff]  }
 0x30e   :  { %v11927_v58 = vld [vmem:[%s13932_s3 + $0x1b0] sm:$0xff]  }
 0x30f   :  { %3985 = vmatpush1.bf16.msra.mxu0 %v10778_v10  ;;  %v11901_v10 = vld [vmem:[%s13932_s3 + $0x1c0] sm:$0xff]  }
 0x310   :  { %4067 = vmatpush1.bf16.msra.mxu1 %v10780_v31  ;;  %3986 = vmatprep.subr.bf16.mxu0 %v10795_v11 }
 0x311   :  { %4068 = vmatprep.subr.bf16.mxu1 %v10797_v12  ;;  %v11902_v12 = vld [vmem:[%s13932_s3 + $0x100] sm:$0xff]  }
 0x313   :  { %3987 = vmatpush1.bf16.msra.mxu0 %v10794_v13 }
 0x314   :  { %4069 = vmatpush1.bf16.msra.mxu1 %v10796_v14  ;;  %11526 = vmatprep.subr.bf16.mxu0 %v11868_v15  ;;  %v12817_v9 = vpop.eup %12816  ;;  %v11903_v15 = vld [vmem:[%s13932_s3 + $0x180] sm:$0xff]  }
 0x315   :  { %11548 = vmatprep.subr.bf16.mxu1 %v11869_v17  ;;  %v12819_v31 = vpop.eup %12818  ;;  %v4095_v14 = vpack.c.bf16 %v12817_v9, %v12817_v9  ;;  %v11942_v9 = vld [vmem:[%s13932_s3 + $0x210] sm:$0xff]  }
 0x316   :  { %3989 = vmatmul.mubr.bf16.vlgmr.msra.gmra.mrb[16].mxu0 %v13198_v30  ;;  %v12821_v11 = vpop.eup %12820  ;;  %v4097_v17 = vpack.c.bf16 %v12819_v31, %v12819_v31  ;;  %v11944_v31 = vld [vmem:[%s13932_s3 + $0x258] sm:$0xff]  }
 0x317   :  { %4071 = vmatmul.mubr.bf16.vlgmr.msra.gmra.mrb[16].mxu1 %v13198_v30  ;;  %11527 = vmatpush3.bf16.msra.mxu0 %v11870_v27  ;;  %v11877_v30 = vld [vmem:[%s13932_s3 + $0xd0] sm:$0xff]   ;;  %v12823_v13 = vpop.eup %12822  ;;  %v4100_v27 = vpack.c.bf16 %v12821_v11, %v12821_v11  ;;  %v11945_v11 = vld [vmem:[%s13932_s3 + $0x2d8] sm:$0xff]  }
 0x318   :  { %5168 = vmatprep.mubr.bf16.mxu0 %v4096_v35  ;;  %11549 = vmatpush3.bf16.msra.mxu1 %v11871_v32  ;;  %v4102_v32 = vpack.c.bf16 %v12823_v13, %v12823_v13  ;;  %v11907_v35 = vld [vmem:[%s13932_s3 + $0x188] sm:$0xff]  }
 0x319   :  { %5208 = vmatprep.mubr.bf16.mxu1 %v4098_v37  ;;  %11528 = vmatprep.subr.bf16.mxu0 %v11872_v34  ;;  %v11906_v34 = vld [vmem:[%s13932_s3 + $0x108] sm:$0xff]   ;;  %v11909_v37 = vld [vmem:[%s13932_s3 + $0x1d0] sm:$0xff]  }
 0x31a   :  { %11550 = vmatprep.subr.bf16.mxu1 %v11873_v54  ;;  %v11908_v54 = vld [vmem:[%s13932_s3 + $0x150] sm:$0xff]  }
 0x31b   :  { %11529 = vmatpush3.bf16.msra.mxu0 %v11874_v38  ;;  %v13400_v38 = vsub.s32 4, %v13155_v22  ;;  %v11913_v22 = vld [vmem:[%s13932_s3 + $0x1d8] sm:$0xff]  }
 0x31c   :  { %11551 = vmatpush3.bf16.msra.mxu1 %v11875_v39  ;;  %11530 = vmatprep.subr.bf16.mxu0 %v11876_v41  ;;  %v11910_v39 = vld [vmem:[%s13932_s3 + $0x110] sm:$0xff]  }
 0x31d   :  { %11552 = vmatprep.subr.bf16.mxu1 %v11877_v30  ;;  %v11911_v41 = vld [vmem:[%s13932_s3 + $0x190] sm:$0xff]   ;;  %v11912_v30 = vld [vmem:[%s13932_s3 + $0x158] sm:$0xff]  }
 0x31e   :  { %v778_v13 = vld [vmem:[#allocation9 + $0x41] ss:$8 sm:$0xf] }
 0x31f   :  { %11531 = vmatpush3.bf16.msra.mxu0 %v11878_v42  ;;  %v802_v42 = vrot.slane %v13235_v21, %v13400_v38  ;;  %v11917_v21 = vld [vmem:[%s13932_s3 + $0x1e0] sm:$0xff]  }
 0x320   :  { %11553 = vmatpush3.bf16.msra.mxu1 %v11879_v59  ;;  %11532 = vmatprep.subr.bf16.mxu0 %v11880_v43  ;;  %v11914_v59 = vld [vmem:[%s13932_s3 + $0x118] sm:$0xff]  }
 0x321   :  { %11554 = vmatprep.subr.bf16.mxu1 %v11881_v46  ;;  %v11915_v43 = vld [vmem:[%s13932_s3 + $0x198] sm:$0xff]   ;;  %v11916_v46 = vld [vmem:[%s13932_s3 + $0x160] sm:$0xff]   ;;  %v11750_v50 = vadd.f32 %v13239_v40, %v802_v42  ;;  %v11921_v40 = vld [vmem:[%s13932_s3 + $0x1e8] sm:$0xff]  }
 0x322   :  { %v11956_v42 = vld [vmem:[%s13932_s3 + $0x270] sm:$0xff]  }
 0x323   :  { %11533 = vmatpush3.bf16.msra.mxu0 %v11882_v51  ;;  %v11918_v51 = vld [vmem:[%s13932_s3 + $0x120] sm:$0xff]   ;;  %12824 = vtanh.f32 %v11750_v50 }
 0x324   :  { %11555 = vmatpush3.bf16.msra.mxu1 %v11883_v53  ;;  %11534 = vmatprep.subr.bf16.mxu0 %v11884_v55  ;;  %v11920_v53 = vld [vmem:[%s13932_s3 + $0x168] sm:$0xff]   ;;  %12826 = vtanh.f32 %v13243_v47  ;;  %v11926_v47 = vld [vmem:[%s13932_s3 + $0x130] sm:$0xff]  }
 0x325   :  { %11556 = vmatprep.subr.bf16.mxu1 %v11885_v24  ;;  %v11922_v55 = vld [vmem:[%s13932_s3 + $0x128] sm:$0xff]   ;;  %v11924_v24 = vld [vmem:[%s13932_s3 + $0x170] sm:$0xff]  }
 0x327   :  { %11535 = vmatpush3.bf16.msra.mxu0 %v11886_v60  ;;  %v11928_v60 = vld [vmem:[%s13932_s3 + $0x178] sm:$0xff]  }
 0x328   :  { %11557 = vmatpush3.bf16.msra.mxu1 %v11887_v61  ;;  %11536 = vmatprep.subr.bf16.mxu0 %v11888_v63  ;;  %v11930_v61 = vld [vmem:[%s13932_s3 + $0x138] sm:$0xff]  }
 0x329   :  { %11558 = vmatprep.subr.bf16.mxu1 %v11889_v19  ;;  %v11931_v63 = vld [vmem:[%s13932_s3 + $0x1b8] sm:$0xff]  }
 0x32b   :  { %11537 = vmatpush3.bf16.msra.mxu0 %v11890_v20 }
 0x32c   :  { %11559 = vmatpush3.bf16.msra.mxu1 %v11891_v44  ;;  %11538 = vmatprep.subr.bf16.mxu0 %v11892_v3  ;;  %v11934_v44 = vld [vmem:[%s13932_s3 + $0x200] sm:$0xff]  }
 0x32d   :  { %11560 = vmatprep.subr.bf16.mxu1 %v11893_v48  ;;  %v12825_v19 = vpop.eup %12824  ;;  %v11935_v48 = vld [vmem:[%s13932_s3 + $0x280] sm:$0xff]  }
 0x32e   :  { %v12827_v20 = vpop.eup %12826  ;;  %v4099_v3 = vpack.c.bf16 %v12825_v19, %v12825_v19  ;;  %v11965_v19 = vld [vmem:[%s13932_s3 + $0x3c0] sm:$0xff]  }
 0x32f   :  { %11539 = vmatpush3.bf16.msra.mxu0 %v11894_v33  ;;  %v11936_v33 = vld [vmem:[%s13932_s3 + $0x248] sm:$0xff]  }
 0x330   :  { %11561 = vmatpush3.bf16.msra.mxu1 %v11895_v5  ;;  %11540 = vmatprep.subr.bf16.mxu0 %v11896_v4  ;;  %v4101_v5 = vpack.c.bf16 %v12827_v20, %v12827_v20  ;;  %v11937_v4 = vld [vmem:[%s13932_s3 + $0x2c8] sm:$0xff]  }
 0x331   :  { %11562 = vmatprep.subr.bf16.mxu1 %v11897_v6  ;;  %v11938_v6 = vld [vmem:[%s13932_s3 + $0x208] sm:$0xff]  }
 0x333   :  { %11541 = vmatpush3.bf16.msra.mxu0 %v11898_v7  ;;  %v11939_v7 = vld [vmem:[%s13932_s3 + $0x288] sm:$0xff]  }
 0x334   :  { %11563 = vmatpush3.bf16.msra.mxu1 %v11899_v8  ;;  %11570 = vmatprep.subr.bf16.mxu0 %v11900_v29  ;;  %v11940_v8 = vld [vmem:[%s13932_s3 + $0x250] sm:$0xff]  }
 0x335   :  { %11592 = vmatprep.subr.bf16.mxu1 %v11901_v10  ;;  %v11941_v29 = vld [vmem:[%s13932_s3 + $0x2d0] sm:$0xff]  }
 0x336   :  { %5169 = vmatmul.mubr.bf16.vlgmr.msra.gmra.mrb[20].mxu0 %v4095_v14  ;;  %v11943_v10 = vld [vmem:[%s13932_s3 + $0x290] sm:$0xff]  }
 0x337   :  { %5209 = vmatmul.mubr.bf16.vlgmr.msra.gmra.mrb[20].mxu1 %v4097_v17  ;;  %11571 = vmatpush3.bf16.msra.mxu0 %v11902_v12  ;;  %v11946_v12 = vld [vmem:[%s13932_s3 + $0x218] sm:$0xff]   ;;  %v11948_v17 = vld [vmem:[%s13932_s3 + $0x260] sm:$0xff]  }
 0x338   :  { %5248 = vmatprep.mubr.bf16.mxu0 %v4100_v27  ;;  %11593 = vmatpush3.bf16.msra.mxu1 %v11903_v15  ;;  %v779_v14 = vld [vmem:[#allocation9 + $0x41] ss:$8 sm:$0xf0] }
 0x339   :  { %5288 = vmatprep.mubr.bf16.mxu1 %v4102_v32  ;;  %11572 = vmatprep.subr.bf16.mxu0 %v11904_v18  ;;  %v11947_v15 = vld [vmem:[%s13932_s3 + $0x298] sm:$0xff]   ;;  %v11949_v18 = vld [vmem:[%s13932_s3 + $0x2e0] sm:$0xff]   ;;  %v13526_v27 = vor.u32 %v779_v14, %v778_v13  ;;  %v11975_v13 = vld [vmem:[%s13932_s3 + $0x390] sm:$0xff]  }
 0x33a   :  { %11594 = vmatprep.subr.bf16.mxu1 %v11905_v28  ;;  %v11950_v28 = vld [vmem:[%s13932_s3 + $0x220] sm:$0xff]   ;;  %v11976_v14 = vld [vmem:[%s13932_s3 + $0x358] sm:$0xff]  }
 0x33b   :  { %11573 = vmatpush3.bf16.msra.mxu0 %v11906_v34  ;;  %v11951_v32 = vld [vmem:[%s13932_s3 + $0x2a0] sm:$0xff]   ;;  %v11952_v34 = vld [vmem:[%s13932_s3 + $0x268] sm:$0xff]  }
 0x33c   :  { %11595 = vmatpush3.bf16.msra.mxu1 %v11907_v35  ;;  %11574 = vmatprep.subr.bf16.mxu0 %v11908_v54  ;;  %v11953_v35 = vld [vmem:[%s13932_s3 + $0x2e8] sm:$0xff]   ;;  %v818_v54 = vrot.slane %v13526_v27, %v13158_v23 }
 0x33d   :  { %11596 = vmatprep.subr.bf16.mxu1 %v11909_v37  ;;  %v826_v37 = vrot.slane %v13526_v27, %v13189_v36 }
 0x33f   :  { %11575 = vmatpush3.bf16.msra.mxu0 %v11910_v39  ;;  %v822_v39 = vrot.slane %v13526_v27, %v13163_v25 }
 0x340   :  { %11597 = vmatpush3.bf16.msra.mxu1 %v11911_v41  ;;  %11576 = vmatprep.subr.bf16.mxu0 %v11912_v30  ;;  %v11954_v41 = vld [vmem:[%s13932_s3 + $0x228] sm:$0xff]   ;;  %v830_v30 = vrot.slane %v13526_v27, %v13166_v26 }
 0x341   :  { %11598 = vmatprep.subr.bf16.mxu1 %v11913_v22  ;;  %v11955_v22 = vld [vmem:[%s13932_s3 + $0x2a8] sm:$0xff]  }
 0x343   :  { %11577 = vmatpush3.bf16.msra.mxu0 %v11914_v59 }
 0x344   :  { %11599 = vmatpush3.bf16.msra.mxu1 %v11915_v43  ;;  %11578 = vmatprep.subr.bf16.mxu0 %v11916_v46  ;;  %v11957_v43 = vld [vmem:[%s13932_s3 + $0x2f0] sm:$0xff]  }
 0x345   :  { %11600 = vmatprep.subr.bf16.mxu1 %v11917_v21 }
 0x347   :  { %11579 = vmatpush3.bf16.msra.mxu0 %v11918_v51 }
 0x348   :  { %11601 = vmatpush3.bf16.msra.mxu1 %v11919_v52  ;;  %11580 = vmatprep.subr.bf16.mxu0 %v11920_v53 }
 0x349   :  { %11602 = vmatprep.subr.bf16.mxu1 %v11921_v40 }
 0x34b   :  { %11581 = vmatpush3.bf16.msra.mxu0 %v11922_v55  ;;  %v11958_v55 = vld [vmem:[%s13932_s3 + $0x230] sm:$0xff]  }
 0x34c   :  { %11603 = vmatpush3.bf16.msra.mxu1 %v11923_v56  ;;  %11582 = vmatprep.subr.bf16.mxu0 %v11924_v24 }
 0x34d   :  { %11604 = vmatprep.subr.bf16.mxu1 %v11925_v57 }
 0x34f   :  { %11583 = vmatpush3.bf16.msra.mxu0 %v11926_v47  ;;  %v11959_v47 = vld [vmem:[%s13932_s3 + $0x2b0] sm:$0xff]  }
 0x350   :  { %11605 = vmatpush3.bf16.msra.mxu1 %v11927_v58  ;;  %11584 = vmatprep.subr.bf16.mxu0 %v11928_v60  ;;  %v11960_v58 = vld [vmem:[%s13932_s3 + $0x278] sm:$0xff]  }
 0x351   :  { %11606 = vmatprep.subr.bf16.mxu1 %v11929_v62  ;;  %v11961_v62 = vld [vmem:[%s13932_s3 + $0x2f8] sm:$0xff]  }
 0x353   :  { %11585 = vmatpush3.bf16.msra.mxu0 %v11930_v61  ;;  %v11962_v61 = vld [vmem:[%s13932_s3 + $0x238] sm:$0xff]  }
 0x354   :  { %11607 = vmatpush3.bf16.msra.mxu1 %v11931_v63  ;;  %11614 = vmatprep.subr.bf16.mxu0 %v11932_v1  ;;  %v11963_v63 = vld [vmem:[%s13932_s3 + $0x2b8] sm:$0xff]   ;;  %v11964_v1 = vld [vmem:[%s13932_s3 + $0x340] sm:$0xff]  }
 0x355   :  { %11636 = vmatprep.subr.bf16.mxu1 %v11933_v2 }
 0x356   :  { %5249 = vmatmul.mubr.bf16.vlgmr.msra.gmra.mrb[24].mxu0 %v4099_v3 }
 0x357   :  { %5289 = vmatmul.mubr.bf16.vlgmr.msra.gmra.mrb[24].mxu1 %v4101_v5  ;;  %11615 = vmatpush3.bf16.msra.mxu0 %v11934_v44 }
 0x358   :  { %11637 = vmatpush3.bf16.msra.mxu1 %v11935_v48  ;;  %11616 = vmatprep.subr.bf16.mxu0 %v11936_v33  ;;  %v11966_v33 = vld [vmem:[%s13932_s3 + $0x300] sm:$0xff]  }
 0x359   :  { %11638 = vmatprep.subr.bf16.mxu1 %v11937_v4 }
 0x35b   :  { %11617 = vmatpush3.bf16.msra.mxu0 %v11938_v6  ;;  %v11967_v6 = vld [vmem:[%s13932_s3 + $0x380] sm:$0xff]  }
 0x35c   :  { %11639 = vmatpush3.bf16.msra.mxu1 %v11939_v7  ;;  %11618 = vmatprep.subr.bf16.mxu0 %v11940_v8  ;;  %v11968_v7 = vld [vmem:[%s13932_s3 + $0x348] sm:$0xff]  }
 0x35d   :  { %11640 = vmatprep.subr.bf16.mxu1 %v11941_v29  ;;  %v11969_v29 = vld [vmem:[%s13932_s3 + $0x3c8] sm:$0xff]  }
 0x35f   :  { %11619 = vmatpush3.bf16.msra.mxu0 %v11942_v9  ;;  %v11970_v9 = vld [vmem:[%s13932_s3 + $0x308] sm:$0xff]  }
 0x360   :  { %11641 = vmatpush3.bf16.msra.mxu1 %v11943_v10  ;;  %11620 = vmatprep.subr.bf16.mxu0 %v11944_v31  ;;  %v11971_v10 = vld [vmem:[%s13932_s3 + $0x388] sm:$0xff]   ;;  %v11972_v31 = vld [vmem:[%s13932_s3 + $0x350] sm:$0xff]  }
 0x361   :  { %11642 = vmatprep.subr.bf16.mxu1 %v11945_v11  ;;  %v11973_v11 = vld [vmem:[%s13932_s3 + $0x3d0] sm:$0xff]  }
 0x363   :  { %11621 = vmatpush3.bf16.msra.mxu0 %v11946_v12  ;;  %v11974_v12 = vld [vmem:[%s13932_s3 + $0x310] sm:$0xff]  }
 0x364   :  { %11643 = vmatpush3.bf16.msra.mxu1 %v11947_v15  ;;  %11622 = vmatprep.subr.bf16.mxu0 %v11948_v17  ;;  %v11977_v15 = vld [vmem:[%s13932_s3 + $0x3d8] sm:$0xff]  }
 0x365   :  { %11644 = vmatprep.subr.bf16.mxu1 %v11949_v18  ;;  %v11978_v17 = vld [vmem:[%s13932_s3 + $0x318] sm:$0xff]  }
 0x366   :  { %v11979_v18 = vld [vmem:[%s13932_s3 + $0x398] sm:$0xff]  }
 0x367   :  { %11623 = vmatpush3.bf16.msra.mxu0 %v11950_v28  ;;  %v11980_v28 = vld [vmem:[%s13932_s3 + $0x360] sm:$0xff]  }
 0x368   :  { %11645 = vmatpush3.bf16.msra.mxu1 %v11951_v32  ;;  %11624 = vmatprep.subr.bf16.mxu0 %v11952_v34  ;;  %v11981_v32 = vld [vmem:[%s13932_s3 + $0x3e0] sm:$0xff]  }
 0x369   :  { %v3826_v59 = vpop.f32.mrb[12].mxu0  ;;  %11646 = vmatprep.subr.bf16.mxu1 %v11953_v35  ;;  %v11982_v34 = vld [vmem:[%s13932_s3 + $0x320] sm:$0xff]  }
 0x36a   :  { %v11754_v46 = vadd.f32 %v3826_v59, %v818_v54  ;;  %v3908_v21 = vpop.f32.mrb[12].mxu1  ;;  %v3828_v50 = vpop.f32.mrb[13].mxu0  ;;  %v11983_v35 = vld [vmem:[%s13932_s3 + $0x3a0] sm:$0xff]   ;;  %v11984_v54 = vld [vmem:[%s13932_s3 + $0x368] sm:$0xff]   ;;  %v11991_v59 = vld [vmem:[%s13932_s3 + $0x3b0] sm:$0xff]  }
 0x36b   :  { %v11756_v51 = vadd.f32 %v3908_v21, %v826_v37  ;;  %v11755_v52 = vadd.f32 %v3828_v50, %v822_v39  ;;  %v3910_v53 = vpop.f32.mrb[13].mxu1  ;;  %v3830_v40 = vpop.f32.mrb[14].mxu0  ;;  %11625 = vmatpush3.bf16.msra.mxu0 %v11954_v41  ;;  %v11985_v37 = vld [vmem:[%s13932_s3 + $0x3e8] sm:$0xff]   ;;  %v11994_v21 = vld [vmem:[%s13932_s3 + $0x338] sm:$0xff]  }
 0x36c   :  { %12828 = vtanh.f32 %v11754_v46  ;;  %v11757_v56 = vadd.f32 %v3910_v53, %v830_v30  ;;  %v3912_v24 = vpop.f32.mrb[14].mxu1  ;;  %v3831_v57 = vpop.f32.mrb[15].mxu0  ;;  %11647 = vmatpush3.bf16.msra.mxu1 %v11955_v22  ;;  %11626 = vmatprep.subr.bf16.mxu0 %v11956_v42  ;;  %v11986_v39 = vld [vmem:[%s13932_s3 + $0x328] sm:$0xff]   ;;  %v11988_v30 = vld [vmem:[%s13932_s3 + $0x370] sm:$0xff]   ;;  %v11993_v46 = vld [vmem:[%s13932_s3 + $0x3f8] sm:$0xff]   ;;  %v838_v53 = vrot.slane %v13526_v27, %v13295_v45  ;;  %v846_v40 = vrot.slane %v13526_v27, %v13301_v49 }
 0x36d   :  { %12830 = vtanh.f32 %v11756_v51  ;;  %v3913_v60 = vpop.f32.mrb[15].mxu1  ;;  %11648 = vmatprep.subr.bf16.mxu1 %v11957_v43  ;;  %v11987_v41 = vld [vmem:[%s13932_s3 + $0x3a8] sm:$0xff]   ;;  %v11989_v22 = vld [vmem:[%s13932_s3 + $0x3f0] sm:$0xff]   ;;  %v11992_v43 = vld [vmem:[%s13932_s3 + $0x378] sm:$0xff]   ;;  %v834_v51 = vrot.slane %v13526_v27, %v13400_v38 }
 0x36e   :  { %12832 = vtanh.f32 %v11755_v52  ;;  %v11990_v42 = vld [vmem:[%s13932_s3 + $0x330] sm:$0xff]   ;;  %v11995_v50 = vld [vmem:[%s13932_s3 + $0x3b8] sm:$0xff]   ;;  %v842_v52 = vrot.slane %v13526_v27, %v13233_v16 }
 0x36f   :  { %12834 = vtanh.f32 %v11757_v56  ;;  %11627 = vmatpush3.bf16.msra.mxu0 %v11958_v55 }
 0x370   :  { %11649 = vmatpush3.bf16.msra.mxu1 %v11959_v47  ;;  %11628 = vmatprep.subr.bf16.mxu0 %v11960_v58 }
 0x371   :  { %11650 = vmatprep.subr.bf16.mxu1 %v11961_v62 }
 0x373   :  { %11629 = vmatpush3.bf16.msra.mxu0 %v11962_v61 }
 0x374   :  { %11651 = vmatpush3.bf16.msra.mxu1 %v11963_v63  ;;  %11658 = vmatprep.subr.bf16.mxu0 %v11964_v1 }
 0x375   :  { %11680 = vmatprep.subr.bf16.mxu1 %v11965_v19 }
 0x376   :  { %v12829_v2 = vpop.eup %12828 }
 0x377   :  { %v12831_v20 = vpop.eup %12830  ;;  %v4103_v5 = vpack.c.bf16 %v12829_v2, %v12829_v2 }
 0x378   :  { %v12833_v44 = vpop.eup %12832  ;;  %v4105_v8 = vpack.c.bf16 %v12831_v20, %v12831_v20 }
 0x379   :  { %v12835_v3 = vpop.eup %12834  ;;  %v4104_v48 = vpack.c.bf16 %v12833_v44, %v12833_v44 }
 0x37a   :  { %v4106_v4 = vpack.c.bf16 %v12835_v3, %v12835_v3 }
 0x37b   :  { %5328 = vmatprep.mubr.bf16.mxu0 %v4104_v48 }
 0x37c   :  { %5368 = vmatprep.mubr.bf16.mxu1 %v4106_v4  ;;  %5329 = vmatmul.mubr.bf16.vlgmr.msra.gmra.mrb[28].mxu0 %v4103_v5 }
 0x37d   :  { %5369 = vmatmul.mubr.bf16.vlgmr.msra.gmra.mrb[28].mxu1 %v4105_v8  ;;  %11659 = vmatpush3.bf16.msra.mxu0 %v11966_v33 }
 0x37e   :  { %11681 = vmatpush3.bf16.msra.mxu1 %v11967_v6  ;;  %11660 = vmatprep.subr.bf16.mxu0 %v11968_v7  ;;  %v4367_v7 = vld [vmem:[#allocation9 + $0x2] ss:$0 sm:$0xff] }
 0x37f   :  { %11682 = vmatprep.subr.bf16.mxu1 %v11969_v29 }
 0x381   :  { %11661 = vmatpush3.bf16.msra.mxu0 %v11970_v9 }
 0x382   :  { %11683 = vmatpush3.bf16.msra.mxu1 %v11971_v10  ;;  %11662 = vmatprep.subr.bf16.mxu0 %v11972_v31 }
 0x383   :  { %11684 = vmatprep.subr.bf16.mxu1 %v11973_v11 }
 0x385   :  { %11663 = vmatpush3.bf16.msra.mxu0 %v11974_v12 }
 0x386   :  { %11685 = vmatpush3.bf16.msra.mxu1 %v11975_v13  ;;  %11664 = vmatprep.subr.bf16.mxu0 %v11976_v14 }
 0x387   :  { %11686 = vmatprep.subr.bf16.mxu1 %v11977_v15 }
 0x389   :  { %11665 = vmatpush3.bf16.msra.mxu0 %v11978_v17 }
 0x38a   :  { %11687 = vmatpush3.bf16.msra.mxu1 %v11979_v18  ;;  %11666 = vmatprep.subr.bf16.mxu0 %v11980_v28 }
 0x38b   :  { %11688 = vmatprep.subr.bf16.mxu1 %v11981_v32 }
 0x38d   :  { %11667 = vmatpush3.bf16.msra.mxu0 %v11982_v34 }
 0x38e   :  { %11689 = vmatpush3.bf16.msra.mxu1 %v11983_v35  ;;  %11668 = vmatprep.subr.bf16.mxu0 %v11984_v54 }
 0x38f   :  { %11690 = vmatprep.subr.bf16.mxu1 %v11985_v37 }
 0x391   :  { %11669 = vmatpush3.bf16.msra.mxu0 %v11986_v39 }
 0x392   :  { %11691 = vmatpush3.bf16.msra.mxu1 %v11987_v41  ;;  %11670 = vmatprep.subr.bf16.mxu0 %v11988_v30 }
 0x393   :  { %11692 = vmatprep.subr.bf16.mxu1 %v11989_v22 }
 0x395   :  { %11671 = vmatpush3.bf16.msra.mxu0 %v11990_v42 }
 0x396   :  { %11693 = vmatpush3.bf16.msra.mxu1 %v11991_v59  ;;  %11672 = vmatprep.subr.bf16.mxu0 %v11992_v43 }
 0x397   :  { %11694 = vmatprep.subr.bf16.mxu1 %v11993_v46 }
 0x399   :  { %11673 = vmatpush3.bf16.msra.mxu0 %v11994_v21 }
 0x39a   :  { %11695 = vmatpush3.bf16.msra.mxu1 %v11995_v50 }
 0x3e9   :  { %v3990_v55 = vpop.f32.mrb[16].mxu0 }
 0x3ea   :  { %v11758_v56 = vadd.f32 %v3990_v55, %v834_v51  ;;  %v4072_v24 = vpop.f32.mrb[16].mxu1  ;;  %v3992_v57 = vpop.f32.mrb[17].mxu0  ;;  %v5468_v55 = vld [vmem:[#allocation6 + $0x40] sm:$0xff] }
 0x3eb   :  { %v11760_v47 = vadd.f32 %v4072_v24, %v842_v52  ;;  %v11759_v58 = vadd.f32 %v3992_v57, %v838_v53  ;;  %v4074_v60 = vpop.f32.mrb[17].mxu1  ;;  %v3994_v62 = vpop.f32.mrb[18].mxu0 }
 0x3ec   :  { %12836 = vtanh.f32 %v11758_v56  ;;  %v11761_v61 = vadd.f32 %v4074_v60, %v846_v40  ;;  %v4076_v63 = vpop.f32.mrb[18].mxu1  ;;  %v3995_v1 = vpop.f32.mrb[19].mxu0  ;;  %v5460_v40 = vld [vmem:[#allocation6] sm:$0xff]  ;;  %v5461_v56 = vld [vmem:[#allocation6 + $0x8] sm:$0xff] }
 0x3ed   :  { %12838 = vtanh.f32 %v11760_v47  ;;  %v4077_v19 = vpop.f32.mrb[19].mxu1  ;;  %v10927_v47 = vcombine.high %v5460_v40, %v5468_v55  ;;  %v10926_v60 = vcombine.low %v5460_v40, %v5468_v55  ;;  %v5476_v1 = vld [vmem:[#allocation6 + $0x80] sm:$0xff] }
 0x3ee   :  { %12840 = vtanh.f32 %v11759_v58  ;;  %v5469_v58 = vld [vmem:[#allocation6 + $0x48] sm:$0xff]  ;;  %v5484_v19 = vld [vmem:[#allocation6 + $0xc0] sm:$0xff] }
 0x3ef   :  { %12842 = vtanh.f32 %v11761_v61  ;;  %v10928_v62 = vcombine.low %v5461_v56, %v5469_v58  ;;  %v10929_v61 = vcombine.high %v5461_v56, %v5469_v58  ;;  %5746 = vmatprep.subr.bf16.mxu0 %v10927_v47  ;;  %v5480_v55 = vld [vmem:[#allocation6 + $0xa0] sm:$0xff] }
 0x3f0   :  { %v5488_v56 = vld [vmem:[#allocation6 + $0xe0] sm:$0xff] }
 0x3f1   :  { %5787 = vmatprep.subr.bf16.mxu1 %v10929_v61  ;;  %v5466_v61 = vld [vmem:[#allocation6 + $0x30] sm:$0xff] }
 0x3f6   :  { %v12837_v2 = vpop.eup %12836 }
 0x3f7   :  { %v12839_v20 = vpop.eup %12838  ;;  %v4107_v48 = vpack.c.bf16 %v12837_v2, %v12837_v2  ;;  %v5477_v2 = vld [vmem:[#allocation6 + $0x88] sm:$0xff] }
 0x3f8   :  { %v12841_v44 = vpop.eup %12840  ;;  %v4109_v5 = vpack.c.bf16 %v12839_v20, %v12839_v20  ;;  %v10943_v20 = vcombine.high %v5476_v1, %v5484_v19 }
 0x3f9   :  { %v12843_v27 = vpop.eup %12842  ;;  %v4108_v3 = vpack.c.bf16 %v12841_v44, %v12841_v44  ;;  %v5485_v44 = vld [vmem:[#allocation6 + $0xc8] sm:$0xff] }
 0x3fa   :  { %v4110_v33 = vpack.c.bf16 %v12843_v27, %v12843_v27  ;;  %v10942_v27 = vcombine.low %v5476_v1, %v5484_v19  ;;  %v5467_v1 = vld [vmem:[#allocation6 + $0x38] sm:$0xff] }
 0x3fb   :  { %5408 = vmatprep.mubr.bf16.mxu0 %v4108_v3  ;;  %v10944_v3 = vcombine.low %v5477_v2, %v5485_v44  ;;  %v5475_v19 = vld [vmem:[#allocation6 + $0x78] sm:$0xff] }
 0x3fc   :  { %5448 = vmatprep.mubr.bf16.mxu1 %v4110_v33  ;;  %5409 = vmatmul.mubr.bf16.vlgmr.msra.gmra.mrb[32].mxu0 %v4107_v48  ;;  %v10945_v48 = vcombine.high %v5477_v2, %v5485_v44  ;;  %v5462_v33 = vld [vmem:[#allocation6 + $0x10] sm:$0xff]  ;;  %v10950_v2 = vcombine.low %v5480_v55, %v5488_v56 }
 0x3fd   :  { %5449 = vmatmul.mubr.bf16.vlgmr.msra.gmra.mrb[32].mxu1 %v4109_v5  ;;  %5778 = vmatprep.mubr.bf16.mxu0 %v13009_v0  ;;  %v5470_v5 = vld [vmem:[#allocation6 + $0x50] sm:$0xff] }
 0x3fe   :  { %5819 = vmatprep.mubr.bf16.mxu1 %v13009_v0  ;;  %5747 = vmatpush1.bf16.msra.mxu0 %v10926_v60  ;;  %v10951_v60 = vcombine.high %v5480_v55, %v5488_v56  ;;  %v12038_v55 = vld [vmem:[#allocation7 + $0xe0] ss:$16 sps:$4 sm:$0xff]   ;;  %v12041_v56 = vld [vmem:[#allocation7 + $0xe8] ss:$16 sps:$4 sm:$0xff]  }
 0x3ff   :  { %5788 = vmatpush1.bf16.msra.mxu1 %v10928_v62  ;;  %5748 = vmatprep.subr.bf16.mxu0 %v10943_v20 }
 0x400   :  { %5789 = vmatprep.subr.bf16.mxu1 %v10945_v48  ;;  %v5490_v48 = vld [vmem:[#allocation6 + $0xf0] sm:$0xff] }
 0x402   :  { %5749 = vmatpush1.bf16.msra.mxu0 %v10942_v27  ;;  %v10941_v27 = vcombine.high %v5467_v1, %v5475_v19 }
 0x403   :  { %5790 = vmatpush1.bf16.msra.mxu1 %v10944_v3  ;;  %v5482_v3 = vld [vmem:[#allocation6 + $0xb0] sm:$0xff] }
 0x409   :  { %v11542_v4 = vpop.f32.mrb[20].mxu0 }
 0x40a   :  { %v11564_v6 = vpop.f32.mrb[20].mxu1  ;;  %v11543_v8 = vpop.f32.mrb[21].mxu0 }
 0x40b   :  { %v11544_v29 = vadd.f32 %v11543_v8, %v11542_v4  ;;  %v11565_v9 = vpop.f32.mrb[21].mxu1  ;;  %v11545_v10 = vpop.f32.mrb[22].mxu0  ;;  %v5463_v4 = vld [vmem:[#allocation6 + $0x18] sm:$0xff]  ;;  %v10930_v8 = vcombine.low %v5462_v33, %v5470_v5 }
 0x40c   :  { %v11566_v31 = vadd.f32 %v11565_v9, %v11564_v6  ;;  %v11567_v11 = vpop.f32.mrb[22].mxu1  ;;  %v11546_v12 = vpop.f32.mrb[23].mxu0  ;;  %v10931_v6 = vcombine.high %v5462_v33, %v5470_v5  ;;  %v5483_v33 = vld [vmem:[#allocation6 + $0xb8] sm:$0xff] }
 0x40d   :  { %v5171_v13 = vadd.f32 %v11544_v29, %v4367_v7  ;;  %v11568_v14 = vpop.f32.mrb[23].mxu1  ;;  %v5471_v7 = vld [vmem:[#allocation6 + $0x58] sm:$0xff] }
 0x40e   :  { %v10932_v29 = vcombine.low %v5463_v4, %v5471_v7  ;;  %v10933_v9 = vcombine.high %v5463_v4, %v5471_v7  ;;  %5828 = vmatprep.subr.bf16.mxu0 %v10931_v6  ;;  %v5491_v5 = vld [vmem:[#allocation6 + $0xf8] sm:$0xff]  ;;  %v10940_v6 = vcombine.low %v5467_v1, %v5475_v19  ;;  %v10955_v7 = vcombine.high %v5482_v3, %v5490_v48  ;;  %v12058_v1 = vld [vmem:[#allocation7 + $0x144] ss:$16 sps:$4 sm:$0xff]  }
 0x40f   :  { %v5211_v15 = vadd.f32 %v11566_v31, %v5171_v13  ;;  %v12061_v19 = vld [vmem:[#allocation7 + $0x14c] ss:$16 sps:$4 sm:$0xff]  }
 0x410   :  { %5869 = vmatprep.subr.bf16.mxu1 %v10933_v9  ;;  %v10956_v9 = vcombine.low %v5483_v33, %v5491_v5 }
 0x429   :  { %v11586_v17 = vpop.f32.mrb[24].mxu0 }
 0x42a   :  { %v11608_v18 = vpop.f32.mrb[24].mxu1  ;;  %v11587_v28 = vpop.f32.mrb[25].mxu0 }
 0x42b   :  { %v11588_v32 = vadd.f32 %v11587_v28, %v11586_v17  ;;  %v11609_v34 = vpop.f32.mrb[25].mxu1  ;;  %v11589_v35 = vpop.f32.mrb[26].mxu0 }
 0x42c   :  { %v11610_v54 = vadd.f32 %v11609_v34, %v11608_v18  ;;  %v11611_v37 = vpop.f32.mrb[26].mxu1  ;;  %v11590_v39 = vpop.f32.mrb[27].mxu0  ;;  %v5478_v35 = vld [vmem:[#allocation6 + $0x90] sm:$0xff] }
 0x42d   :  { %v5251_v41 = vadd.f32 %v11588_v32, %v5211_v15  ;;  %v11612_v30 = vpop.f32.mrb[27].mxu1  ;;  %v5486_v37 = vld [vmem:[#allocation6 + $0xd0] sm:$0xff]  ;;  %v5479_v39 = vld [vmem:[#allocation6 + $0x98] sm:$0xff] }
 0x42f   :  { %v5291_v22 = vadd.f32 %v11610_v54, %v5251_v41  ;;  %v5487_v41 = vld [vmem:[#allocation6 + $0xd8] sm:$0xff] }
 0x44f   :  { %v11630_v42 = vpop.f32.mrb[28].mxu0 }
 0x450   :  { %v11652_v59 = vpop.f32.mrb[28].mxu1  ;;  %v11631_v43 = vpop.f32.mrb[29].mxu0 }
 0x451   :  { %v11632_v46 = vadd.f32 %v11631_v43, %v11630_v42  ;;  %v11653_v21 = vpop.f32.mrb[29].mxu1  ;;  %v11633_v50 = vpop.f32.mrb[30].mxu0  ;;  %v10947_v42 = vcombine.high %v5478_v35, %v5486_v37  ;;  %v5464_v43 = vld [vmem:[#allocation6 + $0x20] sm:$0xff] }
 0x452   :  { %v11654_v51 = vadd.f32 %v11653_v21, %v11652_v59  ;;  %v11655_v52 = vpop.f32.mrb[30].mxu1  ;;  %v11634_v53 = vpop.f32.mrb[31].mxu0  ;;  %v10949_v59 = vcombine.high %v5479_v39, %v5487_v41  ;;  %v5465_v21 = vld [vmem:[#allocation6 + $0x28] sm:$0xff] }
 0x453   :  { %v5331_v24 = vadd.f32 %v11632_v46, %v5291_v22  ;;  %v11656_v57 = vpop.f32.mrb[31].mxu1  ;;  %v5472_v46 = vld [vmem:[#allocation6 + $0x60] sm:$0xff]  ;;  %v5473_v50 = vld [vmem:[#allocation6 + $0x68] sm:$0xff]  ;;  %v10948_v52 = vcombine.low %v5479_v39, %v5487_v41 }
 0x454   :  { %v10935_v53 = vcombine.high %v5464_v43, %v5472_v46  ;;  %v10937_v40 = vcombine.high %v5465_v21, %v5473_v50  ;;  %v5489_v57 = vld [vmem:[#allocation6 + $0xe8] sm:$0xff]  ;;  %v10934_v47 = vcombine.low %v5464_v43, %v5472_v46  ;;  %v10936_v58 = vcombine.low %v5465_v21, %v5473_v50  ;;  %v12022_v39 = vld [vmem:[#allocation7 + $0x84] ss:$16 sps:$4 sm:$0xff]   ;;  %v12026_v43 = vld [vmem:[#allocation7 + $0xa0] ss:$16 sps:$4 sm:$0xff]  }
 0x455   :  { %v5371_v63 = vadd.f32 %v11654_v51, %v5331_v24  ;;  %v10946_v51 = vcombine.low %v5478_v35, %v5486_v37  ;;  %v5481_v24 = vld [vmem:[#allocation6 + $0xa8] sm:$0xff]  ;;  %v12034_v21 = vld [vmem:[#allocation7 + $0xc4] ss:$16 sps:$4 sm:$0xff]  }
 0x456   :  { %v10953_v62 = vcombine.high %v5481_v24, %v5489_v57  ;;  %v10952_v20 = vcombine.low %v5481_v24, %v5489_v57  ;;  %v12019_v35 = vld [vmem:[#allocation7 + $0x6c] ss:$16 sps:$4 sm:$0xff]   ;;  %v12017_v37 = vld [vmem:[#allocation7 + $0x68] ss:$16 sps:$4 sm:$0xff]   ;;  %v12046_v24 = vld [vmem:[#allocation7 + $0x104] ss:$16 sps:$4 sm:$0xff]  }
 0x457   :  { %v12025_v41 = vld [vmem:[#allocation7 + $0x8c] ss:$16 sps:$4 sm:$0xff]   ;;  %v12029_v46 = vld [vmem:[#allocation7 + $0xa8] ss:$16 sps:$4 sm:$0xff]  }
 0x458   :  { %v12037_v50 = vld [vmem:[#allocation7 + $0xcc] ss:$16 sps:$4 sm:$0xff]  }
 0x459   :  { %v12049_v57 = vld [vmem:[#allocation7 + $0x10c] ss:$16 sps:$4 sm:$0xff]  }
 0x4cf   :  { %v11674_v10 = vpop.f32.mrb[32].mxu0 }
 0x4d0   :  { %v11696_v31 = vpop.f32.mrb[32].mxu1  ;;  %v11675_v11 = vpop.f32.mrb[33].mxu0 }
 0x4d1   :  { %v11676_v12 = vadd.f32 %v11675_v11, %v11674_v10  ;;  %v11697_v13 = vpop.f32.mrb[33].mxu1  ;;  %v11677_v14 = vpop.f32.mrb[34].mxu0  ;;  %v11998_v10 = vld [vmem:[#allocation7 + $0x4] ss:$16 sps:$4 sm:$0xff]   ;;  %v11996_v11 = vld [vmem:[#allocation7] ss:$16 sps:$4 sm:$0xff]  }
 0x4d2   :  { %v11698_v15 = vadd.f32 %v11697_v13, %v11696_v31  ;;  %v11699_v17 = vpop.f32.mrb[34].mxu1  ;;  %v11678_v18 = vpop.f32.mrb[35].mxu0  ;;  %v12001_v31 = vld [vmem:[#allocation7 + $0xc] ss:$16 sps:$4 sm:$0xff]   ;;  %v12004_v13 = vld [vmem:[#allocation7 + $0x24] ss:$16 sps:$4 sm:$0xff]  }
 0x4d3   :  { %v5411_v28 = vadd.f32 %v11676_v12, %v5371_v63  ;;  %v11700_v32 = vpop.f32.mrb[35].mxu1  ;;  %v5474_v63 = vld [vmem:[#allocation6 + $0x70] sm:$0xff]  ;;  %v11999_v12 = vld [vmem:[#allocation7 + $0x8] ss:$16 sps:$4 sm:$0xff]   ;;  %v12007_v14 = vld [vmem:[#allocation7 + $0x2c] ss:$16 sps:$4 sm:$0xff]  }
 0x4d4   :  { %v10939_v44 = vcombine.high %v5466_v61, %v5474_v63  ;;  %v10938_v4 = vcombine.low %v5466_v61, %v5474_v63  ;;  %v12005_v17 = vld [vmem:[#allocation7 + $0x28] ss:$16 sps:$4 sm:$0xff]   ;;  %v12013_v18 = vld [vmem:[#allocation7 + $0x4c] ss:$16 sps:$4 sm:$0xff]   ;;  %v12050_v61 = vld [vmem:[#allocation7 + $0x120] ss:$16 sps:$4 sm:$0xff]  }
 0x4d5   :  { %v5451_v34 = vadd.f32 %v11698_v15, %v5411_v28  ;;  %v12002_v15 = vld [vmem:[#allocation7 + $0x20] ss:$16 sps:$4 sm:$0xff]   ;;  %v12011_v32 = vld [vmem:[#allocation7 + $0x48] ss:$16 sps:$4 sm:$0xff]  }
 0x4d6   :  { %v12008_v28 = vld [vmem:[#allocation7 + $0x40] ss:$16 sps:$4 sm:$0xff]   ;;  %v12053_v63 = vld [vmem:[#allocation7 + $0x128] ss:$16 sps:$4 sm:$0xff]  }
 0x4d7   :  { %vm5456_vm2 = vcmp.gt.f32.partialorder %v5451_v34, 0.0  ;;  %v5457_v54 = vmul.f32 0.01, %v5451_v34 }
 0x4d9   :  { %v5458_v30 = vsel %vm5456_vm2, %v5451_v34, %v5457_v54  ;;  %v12016_v34 = vld [vmem:[#allocation7 + $0x64] ss:$16 sps:$4 sm:$0xff]   ;;  %v12014_v54 = vld [vmem:[#allocation7 + $0x60] ss:$16 sps:$4 sm:$0xff]  }
 0x4da   :  { %v13684_v22 = vpack.c.bf16 %v5458_v30, %v5458_v30  ;;  %v12020_v30 = vld [vmem:[#allocation7 + $0x80] ss:$16 sps:$4 sm:$0xff]  }
 0x4dc   :  { %10958 = vmatmul.mubr.msk.bf16.vlgmr.msra.gmra.mrb[36].mxu0 %vm5742_vm3, %v13684_v22  ;;  %10959 = vmatmul.mubr.msk.bf16.vlgmr.msra.gmra.mrb[36].mxu1 %vm5742_vm3, %v13684_v22 }
 0x4dd   :  { %5829 = vmatpush1.bf16.msra.mxu0 %v10930_v8  ;;  %5870 = vmatpush1.bf16.msra.mxu1 %v10932_v29  ;;  %v10957_v8 = vcombine.high %v5483_v33, %v5491_v5  ;;  %v10954_v29 = vcombine.low %v5482_v3, %v5490_v48  ;;  %v12062_v3 = vld [vmem:[#allocation7 + $0x160] ss:$16 sps:$4 sm:$0xff]   ;;  %v12065_v48 = vld [vmem:[#allocation7 + $0x168] ss:$16 sps:$4 sm:$0xff]   ;;  %v12070_v33 = vld [vmem:[#allocation7 + $0x184] ss:$16 sps:$4 sm:$0xff]  }
 0x4de   :  { %5830 = vmatprep.subr.bf16.mxu0 %v10947_v42  ;;  %5871 = vmatprep.subr.bf16.mxu1 %v10949_v59  ;;  %v12028_v42 = vld [vmem:[#allocation7 + $0xa4] ss:$16 sps:$4 sm:$0xff]   ;;  %v12031_v59 = vld [vmem:[#allocation7 + $0xac] ss:$16 sps:$4 sm:$0xff]  }
 0x4df   :  { %5860 = vmatprep.mubr.bf16.mxu0 %v13009_v0  ;;  %5901 = vmatprep.mubr.bf16.mxu1 %v13009_v0  ;;  %v12073_v5 = vld [vmem:[#allocation7 + $0x18c] ss:$16 sps:$4 sm:$0xff]  }
 0x4e1   :  { %5831 = vmatpush1.bf16.msra.mxu0 %v10946_v51  ;;  %5872 = vmatpush1.bf16.msra.mxu1 %v10948_v52  ;;  %v12032_v51 = vld [vmem:[#allocation7 + $0xc0] ss:$16 sps:$4 sm:$0xff]   ;;  %v12035_v52 = vld [vmem:[#allocation7 + $0xc8] ss:$16 sps:$4 sm:$0xff]  }
 0x4e2   :  { %5910 = vmatprep.subr.bf16.mxu0 %v10935_v53  ;;  %5951 = vmatprep.subr.bf16.mxu1 %v10937_v40  ;;  %v12040_v53 = vld [vmem:[#allocation7 + $0xe4] ss:$16 sps:$4 sm:$0xff]   ;;  %v12043_v40 = vld [vmem:[#allocation7 + $0xec] ss:$16 sps:$4 sm:$0xff]  }
 0x4e4   :  { %10960 = vmatmul.mubr.msk.bf16.vlgmr.msra.gmra.mrb[40].mxu0 %vm5742_vm3, %v13684_v22  ;;  %10961 = vmatmul.mubr.msk.bf16.vlgmr.msra.gmra.mrb[40].mxu1 %vm5742_vm3, %v13684_v22 }
 0x4e5   :  { %5911 = vmatpush1.bf16.msra.mxu0 %v10934_v47  ;;  %5952 = vmatpush1.bf16.msra.mxu1 %v10936_v58  ;;  %v12044_v47 = vld [vmem:[#allocation7 + $0x100] ss:$16 sps:$4 sm:$0xff]   ;;  %v12047_v58 = vld [vmem:[#allocation7 + $0x108] ss:$16 sps:$4 sm:$0xff]  }
 0x4e6   :  { %5912 = vmatprep.subr.bf16.mxu0 %v10951_v60  ;;  %5953 = vmatprep.subr.bf16.mxu1 %v10953_v62  ;;  %v12052_v60 = vld [vmem:[#allocation7 + $0x124] ss:$16 sps:$4 sm:$0xff]   ;;  %v12055_v62 = vld [vmem:[#allocation7 + $0x12c] ss:$16 sps:$4 sm:$0xff]  }
 0x4e7   :  { %5942 = vmatprep.mubr.bf16.mxu0 %v13009_v0  ;;  %5983 = vmatprep.mubr.bf16.mxu1 %v13009_v0 }
 0x4e9   :  { %5913 = vmatpush1.bf16.msra.mxu0 %v10950_v2  ;;  %5954 = vmatpush1.bf16.msra.mxu1 %v10952_v20  ;;  %v12056_v2 = vld [vmem:[#allocation7 + $0x140] ss:$16 sps:$4 sm:$0xff]   ;;  %v12059_v20 = vld [vmem:[#allocation7 + $0x148] ss:$16 sps:$4 sm:$0xff]  }
 0x4ea   :  { %5992 = vmatprep.subr.bf16.mxu0 %v10939_v44  ;;  %6033 = vmatprep.subr.bf16.mxu1 %v10941_v27  ;;  %v12064_v44 = vld [vmem:[#allocation7 + $0x164] ss:$16 sps:$4 sm:$0xff]   ;;  %v12067_v27 = vld [vmem:[#allocation7 + $0x16c] ss:$16 sps:$4 sm:$0xff]  }
 0x4ec   :  { %10962 = vmatmul.mubr.msk.bf16.vlgmr.msra.gmra.mrb[44].mxu0 %vm5742_vm3, %v13684_v22  ;;  %10963 = vmatmul.mubr.msk.bf16.vlgmr.msra.gmra.mrb[44].mxu1 %vm5742_vm3, %v13684_v22 }
 0x4ed   :  { %5993 = vmatpush1.bf16.msra.mxu0 %v10938_v4  ;;  %6034 = vmatpush1.bf16.msra.mxu1 %v10940_v6  ;;  %v12068_v4 = vld [vmem:[#allocation7 + $0x180] ss:$16 sps:$4 sm:$0xff]   ;;  %v12071_v6 = vld [vmem:[#allocation7 + $0x188] ss:$16 sps:$4 sm:$0xff]  }
 0x4ee   :  { %5994 = vmatprep.subr.bf16.mxu0 %v10955_v7  ;;  %6035 = vmatprep.subr.bf16.mxu1 %v10957_v8  ;;  %v12076_v7 = vld [vmem:[#allocation7 + $0x1a4] ss:$16 sps:$4 sm:$0xff]   ;;  %v12079_v8 = vld [vmem:[#allocation7 + $0x1ac] ss:$16 sps:$4 sm:$0xff]  }
 0x4ef   :  { %6024 = vmatprep.mubr.bf16.mxu0 %v13009_v0  ;;  %6065 = vmatprep.mubr.bf16.mxu1 %v13009_v0  ;;  %v12010_v0 = vld [vmem:[#allocation7 + $0x44] ss:$16 sps:$4 sm:$0xff]  }
 0x4f1   :  { %5995 = vmatpush1.bf16.msra.mxu0 %v10954_v29  ;;  %6036 = vmatpush1.bf16.msra.mxu1 %v10956_v9  ;;  %v12074_v29 = vld [vmem:[#allocation7 + $0x1a0] ss:$16 sps:$4 sm:$0xff]   ;;  %v12077_v9 = vld [vmem:[#allocation7 + $0x1a8] ss:$16 sps:$4 sm:$0xff]  }
 0x4f2   :  { %9265 = vmatprep.subr.bf16.mxu0 %v11998_v10  ;;  %9593 = vmatprep.subr.bf16.mxu1 %v12001_v31  ;;  %v12082_v10 = vld [vmem:[#allocation7 + $0x1c4] ss:$16 sps:$4 sm:$0xff]   ;;  %v12085_v31 = vld [vmem:[#allocation7 + $0x1cc] ss:$16 sps:$4 sm:$0xff]  }
 0x4f4   :  { %10964 = vmatmul.mubr.msk.bf16.vlgmr.msra.gmra.mrb[48].mxu0 %vm5742_vm3, %v13684_v22  ;;  %10965 = vmatmul.mubr.msk.bf16.vlgmr.msra.gmra.mrb[48].mxu1 %vm5742_vm3, %v13684_v22  ;;  %v12023_v22 = vld [vmem:[#allocation7 + $0x88] ss:$16 sps:$4 sm:$0xff]  }
 0x4f5   :  { %9266 = vmatpush1.bf16.msra.mxu0 %v11996_v11  ;;  %9594 = vmatpush1.bf16.msra.mxu1 %v11999_v12  ;;  %v12080_v11 = vld [vmem:[#allocation7 + $0x1c0] ss:$16 sps:$4 sm:$0xff]   ;;  %v12083_v12 = vld [vmem:[#allocation7 + $0x1c8] ss:$16 sps:$4 sm:$0xff]  }
 0x4f6   :  { %9267 = vmatprep.subr.bf16.mxu0 %v12004_v13  ;;  %9595 = vmatprep.subr.bf16.mxu1 %v12007_v14  ;;  %v12088_v13 = vld [vmem:[#allocation7 + $0x1e4] ss:$16 sps:$4 sm:$0xff]   ;;  %v12091_v14 = vld [vmem:[#allocation7 + $0x1ec] ss:$16 sps:$4 sm:$0xff]  }
 0x4f9   :  { %9268 = vmatpush1.bf16.msra.mxu0 %v12002_v15  ;;  %9596 = vmatpush1.bf16.msra.mxu1 %v12005_v17  ;;  %v12086_v15 = vld [vmem:[#allocation7 + $0x1e0] ss:$16 sps:$4 sm:$0xff]   ;;  %v12089_v17 = vld [vmem:[#allocation7 + $0x1e8] ss:$16 sps:$4 sm:$0xff]  }
 0x4fa   :  { %9269 = vmatprep.subr.bf16.mxu0 %v12010_v0  ;;  %9597 = vmatprep.subr.bf16.mxu1 %v12013_v18  ;;  %v12094_v0 = vld [vmem:[#allocation7 + $0x204] ss:$16 sps:$4 sm:$0xff]   ;;  %v12097_v18 = vld [vmem:[#allocation7 + $0x20c] ss:$16 sps:$4 sm:$0xff]  }
 0x4fd   :  { %9270 = vmatpush1.bf16.msra.mxu0 %v12008_v28  ;;  %9598 = vmatpush1.bf16.msra.mxu1 %v12011_v32  ;;  %v5493_v28 = vld [vmem:[#allocation9 + $0x3] ss:$8 sm:$0xf] }
 0x4fe   :  { %9271 = vmatprep.subr.bf16.mxu0 %v12016_v34  ;;  %9599 = vmatprep.subr.bf16.mxu1 %v12019_v35  ;;  %v5494_v32 = vld [vmem:[#allocation9 + $0x3] ss:$8 sm:$0xf0] }
 0x4ff   :  { %v13708_v34 = vor.u32 %v5494_v32, %v5493_v28  ;;  %v12092_v28 = vld [vmem:[#allocation7 + $0x200] ss:$16 sps:$4 sm:$0xff]   ;;  %v12095_v32 = vld [vmem:[#allocation7 + $0x208] ss:$16 sps:$4 sm:$0xff]  }
 0x501   :  { %9272 = vmatpush1.bf16.msra.mxu0 %v12014_v54  ;;  %9600 = vmatpush1.bf16.msra.mxu1 %v12017_v37  ;;  %v5505_v35 = vrot.slane %v13708_v34, %v13158_v23  ;;  %v5509_v54 = vrot.slane %v13708_v34, %v13163_v25  ;;  %v5517_v37 = vrot.slane %v13708_v34, %v13166_v26 }
 0x502   :  { %9273 = vmatprep.subr.bf16.mxu0 %v12022_v39  ;;  %9601 = vmatprep.subr.bf16.mxu1 %v12025_v41 }
 0x505   :  { %9274 = vmatpush1.bf16.msra.mxu0 %v12020_v30  ;;  %9602 = vmatpush1.bf16.msra.mxu1 %v12023_v22 }
 0x506   :  { %9275 = vmatprep.subr.bf16.mxu0 %v12028_v42  ;;  %9603 = vmatprep.subr.bf16.mxu1 %v12031_v59 }
 0x509   :  { %9276 = vmatpush1.bf16.msra.mxu0 %v12026_v43  ;;  %9604 = vmatpush1.bf16.msra.mxu1 %v12029_v46 }
 0x50a   :  { %9277 = vmatprep.subr.bf16.mxu0 %v12034_v21  ;;  %9605 = vmatprep.subr.bf16.mxu1 %v12037_v50 }
 0x50d   :  { %9278 = vmatpush1.bf16.msra.mxu0 %v12032_v51  ;;  %9606 = vmatpush1.bf16.msra.mxu1 %v12035_v52 }
 0x50e   :  { %9279 = vmatprep.subr.bf16.mxu0 %v12040_v53  ;;  %9607 = vmatprep.subr.bf16.mxu1 %v12043_v40 }
 0x511   :  { %9280 = vmatpush1.bf16.msra.mxu0 %v12038_v55  ;;  %9608 = vmatpush1.bf16.msra.mxu1 %v12041_v56  ;;  %v5497_v55 = vld [vmem:[#allocation9 + $0x43] ss:$8 sm:$0xf] }
 0x512   :  { %9281 = vmatprep.subr.bf16.mxu0 %v12046_v24  ;;  %9609 = vmatprep.subr.bf16.mxu1 %v12049_v57  ;;  %v5498_v56 = vld [vmem:[#allocation9 + $0x43] ss:$8 sm:$0xf0] }
 0x515   :  { %9282 = vmatpush1.bf16.msra.mxu0 %v12044_v47  ;;  %9610 = vmatpush1.bf16.msra.mxu1 %v12047_v58 }
 0x516   :  { %9283 = vmatprep.subr.bf16.mxu0 %v12052_v60  ;;  %9611 = vmatprep.subr.bf16.mxu1 %v12055_v62  ;;  %v13726_v60 = vor.u32 %v5498_v56, %v5497_v55  ;;  %v12101_v55 = vld [vmem:[#allocation7 + $0x228] ss:$16 sps:$4 sm:$0xff]  }
 0x519   :  { %9284 = vmatpush1.bf16.msra.mxu0 %v12050_v61  ;;  %9612 = vmatpush1.bf16.msra.mxu1 %v12053_v63 }
 0x51a   :  { %9285 = vmatprep.subr.bf16.mxu0 %v12058_v1  ;;  %9613 = vmatprep.subr.bf16.mxu1 %v12061_v19  ;;  %v5545_v19 = vrot.slane %v13726_v60, %v13189_v36 }
 0x51d   :  { %9286 = vmatpush1.bf16.msra.mxu0 %v12056_v2  ;;  %9614 = vmatpush1.bf16.msra.mxu1 %v12059_v20  ;;  %v5549_v2 = vrot.slane %v13726_v60, %v13166_v26 }
 0x51e   :  { %9287 = vmatprep.subr.bf16.mxu0 %v12064_v44  ;;  %9615 = vmatprep.subr.bf16.mxu1 %v12067_v27 }
 0x521   :  { %9288 = vmatpush1.bf16.msra.mxu0 %v12062_v3  ;;  %9616 = vmatpush1.bf16.msra.mxu1 %v12065_v48 }
 0x522   :  { %9289 = vmatprep.subr.bf16.mxu0 %v12070_v33  ;;  %9617 = vmatprep.subr.bf16.mxu1 %v12073_v5 }
 0x525   :  { %9290 = vmatpush1.bf16.msra.mxu0 %v12068_v4  ;;  %9618 = vmatpush1.bf16.msra.mxu1 %v12071_v6 }
 0x526   :  { %9291 = vmatprep.subr.bf16.mxu0 %v12076_v7  ;;  %9619 = vmatprep.subr.bf16.mxu1 %v12079_v8 }
 0x529   :  { %9292 = vmatpush1.bf16.msra.mxu0 %v12074_v29  ;;  %9620 = vmatpush1.bf16.msra.mxu1 %v12077_v9 }
 0x52a   :  { %9293 = vmatprep.subr.bf16.mxu0 %v12082_v10  ;;  %9621 = vmatprep.subr.bf16.mxu1 %v12085_v31 }
 0x52d   :  { %9294 = vmatpush1.bf16.msra.mxu0 %v12080_v11  ;;  %9622 = vmatpush1.bf16.msra.mxu1 %v12083_v12 }
 0x52e   :  { %9295 = vmatprep.subr.bf16.mxu0 %v12088_v13  ;;  %9623 = vmatprep.subr.bf16.mxu1 %v12091_v14  ;;  %v5553_v13 = vrot.slane %v13726_v60, %v13400_v38  ;;  %v5561_v14 = vrot.slane %v13726_v60, %v13233_v16 }
 0x531   :  { %9296 = vmatpush1.bf16.msra.mxu0 %v12086_v15  ;;  %9624 = vmatpush1.bf16.msra.mxu1 %v12089_v17  ;;  %v5557_v17 = vrot.slane %v13726_v60, %v13295_v45 }
 0x532   :  { %9306 = vmatprep.subr.bf16.mxu0 %v12094_v0  ;;  %9634 = vmatprep.subr.bf16.mxu1 %v12097_v18  ;;  %v5565_v0 = vrot.slane %v13726_v60, %v13301_v49 }
 0x5af   :  { %v5780_v39 = vpop.f32.mrb[36].mxu0  ;;  %v13716_v41 = vpop.f32.mrb[36].mxu1 }
 0x5b0   :  { %v5781_v30 = vadd.f32 %v5780_v39, %v5505_v35  ;;  %v5782_v22 = vpop.f32.mrb[37].mxu0  ;;  %v5823_v42 = vpop.f32.mrb[37].mxu1 }
 0x5b1   :  { %v5783_v59 = vadd.f32 %v5782_v22, %v5509_v54  ;;  %v5824_v43 = vadd.f32 %v5823_v42, %v5517_v37  ;;  %v5784_v46 = vpop.f32.mrb[38].mxu0  ;;  %v5825_v21 = vpop.f32.mrb[38].mxu1 }
 0x5b2   :  { %v6090_v50 = vmul.f32 1.442695, %v5781_v30  ;;  %v5785_v53 = vpop.f32.mrb[39].mxu0  ;;  %v5826_v40 = vpop.f32.mrb[39].mxu1  ;;  %vm6074_vm4 = vcmp.gt.f32.partialorder %v5781_v30, 0.0 }
 0x5b3   :  { %v6092_v51 = vmul.f32 1.442695, %v5783_v59  ;;  %v6096_v52 = vmul.f32 1.442695, %v5824_v43  ;;  %vm6075_vm5 = vcmp.gt.f32.partialorder %v5783_v59, 0.0  ;;  %vm6077_vm6 = vcmp.gt.f32.partialorder %v5824_v43, 0.0 }
 0x5b4   :  { %12844 = vpow2.f32 %v6090_v50  ;;  %v12100_v46 = vld [vmem:[#allocation7 + $0x224] ss:$16 sps:$4 sm:$0xff]   ;;  %v12103_v21 = vld [vmem:[#allocation7 + $0x22c] ss:$16 sps:$4 sm:$0xff]   ;;  %v12098_v40 = vld [vmem:[#allocation7 + $0x220] ss:$16 sps:$4 sm:$0xff]  }
 0x5b5   :  { %12846 = vpow2.f32 %v6092_v51 }
 0x5b6   :  { %12848 = vpow2.f32 %v6096_v52 }
 0x5b7   :  { %v13718_v24 = vpop.f32.mrb[40].mxu0  ;;  %v13720_v57 = vpop.f32.mrb[40].mxu1 }
 0x5b8   :  { %v13722_v47 = vpop.f32.mrb[41].mxu0  ;;  %v13724_v58 = vpop.f32.mrb[41].mxu1 }
 0x5b9   :  { %v5866_v62 = vpop.f32.mrb[42].mxu0  ;;  %v5907_v61 = vpop.f32.mrb[42].mxu1 }
 0x5ba   :  { %v5867_v63 = vpop.f32.mrb[43].mxu0  ;;  %v5908_v1 = vpop.f32.mrb[43].mxu1  ;;  %v12106_v61 = vld [vmem:[#allocation7 + $0x244] ss:$16 sps:$4 sm:$0xff]  }
 0x5bb   :  { %v12109_v63 = vld [vmem:[#allocation7 + $0x24c] ss:$16 sps:$4 sm:$0xff]   ;;  %v12104_v1 = vld [vmem:[#allocation7 + $0x240] ss:$16 sps:$4 sm:$0xff]  }
 0x5be   :  { %v12845_v20 = vpop.eup %12844 }
 0x5bf   :  { %v13732_v44 = vpop.f32.mrb[44].mxu0  ;;  %v5985_v27 = vpop.f32.mrb[44].mxu1  ;;  %v10966_v48 = vadd.f32 -1.0, %v12845_v20  ;;  %v12115_v20 = vld [vmem:[#allocation7 + $0x26c] ss:$16 sps:$4 sm:$0xff]  }
 0x5c0   :  { %v12847_v3 = vpop.eup %12846  ;;  %v13734_v33 = vadd.f32 %v5985_v27, %v5545_v19  ;;  %v13736_v5 = vpop.f32.mrb[45].mxu0  ;;  %v12107_v19 = vld [vmem:[#allocation7 + $0x248] ss:$16 sps:$4 sm:$0xff]   ;;  %v12110_v27 = vld [vmem:[#allocation7 + $0x260] ss:$16 sps:$4 sm:$0xff]  }
 0x5c1   :  { %v5987_v4 = vpop.f32.mrb[45].mxu1  ;;  %v12849_v6 = vpop.eup %12848  ;;  %v10967_v7 = vadd.f32 -1.0, %v12847_v3  ;;  %v6138_v12 = vsel %vm6074_vm4, %v5781_v30, %v10966_v48  ;;  %v12113_v3 = vld [vmem:[#allocation7 + $0x268] ss:$16 sps:$4 sm:$0xff]   ;;  %v12118_v48 = vld [vmem:[#allocation7 + $0x284] ss:$16 sps:$4 sm:$0xff]  }
 0x5c2   :  { %v13738_v8 = vadd.f32 %v5987_v4, %v5549_v2  ;;  %v5948_v29 = vpop.f32.mrb[46].mxu0  ;;  %v5989_v9 = vpop.f32.mrb[46].mxu1  ;;  %v10969_v10 = vadd.f32 -1.0, %v12849_v6  ;;  %v6154_v54 = vpack.c.bf16 %v6138_v12, %v6138_v12  ;;  %v12112_v2 = vld [vmem:[#allocation7 + $0x264] ss:$16 sps:$4 sm:$0xff]   ;;  %vm6084_vm15 = vcmp.gt.f32.partialorder %v13734_v33, 0.0 }
 0x5c3   :  { %v5949_v31 = vpop.f32.mrb[47].mxu0  ;;  %v5990_v11 = vpop.f32.mrb[47].mxu1  ;;  %v6139_v15 = vsel %vm6075_vm5, %v5783_v59, %v10967_v7  ;;  %v12121_v4 = vld [vmem:[#allocation7 + $0x28c] ss:$16 sps:$4 sm:$0xff]   ;;  %v12116_v6 = vld [vmem:[#allocation7 + $0x280] ss:$16 sps:$4 sm:$0xff]  }
 0x5c4   :  { %v6155_v18 = vpack.c.bf16 %v6139_v15, %v6139_v15  ;;  %v6141_v35 = vsel %vm6077_vm6, %v5824_v43, %v10969_v10  ;;  %v12119_v7 = vld [vmem:[#allocation7 + $0x288] ss:$16 sps:$4 sm:$0xff]   ;;  %v12124_v29 = vld [vmem:[#allocation7 + $0x2a4] ss:$16 sps:$4 sm:$0xff]   ;;  %v12127_v9 = vld [vmem:[#allocation7 + $0x2ac] ss:$16 sps:$4 sm:$0xff]  }
 0x5c5   :  { %v6157_v50 = vpack.c.bf16 %v6141_v35, %v6141_v35  ;;  %v12122_v10 = vld [vmem:[#allocation7 + $0x2a0] ss:$16 sps:$4 sm:$0xff]   ;;  %v12125_v31 = vld [vmem:[#allocation7 + $0x2a8] ss:$16 sps:$4 sm:$0xff]   ;;  %v12130_v11 = vld [vmem:[#allocation7 + $0x2c4] ss:$16 sps:$4 sm:$0xff]  }
 0x5c6   :  { %9297 = vmatprep.mubr.bf16.mxu0 %v6155_v18  ;;  %9625 = vmatprep.mubr.bf16.mxu1 %v6155_v18  ;;  %v12133_v12 = vld [vmem:[#allocation7 + $0x2cc] ss:$16 sps:$4 sm:$0xff]   ;;  %v12136_v15 = vld [vmem:[#allocation7 + $0x2e4] ss:$16 sps:$4 sm:$0xff]   ;;  %v12137_v18 = vld [vmem:[#allocation7 + $0x2e8] ss:$16 sps:$4 sm:$0xff]  }
 0x5c7   :  { %v6026_v37 = vpop.f32.mrb[48].mxu0  ;;  %v6067_v39 = vpop.f32.mrb[48].mxu1  ;;  %9298 = vmatmul.mubr.bf16.vlgmr.msra.gmra.mrb[52].mxu0 %v6154_v54  ;;  %9626 = vmatmul.mubr.bf16.vlgmr.msra.gmra.mrb[52].mxu1 %v6154_v54  ;;  %v12140_v35 = vld [vmem:[#allocation7 + $0x300] ss:$16 sps:$4 sm:$0xff]   ;;  %v12143_v54 = vld [vmem:[#allocation7 + $0x308] ss:$16 sps:$4 sm:$0xff]  }
 0x5c8   :  { %v13748_v30 = vadd.f32 %v6026_v37, %v5553_v13  ;;  %v13750_v22 = vadd.f32 %v6067_v39, %v5561_v14  ;;  %v6028_v42 = vpop.f32.mrb[49].mxu0  ;;  %v6069_v59 = vpop.f32.mrb[49].mxu1  ;;  %9307 = vmatpush1.bf16.msra.mxu0 %v12092_v28  ;;  %9635 = vmatpush1.bf16.msra.mxu1 %v12095_v32  ;;  %v12128_v13 = vld [vmem:[#allocation7 + $0x2c0] ss:$16 sps:$4 sm:$0xff]   ;;  %v12131_v14 = vld [vmem:[#allocation7 + $0x2c8] ss:$16 sps:$4 sm:$0xff]   ;;  %v5513_v37 = vrot.slane %v13708_v34, %v13189_v36 }
 0x5c9   :  { %v13752_v51 = vadd.f32 %v6028_v42, %v5557_v17  ;;  %v13754_v52 = vadd.f32 %v6069_v59, %v5565_v0  ;;  %v6030_v43 = vpop.f32.mrb[50].mxu0  ;;  %v6071_v53 = vpop.f32.mrb[50].mxu1  ;;  %9338 = vmatprep.mubr.bf16.mxu0 %v6157_v50  ;;  %9666 = vmatprep.mubr.bf16.mxu1 %v6157_v50  ;;  %v12139_v17 = vld [vmem:[#allocation7 + $0x2ec] ss:$16 sps:$4 sm:$0xff]   ;;  %v12134_v0 = vld [vmem:[#allocation7 + $0x2e0] ss:$16 sps:$4 sm:$0xff]   ;;  %v5525_v59 = vrot.slane %v13708_v34, %v13295_v45 }
 0x5ca   :  { %v6031_v56 = vpop.f32.mrb[51].mxu0  ;;  %v6072_v62 = vpop.f32.mrb[51].mxu1  ;;  %9308 = vmatprep.subr.bf16.mxu0 %v12100_v46  ;;  %9636 = vmatprep.subr.bf16.mxu1 %v12103_v21  ;;  %v12142_v28 = vld [vmem:[#allocation7 + $0x304] ss:$16 sps:$4 sm:$0xff]   ;;  %v12145_v32 = vld [vmem:[#allocation7 + $0x30c] ss:$16 sps:$4 sm:$0xff]   ;;  %v13761_v50 = vadd.f32 %v13716_v41, %v5513_v37 }
 0x5cb   :  { %v12148_v39 = vld [vmem:[#allocation7 + $0x324] ss:$16 sps:$4 sm:$0xff]   ;;  %v12151_v42 = vld [vmem:[#allocation7 + $0x32c] ss:$16 sps:$4 sm:$0xff]   ;;  %v12146_v46 = vld [vmem:[#allocation7 + $0x320] ss:$16 sps:$4 sm:$0xff]  }
 0x5cc   :  { %9309 = vmatpush1.bf16.msra.mxu0 %v12098_v40  ;;  %9637 = vmatpush1.bf16.msra.mxu1 %v12101_v55  ;;  %v12149_v21 = vld [vmem:[#allocation7 + $0x328] ss:$16 sps:$4 sm:$0xff]   ;;  %v12154_v43 = vld [vmem:[#allocation7 + $0x344] ss:$16 sps:$4 sm:$0xff]   ;;  %v12157_v53 = vld [vmem:[#allocation7 + $0x34c] ss:$16 sps:$4 sm:$0xff]   ;;  %v5865_v40 = vadd.f32 %v13722_v47, %v5525_v59 }
 0x5cd   :  { %9310 = vmatprep.subr.bf16.mxu0 %v12106_v61  ;;  %9638 = vmatprep.subr.bf16.mxu1 %v12109_v63  ;;  %v12152_v55 = vld [vmem:[#allocation7 + $0x340] ss:$16 sps:$4 sm:$0xff]   ;;  %v12155_v56 = vld [vmem:[#allocation7 + $0x348] ss:$16 sps:$4 sm:$0xff]   ;;  %v6094_v62 = vmul.f32 1.442695, %v13761_v50 }
 0x5ce   :  { %v12160_v45 = vld [vmem:[#allocation7 + $0x364] ss:$16 sps:$4 sm:$0xff]   ;;  %v12163_v61 = vld [vmem:[#allocation7 + $0x36c] ss:$16 sps:$4 sm:$0xff]   ;;  %v6100_v63 = vmul.f32 1.442695, %v5865_v40 }
 0x5cf   :  { %v12158_v41 = vld [vmem:[#allocation7 + $0x360] ss:$16 sps:$4 sm:$0xff]   ;;  %12850 = vpow2.f32 %v6094_v62  ;;  %v12169_v47 = vld [vmem:[#allocation7 + $0x38c] ss:$16 sps:$4 sm:$0xff]   ;;  %vm6076_vm7 = vcmp.gt.f32.partialorder %v13761_v50, 0.0  ;;  %vm6079_vm8 = vcmp.gt.f32.partialorder %v5865_v40, 0.0 }
 0x5d0   :  { %9311 = vmatpush1.bf16.msra.mxu0 %v12104_v1  ;;  %9639 = vmatpush1.bf16.msra.mxu1 %v12107_v19  ;;  %v12161_v1 = vld [vmem:[#allocation7 + $0x368] ss:$16 sps:$4 sm:$0xff]   ;;  %v12166_v19 = vld [vmem:[#allocation7 + $0x384] ss:$16 sps:$4 sm:$0xff]   ;;  %12852 = vpow2.f32 %v6100_v63  ;;  %v12199_v59 = vld [vmem:[#allocation7 + $0x42c] ss:$16 sps:$4 sm:$0xff]  }
 0x5d1   :  { %9312 = vmatprep.subr.bf16.mxu0 %v12112_v2  ;;  %9640 = vmatprep.subr.bf16.mxu1 %v12115_v20  ;;  %v12164_v2 = vld [vmem:[#allocation7 + $0x380] ss:$16 sps:$4 sm:$0xff]   ;;  %v12167_v20 = vld [vmem:[#allocation7 + $0x388] ss:$16 sps:$4 sm:$0xff]   ;;  %v12217_v63 = vld [vmem:[#allocation7 + $0x48c] ss:$16 sps:$4 sm:$0xff]  }
 0x5d2   :  { %v12191_v37 = vld [vmem:[#allocation7 + $0x408] ss:$16 sps:$4 sm:$0xff]   ;;  %v12206_v62 = vld [vmem:[#allocation7 + $0x460] ss:$16 sps:$4 sm:$0xff]   ;;  %vm6085_vm14 = vcmp.gt.f32.partialorder %v13738_v8, 0.0  ;;  %vm6087_vm0 = vcmp.gt.f32.partialorder %v13752_v51, 0.0 }
 0x5d3   :  { %vm6086_vm2 = vcmp.gt.f32.partialorder %v13748_v30, 0.0  ;;  %vm6089_vm3 = vcmp.gt.f32.partialorder %v13754_v52, 0.0  ;;  %vm6088_vm4 = vcmp.gt.f32.partialorder %v13750_v22, 0.0 }
 0x5d4   :  { %9313 = vmatpush1.bf16.msra.mxu0 %v12110_v27  ;;  %9641 = vmatpush1.bf16.msra.mxu1 %v12113_v3  ;;  %v12172_v27 = vld [vmem:[#allocation7 + $0x3a4] ss:$16 sps:$4 sm:$0xff]   ;;  %v12175_v3 = vld [vmem:[#allocation7 + $0x3ac] ss:$16 sps:$4 sm:$0xff]  }
 0x5d5   :  { %9314 = vmatprep.subr.bf16.mxu0 %v12118_v48  ;;  %9642 = vmatprep.subr.bf16.mxu1 %v12121_v4  ;;  %v12170_v48 = vld [vmem:[#allocation7 + $0x3a0] ss:$16 sps:$4 sm:$0xff]   ;;  %v12173_v4 = vld [vmem:[#allocation7 + $0x3a8] ss:$16 sps:$4 sm:$0xff]  }
 0x5d8   :  { %9315 = vmatpush1.bf16.msra.mxu0 %v12116_v6  ;;  %9643 = vmatpush1.bf16.msra.mxu1 %v12119_v7  ;;  %v12178_v6 = vld [vmem:[#allocation7 + $0x3c4] ss:$16 sps:$4 sm:$0xff]   ;;  %v12181_v7 = vld [vmem:[#allocation7 + $0x3cc] ss:$16 sps:$4 sm:$0xff]  }
 0x5d9   :  { %9316 = vmatprep.subr.bf16.mxu0 %v12124_v29  ;;  %9644 = vmatprep.subr.bf16.mxu1 %v12127_v9  ;;  %v12851_v29 = vpop.eup %12850 }
 0x5da   :  { %v12853_v9 = vpop.eup %12852 }
 0x5dc   :  { %9317 = vmatpush1.bf16.msra.mxu0 %v12122_v10  ;;  %9645 = vmatpush1.bf16.msra.mxu1 %v12125_v31  ;;  %v12176_v10 = vld [vmem:[#allocation7 + $0x3c0] ss:$16 sps:$4 sm:$0xff]   ;;  %v12179_v31 = vld [vmem:[#allocation7 + $0x3c8] ss:$16 sps:$4 sm:$0xff]  }
 0x5dd   :  { %9318 = vmatprep.subr.bf16.mxu0 %v12130_v11  ;;  %9646 = vmatprep.subr.bf16.mxu1 %v12133_v12  ;;  %v12184_v11 = vld [vmem:[#allocation7 + $0x3e4] ss:$16 sps:$4 sm:$0xff]   ;;  %v12187_v12 = vld [vmem:[#allocation7 + $0x3ec] ss:$16 sps:$4 sm:$0xff]  }
 0x5e0   :  { %9319 = vmatpush1.bf16.msra.mxu0 %v12128_v13  ;;  %9647 = vmatpush1.bf16.msra.mxu1 %v12131_v14  ;;  %v10968_v13 = vadd.f32 -1.0, %v12851_v29  ;;  %v10971_v14 = vadd.f32 -1.0, %v12853_v9  ;;  %v12230_v29 = vld [vmem:[#allocation7 + $0x4e0] ss:$16 sps:$4 sm:$0xff]   ;;  %v12233_v9 = vld [vmem:[#allocation7 + $0x4e8] ss:$16 sps:$4 sm:$0xff]  }
 0x5e1   :  { %9320 = vmatprep.subr.bf16.mxu0 %v12136_v15  ;;  %9648 = vmatprep.subr.bf16.mxu1 %v12139_v17  ;;  %v12182_v15 = vld [vmem:[#allocation7 + $0x3e0] ss:$16 sps:$4 sm:$0xff]   ;;  %v12185_v17 = vld [vmem:[#allocation7 + $0x3e8] ss:$16 sps:$4 sm:$0xff]  }
 0x5e4   :  { %9321 = vmatpush1.bf16.msra.mxu0 %v12134_v0  ;;  %9649 = vmatpush1.bf16.msra.mxu1 %v12137_v18  ;;  %v12190_v0 = vld [vmem:[#allocation7 + $0x404] ss:$16 sps:$4 sm:$0xff]   ;;  %v12193_v18 = vld [vmem:[#allocation7 + $0x40c] ss:$16 sps:$4 sm:$0xff]  }
 0x5e5   :  { %9322 = vmatprep.subr.bf16.mxu0 %v12142_v28  ;;  %9650 = vmatprep.subr.bf16.mxu1 %v12145_v32  ;;  %v6140_v28 = vsel %vm6076_vm7, %v13761_v50, %v10968_v13  ;;  %v6143_v32 = vsel %vm6079_vm8, %v5865_v40, %v10971_v14  ;;  %v12202_v50 = vld [vmem:[#allocation7 + $0x444] ss:$16 sps:$4 sm:$0xff]   ;;  %v12203_v40 = vld [vmem:[#allocation7 + $0x448] ss:$16 sps:$4 sm:$0xff]  }
 0x5e6   :  { %v12239_v13 = vld [vmem:[#allocation7 + $0x508] ss:$16 sps:$4 sm:$0xff]   ;;  %v12244_v14 = vld [vmem:[#allocation7 + $0x524] ss:$16 sps:$4 sm:$0xff]  }
 0x5e8   :  { %9323 = vmatpush1.bf16.msra.mxu0 %v12140_v35  ;;  %9651 = vmatpush1.bf16.msra.mxu1 %v12143_v54  ;;  %v12188_v35 = vld [vmem:[#allocation7 + $0x400] ss:$16 sps:$4 sm:$0xff]   ;;  %v6156_v54 = vpack.c.bf16 %v6140_v28, %v6140_v28  ;;  %v12245_v28 = vld [vmem:[#allocation7 + $0x528] ss:$16 sps:$4 sm:$0xff]  }
 0x5e9   :  { %9324 = vmatprep.subr.bf16.mxu0 %v12148_v39  ;;  %9652 = vmatprep.subr.bf16.mxu1 %v12151_v42  ;;  %v6159_v39 = vpack.c.bf16 %v6143_v32, %v6143_v32  ;;  %v12196_v42 = vld [vmem:[#allocation7 + $0x424] ss:$16 sps:$4 sm:$0xff]  }
 0x5ea   :  { %v12250_v32 = vld [vmem:[#allocation7 + $0x544] ss:$16 sps:$4 sm:$0xff]  }
 0x5ec   :  { %9325 = vmatpush1.bf16.msra.mxu0 %v12146_v46  ;;  %9653 = vmatpush1.bf16.msra.mxu1 %v12149_v21  ;;  %v12194_v46 = vld [vmem:[#allocation7 + $0x420] ss:$16 sps:$4 sm:$0xff]   ;;  %v12197_v21 = vld [vmem:[#allocation7 + $0x428] ss:$16 sps:$4 sm:$0xff]  }
 0x5ed   :  { %9326 = vmatprep.subr.bf16.mxu0 %v12154_v43  ;;  %9654 = vmatprep.subr.bf16.mxu1 %v12157_v53  ;;  %v12205_v43 = vld [vmem:[#allocation7 + $0x44c] ss:$16 sps:$4 sm:$0xff]   ;;  %v12200_v53 = vld [vmem:[#allocation7 + $0x440] ss:$16 sps:$4 sm:$0xff]  }
 0x5f0   :  { %9327 = vmatpush1.bf16.msra.mxu0 %v12152_v55  ;;  %9655 = vmatpush1.bf16.msra.mxu1 %v12155_v56  ;;  %v12208_v55 = vld [vmem:[#allocation7 + $0x464] ss:$16 sps:$4 sm:$0xff]   ;;  %v12211_v56 = vld [vmem:[#allocation7 + $0x46c] ss:$16 sps:$4 sm:$0xff]  }
 0x5f1   :  { %9328 = vmatprep.subr.bf16.mxu0 %v12160_v45  ;;  %9656 = vmatprep.subr.bf16.mxu1 %v12163_v61  ;;  %v12209_v45 = vld [vmem:[#allocation7 + $0x468] ss:$16 sps:$4 sm:$0xff]   ;;  %v12214_v61 = vld [vmem:[#allocation7 + $0x484] ss:$16 sps:$4 sm:$0xff]  }
 0x5f4   :  { %9329 = vmatpush1.bf16.msra.mxu0 %v12158_v41  ;;  %9657 = vmatpush1.bf16.msra.mxu1 %v12161_v1  ;;  %v12212_v41 = vld [vmem:[#allocation7 + $0x480] ss:$16 sps:$4 sm:$0xff]   ;;  %v12215_v1 = vld [vmem:[#allocation7 + $0x488] ss:$16 sps:$4 sm:$0xff]  }
 0x5f5   :  { %9330 = vmatprep.subr.bf16.mxu0 %v12166_v19  ;;  %9658 = vmatprep.subr.bf16.mxu1 %v12169_v47  ;;  %v12220_v19 = vld [vmem:[#allocation7 + $0x4a4] ss:$16 sps:$4 sm:$0xff]   ;;  %v12223_v47 = vld [vmem:[#allocation7 + $0x4ac] ss:$16 sps:$4 sm:$0xff]  }
 0x5f8   :  { %9331 = vmatpush1.bf16.msra.mxu0 %v12164_v2  ;;  %9659 = vmatpush1.bf16.msra.mxu1 %v12167_v20  ;;  %v12218_v2 = vld [vmem:[#allocation7 + $0x4a0] ss:$16 sps:$4 sm:$0xff]   ;;  %v12221_v20 = vld [vmem:[#allocation7 + $0x4a8] ss:$16 sps:$4 sm:$0xff]  }
 0x5f9   :  { %9332 = vmatprep.subr.bf16.mxu0 %v12172_v27  ;;  %9660 = vmatprep.subr.bf16.mxu1 %v12175_v3  ;;  %v12226_v27 = vld [vmem:[#allocation7 + $0x4c4] ss:$16 sps:$4 sm:$0xff]   ;;  %v12229_v3 = vld [vmem:[#allocation7 + $0x4cc] ss:$16 sps:$4 sm:$0xff]  }
 0x5fc   :  { %9333 = vmatpush1.bf16.msra.mxu0 %v12170_v48  ;;  %9661 = vmatpush1.bf16.msra.mxu1 %v12173_v4  ;;  %v12224_v48 = vld [vmem:[#allocation7 + $0x4c0] ss:$16 sps:$4 sm:$0xff]   ;;  %v12227_v4 = vld [vmem:[#allocation7 + $0x4c8] ss:$16 sps:$4 sm:$0xff]  }
 0x5fd   :  { %9334 = vmatprep.subr.bf16.mxu0 %v12178_v6  ;;  %9662 = vmatprep.subr.bf16.mxu1 %v12181_v7  ;;  %v12232_v6 = vld [vmem:[#allocation7 + $0x4e4] ss:$16 sps:$4 sm:$0xff]   ;;  %v12235_v7 = vld [vmem:[#allocation7 + $0x4ec] ss:$16 sps:$4 sm:$0xff]  }
 0x600   :  { %9335 = vmatpush1.bf16.msra.mxu0 %v12176_v10  ;;  %9663 = vmatpush1.bf16.msra.mxu1 %v12179_v31  ;;  %v12238_v10 = vld [vmem:[#allocation7 + $0x504] ss:$16 sps:$4 sm:$0xff]   ;;  %v12241_v31 = vld [vmem:[#allocation7 + $0x50c] ss:$16 sps:$4 sm:$0xff]  }
 0x601   :  { %9336 = vmatprep.subr.bf16.mxu0 %v12184_v11  ;;  %9664 = vmatprep.subr.bf16.mxu1 %v12187_v12  ;;  %v12236_v11 = vld [vmem:[#allocation7 + $0x500] ss:$16 sps:$4 sm:$0xff]   ;;  %v5521_v12 = vrot.slane %v13708_v34, %v13400_v38  ;;  %v12253_v38 = vld [vmem:[#allocation7 + $0x54c] ss:$16 sps:$4 sm:$0xff]  }
 0x604   :  { %9337 = vmatpush1.bf16.msra.mxu0 %v12182_v15  ;;  %9665 = vmatpush1.bf16.msra.mxu1 %v12185_v17  ;;  %v12247_v15 = vld [vmem:[#allocation7 + $0x52c] ss:$16 sps:$4 sm:$0xff]   ;;  %v5533_v17 = vrot.slane %v13708_v34, %v13301_v49  ;;  %v12251_v49 = vld [vmem:[#allocation7 + $0x548] ss:$16 sps:$4 sm:$0xff]  }
 0x605   :  { %9347 = vmatprep.subr.bf16.mxu0 %v12190_v0  ;;  %9675 = vmatprep.subr.bf16.mxu1 %v12193_v18  ;;  %v12242_v0 = vld [vmem:[#allocation7 + $0x520] ss:$16 sps:$4 sm:$0xff]   ;;  %v13772_v18 = vadd.f32 %v13718_v24, %v5521_v12  ;;  %v12259_v24 = vld [vmem:[#allocation7 + $0x56c] ss:$16 sps:$4 sm:$0xff]  }
 0x606   :  { %v12295_v12 = vld [vmem:[#allocation7 + $0x62c] ss:$16 sps:$4 sm:$0xff]  }
 0x607   :  { %9339 = vmatmul.mubr.bf16.vlgmr.msra.gmra.mrb[52].mxu0 %v6156_v54  ;;  %9667 = vmatmul.mubr.bf16.vlgmr.msra.gmra.mrb[52].mxu1 %v6156_v54  ;;  %v12248_v54 = vld [vmem:[#allocation7 + $0x540] ss:$16 sps:$4 sm:$0xff]   ;;  %vm6078_vm9 = vcmp.gt.f32.partialorder %v13772_v18, 0.0 }
 0x608   :  { %9348 = vmatpush1.bf16.msra.mxu0 %v12188_v35  ;;  %9379 = vmatprep.mubr.bf16.mxu0 %v6159_v39  ;;  %v13775_v35 = vadd.f32 %v13724_v58, %v5533_v17  ;;  %v12262_v58 = vld [vmem:[#allocation7 + $0x584] ss:$16 sps:$4 sm:$0xff]   ;;  %v12301_v17 = vld [vmem:[#allocation7 + $0x64c] ss:$16 sps:$4 sm:$0xff]  }
 0x609   :  { %9676 = vmatpush1.bf16.msra.mxu1 %v12191_v37  ;;  %9707 = vmatprep.mubr.bf16.mxu1 %v6159_v39  ;;  %v6098_v37 = vmul.f32 1.442695, %v13772_v18  ;;  %v12256_v39 = vld [vmem:[#allocation7 + $0x564] ss:$16 sps:$4 sm:$0xff]  }
 0x60a   :  { %9349 = vmatprep.subr.bf16.mxu0 %v12196_v42  ;;  %9677 = vmatprep.subr.bf16.mxu1 %v12199_v59  ;;  %v6104_v42 = vmul.f32 1.442695, %v13775_v35  ;;  %v12254_v59 = vld [vmem:[#allocation7 + $0x560] ss:$16 sps:$4 sm:$0xff]   ;;  %vm6081_vm10 = vcmp.gt.f32.partialorder %v13775_v35, 0.0 }
 0x60b   :  { %12854 = vpow2.f32 %v6098_v37  ;;  %v12313_v37 = vld [vmem:[#allocation7 + $0x68c] ss:$16 sps:$4 sm:$0xff]  }
 0x60c   :  { %9350 = vmatpush1.bf16.msra.mxu0 %v12194_v46  ;;  %v12257_v46 = vld [vmem:[#allocation7 + $0x568] ss:$16 sps:$4 sm:$0xff]   ;;  %12856 = vpow2.f32 %v6104_v42  ;;  %v12319_v42 = vld [vmem:[#allocation7 + $0x6ac] ss:$16 sps:$4 sm:$0xff]  }
 0x60d   :  { %9678 = vmatpush1.bf16.msra.mxu1 %v12197_v21  ;;  %9351 = vmatprep.subr.bf16.mxu0 %v12202_v50  ;;  %v12265_v21 = vld [vmem:[#allocation7 + $0x58c] ss:$16 sps:$4 sm:$0xff]   ;;  %v12260_v50 = vld [vmem:[#allocation7 + $0x580] ss:$16 sps:$4 sm:$0xff]  }
 0x60e   :  { %9679 = vmatprep.subr.bf16.mxu1 %v12205_v43  ;;  %v12263_v43 = vld [vmem:[#allocation7 + $0x588] ss:$16 sps:$4 sm:$0xff]  }
 0x610   :  { %9352 = vmatpush1.bf16.msra.mxu0 %v12200_v53  ;;  %v12268_v53 = vld [vmem:[#allocation7 + $0x5a4] ss:$16 sps:$4 sm:$0xff]  }
 0x611   :  { %9680 = vmatpush1.bf16.msra.mxu1 %v12203_v40  ;;  %9353 = vmatprep.subr.bf16.mxu0 %v12208_v55  ;;  %v12271_v40 = vld [vmem:[#allocation7 + $0x5ac] ss:$16 sps:$4 sm:$0xff]   ;;  %v12266_v55 = vld [vmem:[#allocation7 + $0x5a0] ss:$16 sps:$4 sm:$0xff]  }
 0x612   :  { %9681 = vmatprep.subr.bf16.mxu1 %v12211_v56  ;;  %v12269_v56 = vld [vmem:[#allocation7 + $0x5a8] ss:$16 sps:$4 sm:$0xff]  }
 0x614   :  { %9354 = vmatpush1.bf16.msra.mxu0 %v12206_v62  ;;  %v12274_v62 = vld [vmem:[#allocation7 + $0x5c4] ss:$16 sps:$4 sm:$0xff]  }
 0x615   :  { %9682 = vmatpush1.bf16.msra.mxu1 %v12209_v45  ;;  %9355 = vmatprep.subr.bf16.mxu0 %v12214_v61  ;;  %v12277_v45 = vld [vmem:[#allocation7 + $0x5cc] ss:$16 sps:$4 sm:$0xff]   ;;  %v12855_v61 = vpop.eup %12854 }
 0x616   :  { %9683 = vmatprep.subr.bf16.mxu1 %v12217_v63  ;;  %v12272_v63 = vld [vmem:[#allocation7 + $0x5c0] ss:$16 sps:$4 sm:$0xff]  }
 0x618   :  { %9356 = vmatpush1.bf16.msra.mxu0 %v12212_v41  ;;  %v12857_v41 = vpop.eup %12856 }
 0x619   :  { %9684 = vmatpush1.bf16.msra.mxu1 %v12215_v1  ;;  %9357 = vmatprep.subr.bf16.mxu0 %v12220_v19  ;;  %v12275_v1 = vld [vmem:[#allocation7 + $0x5c8] ss:$16 sps:$4 sm:$0xff]   ;;  %v12280_v19 = vld [vmem:[#allocation7 + $0x5e4] ss:$16 sps:$4 sm:$0xff]  }
 0x61a   :  { %9685 = vmatprep.subr.bf16.mxu1 %v12223_v47  ;;  %v10970_v47 = vadd.f32 -1.0, %v12855_v61  ;;  %v12332_v61 = vld [vmem:[#allocation7 + $0x700] ss:$16 sps:$4 sm:$0xff]  }
 0x61c   :  { %9358 = vmatpush1.bf16.msra.mxu0 %v12218_v2  ;;  %v12283_v2 = vld [vmem:[#allocation7 + $0x5ec] ss:$16 sps:$4 sm:$0xff]  }
 0x61d   :  { %9686 = vmatpush1.bf16.msra.mxu1 %v12221_v20  ;;  %9359 = vmatprep.subr.bf16.mxu0 %v12226_v27  ;;  %v10973_v20 = vadd.f32 -1.0, %v12857_v41  ;;  %v12278_v27 = vld [vmem:[#allocation7 + $0x5e0] ss:$16 sps:$4 sm:$0xff]   ;;  %v12335_v41 = vld [vmem:[#allocation7 + $0x708] ss:$16 sps:$4 sm:$0xff]  }
 0x61e   :  { %9687 = vmatprep.subr.bf16.mxu1 %v12229_v3  ;;  %v12281_v3 = vld [vmem:[#allocation7 + $0x5e8] ss:$16 sps:$4 sm:$0xff]  }
 0x620   :  { %9360 = vmatpush1.bf16.msra.mxu0 %v12224_v48  ;;  %v12286_v48 = vld [vmem:[#allocation7 + $0x604] ss:$16 sps:$4 sm:$0xff]  }
 0x621   :  { %9688 = vmatpush1.bf16.msra.mxu1 %v12227_v4  ;;  %9361 = vmatprep.subr.bf16.mxu0 %v12232_v6  ;;  %v6142_v4 = vsel %vm6078_vm9, %v13772_v18, %v10970_v47  ;;  %v12289_v6 = vld [vmem:[#allocation7 + $0x60c] ss:$16 sps:$4 sm:$0xff]   ;;  %v12299_v18 = vld [vmem:[#allocation7 + $0x648] ss:$16 sps:$4 sm:$0xff]   ;;  %v5541_v47 = vrot.slane %v13726_v60, %v13163_v25 }
 0x622   :  { %9689 = vmatprep.subr.bf16.mxu1 %v12235_v7  ;;  %v12284_v7 = vld [vmem:[#allocation7 + $0x600] ss:$16 sps:$4 sm:$0xff]  }
 0x624   :  { %9362 = vmatpush1.bf16.msra.mxu0 %v12230_v29  ;;  %v6145_v29 = vsel %vm6081_vm10, %v13775_v35, %v10973_v20  ;;  %v12305_v35 = vld [vmem:[#allocation7 + $0x668] ss:$16 sps:$4 sm:$0xff]  }
 0x625   :  { %9690 = vmatpush1.bf16.msra.mxu1 %v12233_v9  ;;  %9363 = vmatprep.subr.bf16.mxu0 %v12238_v10  ;;  %v6158_v9 = vpack.c.bf16 %v6142_v4, %v6142_v4  ;;  %v12287_v10 = vld [vmem:[#allocation7 + $0x608] ss:$16 sps:$4 sm:$0xff]  }
 0x626   :  { %9691 = vmatprep.subr.bf16.mxu1 %v12241_v31  ;;  %v12292_v31 = vld [vmem:[#allocation7 + $0x624] ss:$16 sps:$4 sm:$0xff]  }
 0x628   :  { %9364 = vmatpush1.bf16.msra.mxu0 %v12236_v11  ;;  %v6161_v11 = vpack.c.bf16 %v6145_v29, %v6145_v29 }
 0x629   :  { %9692 = vmatpush1.bf16.msra.mxu1 %v12239_v13  ;;  %9365 = vmatprep.subr.bf16.mxu0 %v12244_v14  ;;  %v12290_v13 = vld [vmem:[#allocation7 + $0x620] ss:$16 sps:$4 sm:$0xff]   ;;  %v12293_v14 = vld [vmem:[#allocation7 + $0x628] ss:$16 sps:$4 sm:$0xff]  }
 0x62a   :  { %9693 = vmatprep.subr.bf16.mxu1 %v12247_v15  ;;  %v12298_v15 = vld [vmem:[#allocation7 + $0x644] ss:$16 sps:$4 sm:$0xff]  }
 0x62c   :  { %9366 = vmatpush1.bf16.msra.mxu0 %v12242_v0  ;;  %v12296_v0 = vld [vmem:[#allocation7 + $0x640] ss:$16 sps:$4 sm:$0xff]  }
 0x62d   :  { %9694 = vmatpush1.bf16.msra.mxu1 %v12245_v28  ;;  %9367 = vmatprep.subr.bf16.mxu0 %v12250_v32  ;;  %v12304_v28 = vld [vmem:[#allocation7 + $0x664] ss:$16 sps:$4 sm:$0xff]   ;;  %v12307_v32 = vld [vmem:[#allocation7 + $0x66c] ss:$16 sps:$4 sm:$0xff]  }
 0x62e   :  { %9695 = vmatprep.subr.bf16.mxu1 %v12253_v38  ;;  %v12302_v38 = vld [vmem:[#allocation7 + $0x660] ss:$16 sps:$4 sm:$0xff]  }
 0x630   :  { %9368 = vmatpush1.bf16.msra.mxu0 %v12248_v54  ;;  %v12310_v54 = vld [vmem:[#allocation7 + $0x684] ss:$16 sps:$4 sm:$0xff]  }
 0x631   :  { %9696 = vmatpush1.bf16.msra.mxu1 %v12251_v49  ;;  %9369 = vmatprep.subr.bf16.mxu0 %v12256_v39  ;;  %v12308_v49 = vld [vmem:[#allocation7 + $0x680] ss:$16 sps:$4 sm:$0xff]   ;;  %v12311_v39 = vld [vmem:[#allocation7 + $0x688] ss:$16 sps:$4 sm:$0xff]  }
 0x632   :  { %9697 = vmatprep.subr.bf16.mxu1 %v12259_v24  ;;  %v12316_v24 = vld [vmem:[#allocation7 + $0x6a4] ss:$16 sps:$4 sm:$0xff]  }
 0x634   :  { %9370 = vmatpush1.bf16.msra.mxu0 %v12254_v59  ;;  %v12314_v59 = vld [vmem:[#allocation7 + $0x6a0] ss:$16 sps:$4 sm:$0xff]  }
 0x635   :  { %9698 = vmatpush1.bf16.msra.mxu1 %v12257_v46  ;;  %9371 = vmatprep.subr.bf16.mxu0 %v12262_v58  ;;  %v12317_v46 = vld [vmem:[#allocation7 + $0x6a8] ss:$16 sps:$4 sm:$0xff]   ;;  %v12322_v58 = vld [vmem:[#allocation7 + $0x6c4] ss:$16 sps:$4 sm:$0xff]  }
 0x636   :  { %9699 = vmatprep.subr.bf16.mxu1 %v12265_v21  ;;  %v12325_v21 = vld [vmem:[#allocation7 + $0x6cc] ss:$16 sps:$4 sm:$0xff]  }
 0x638   :  { %9372 = vmatpush1.bf16.msra.mxu0 %v12260_v50  ;;  %v12320_v50 = vld [vmem:[#allocation7 + $0x6c0] ss:$16 sps:$4 sm:$0xff]  }
 0x639   :  { %9700 = vmatpush1.bf16.msra.mxu1 %v12263_v43  ;;  %9373 = vmatprep.subr.bf16.mxu0 %v12268_v53  ;;  %v12323_v43 = vld [vmem:[#allocation7 + $0x6c8] ss:$16 sps:$4 sm:$0xff]   ;;  %v12328_v53 = vld [vmem:[#allocation7 + $0x6e4] ss:$16 sps:$4 sm:$0xff]  }
 0x63a   :  { %9701 = vmatprep.subr.bf16.mxu1 %v12271_v40  ;;  %v12331_v40 = vld [vmem:[#allocation7 + $0x6ec] ss:$16 sps:$4 sm:$0xff]  }
 0x63c   :  { %9374 = vmatpush1.bf16.msra.mxu0 %v12266_v55  ;;  %v12326_v55 = vld [vmem:[#allocation7 + $0x6e0] ss:$16 sps:$4 sm:$0xff]  }
 0x63d   :  { %9702 = vmatpush1.bf16.msra.mxu1 %v12269_v56  ;;  %9375 = vmatprep.subr.bf16.mxu0 %v12274_v62  ;;  %v12329_v56 = vld [vmem:[#allocation7 + $0x6e8] ss:$16 sps:$4 sm:$0xff]   ;;  %v12334_v62 = vld [vmem:[#allocation7 + $0x704] ss:$16 sps:$4 sm:$0xff]  }
 0x63e   :  { %9703 = vmatprep.subr.bf16.mxu1 %v12277_v45  ;;  %v12337_v45 = vld [vmem:[#allocation7 + $0x70c] ss:$16 sps:$4 sm:$0xff]  }
 0x640   :  { %9376 = vmatpush1.bf16.msra.mxu0 %v12272_v63  ;;  %v5529_v63 = vrot.slane %v13708_v34, %v13233_v16  ;;  %v12349_v16 = vld [vmem:[#allocation7 + $0x74c] ss:$16 sps:$4 sm:$0xff]   ;;  %v13791_v34 = vadd.f32 %v13736_v5, %v5541_v47  ;;  %v12358_v5 = vld [vmem:[#allocation7 + $0x784] ss:$16 sps:$4 sm:$0xff]  }
 0x641   :  { %9704 = vmatpush1.bf16.msra.mxu1 %v12275_v1  ;;  %9377 = vmatprep.subr.bf16.mxu0 %v12280_v19  ;;  %v12340_v1 = vld [vmem:[#allocation7 + $0x724] ss:$16 sps:$4 sm:$0xff]   ;;  %v12343_v19 = vld [vmem:[#allocation7 + $0x72c] ss:$16 sps:$4 sm:$0xff]  }
 0x642   :  { %9705 = vmatprep.subr.bf16.mxu1 %v12283_v2  ;;  %v12338_v2 = vld [vmem:[#allocation7 + $0x720] ss:$16 sps:$4 sm:$0xff]   ;;  %v13788_v20 = vadd.f32 %v13720_v57, %v5529_v63  ;;  %v12355_v57 = vld [vmem:[#allocation7 + $0x76c] ss:$16 sps:$4 sm:$0xff]   ;;  %v6108_v29 = vmul.f32 1.442695, %v13791_v34 }
 0x643   :  { %vm6083_vm12 = vcmp.gt.f32.partialorder %v13791_v34, 0.0  ;;  %v12397_v63 = vld [vmem:[#allocation7 + $0x84c] ss:$16 sps:$4 sm:$0xff]  }
 0x644   :  { %9378 = vmatpush1.bf16.msra.mxu0 %v12278_v27  ;;  %v12341_v27 = vld [vmem:[#allocation7 + $0x728] ss:$16 sps:$4 sm:$0xff]   ;;  %v6102_v4 = vmul.f32 1.442695, %v13788_v20  ;;  %vm6080_vm11 = vcmp.gt.f32.partialorder %v13788_v20, 0.0 }
 0x645   :  { %9706 = vmatpush1.bf16.msra.mxu1 %v12281_v3  ;;  %9388 = vmatprep.subr.bf16.mxu0 %v12286_v48  ;;  %v12346_v3 = vld [vmem:[#allocation7 + $0x744] ss:$16 sps:$4 sm:$0xff]   ;;  %v12344_v48 = vld [vmem:[#allocation7 + $0x740] ss:$16 sps:$4 sm:$0xff]   ;;  %v12403_v47 = vld [vmem:[#allocation7 + $0x86c] ss:$16 sps:$4 sm:$0xff]  }
 0x646   :  { %9716 = vmatprep.subr.bf16.mxu1 %v12289_v6  ;;  %v12347_v6 = vld [vmem:[#allocation7 + $0x748] ss:$16 sps:$4 sm:$0xff]   ;;  %12858 = vpow2.f32 %v6102_v4  ;;  %v12415_v4 = vld [vmem:[#allocation7 + $0x8ac] ss:$16 sps:$4 sm:$0xff]  }
 0x647   :  { %9380 = vmatmul.mubr.bf16.vlgmr.msra.gmra.mrb[52].mxu0 %v6158_v9  ;;  %12860 = vpow2.f32 %v6108_v29  ;;  %v12421_v29 = vld [vmem:[#allocation7 + $0x8cc] ss:$16 sps:$4 sm:$0xff]  }
 0x648   :  { %9708 = vmatmul.mubr.bf16.vlgmr.msra.gmra.mrb[52].mxu1 %v6158_v9  ;;  %9389 = vmatpush1.bf16.msra.mxu0 %v12284_v7  ;;  %v12352_v7 = vld [vmem:[#allocation7 + $0x764] ss:$16 sps:$4 sm:$0xff]   ;;  %v12350_v9 = vld [vmem:[#allocation7 + $0x760] ss:$16 sps:$4 sm:$0xff]  }
 0x649   :  { %9420 = vmatprep.mubr.bf16.mxu0 %v6161_v11  ;;  %9717 = vmatpush1.bf16.msra.mxu1 %v12287_v10  ;;  %v12353_v10 = vld [vmem:[#allocation7 + $0x768] ss:$16 sps:$4 sm:$0xff]  }
 0x64a   :  { %9748 = vmatprep.mubr.bf16.mxu1 %v6161_v11  ;;  %9390 = vmatprep.subr.bf16.mxu0 %v12292_v31  ;;  %v12361_v31 = vld [vmem:[#allocation7 + $0x78c] ss:$16 sps:$4 sm:$0xff]   ;;  %v12356_v11 = vld [vmem:[#allocation7 + $0x780] ss:$16 sps:$4 sm:$0xff]  }
 0x64b   :  { %9718 = vmatprep.subr.bf16.mxu1 %v12295_v12  ;;  %v12359_v12 = vld [vmem:[#allocation7 + $0x788] ss:$16 sps:$4 sm:$0xff]  }
 0x64c   :  { %9391 = vmatpush1.bf16.msra.mxu0 %v12290_v13  ;;  %v12364_v13 = vld [vmem:[#allocation7 + $0x7a4] ss:$16 sps:$4 sm:$0xff]  }
 0x64d   :  { %9719 = vmatpush1.bf16.msra.mxu1 %v12293_v14  ;;  %9392 = vmatprep.subr.bf16.mxu0 %v12298_v15  ;;  %v12367_v14 = vld [vmem:[#allocation7 + $0x7ac] ss:$16 sps:$4 sm:$0xff]   ;;  %v12362_v15 = vld [vmem:[#allocation7 + $0x7a0] ss:$16 sps:$4 sm:$0xff]  }
 0x64e   :  { %9720 = vmatprep.subr.bf16.mxu1 %v12301_v17  ;;  %v12365_v17 = vld [vmem:[#allocation7 + $0x7a8] ss:$16 sps:$4 sm:$0xff]  }
 0x650   :  { %9393 = vmatpush1.bf16.msra.mxu0 %v12296_v0  ;;  %v12370_v0 = vld [vmem:[#allocation7 + $0x7c4] ss:$16 sps:$4 sm:$0xff]  }
 0x651   :  { %9721 = vmatpush1.bf16.msra.mxu1 %v12299_v18  ;;  %9394 = vmatprep.subr.bf16.mxu0 %v12304_v28  ;;  %v12373_v18 = vld [vmem:[#allocation7 + $0x7cc] ss:$16 sps:$4 sm:$0xff]   ;;  %v12859_v28 = vpop.eup %12858 }
 0x652   :  { %9722 = vmatprep.subr.bf16.mxu1 %v12307_v32  ;;  %v12368_v32 = vld [vmem:[#allocation7 + $0x7c0] ss:$16 sps:$4 sm:$0xff]  }
 0x654   :  { %9395 = vmatpush1.bf16.msra.mxu0 %v12302_v38  ;;  %v12861_v38 = vpop.eup %12860 }
 0x655   :  { %9723 = vmatpush1.bf16.msra.mxu1 %v12305_v35  ;;  %9396 = vmatprep.subr.bf16.mxu0 %v12310_v54  ;;  %v12371_v35 = vld [vmem:[#allocation7 + $0x7c8] ss:$16 sps:$4 sm:$0xff]   ;;  %v12376_v54 = vld [vmem:[#allocation7 + $0x7e4] ss:$16 sps:$4 sm:$0xff]  }
 0x656   :  { %9724 = vmatprep.subr.bf16.mxu1 %v12313_v37  ;;  %v10972_v37 = vadd.f32 -1.0, %v12859_v28  ;;  %v12439_v28 = vld [vmem:[#allocation7 + $0x92c] ss:$16 sps:$4 sm:$0xff]  }
 0x658   :  { %9397 = vmatpush1.bf16.msra.mxu0 %v12308_v49  ;;  %v12379_v49 = vld [vmem:[#allocation7 + $0x7ec] ss:$16 sps:$4 sm:$0xff]  }
 0x659   :  { %9725 = vmatpush1.bf16.msra.mxu1 %v12311_v39  ;;  %9398 = vmatprep.subr.bf16.mxu0 %v12316_v24  ;;  %v10975_v39 = vadd.f32 -1.0, %v12861_v38  ;;  %v12374_v24 = vld [vmem:[#allocation7 + $0x7e0] ss:$16 sps:$4 sm:$0xff]  }
 0x65a   :  { %9726 = vmatprep.subr.bf16.mxu1 %v12319_v42  ;;  %v12377_v42 = vld [vmem:[#allocation7 + $0x7e8] ss:$16 sps:$4 sm:$0xff]  }
 0x65c   :  { %9399 = vmatpush1.bf16.msra.mxu0 %v12314_v59  ;;  %v12382_v59 = vld [vmem:[#allocation7 + $0x804] ss:$16 sps:$4 sm:$0xff]  }
 0x65d   :  { %9727 = vmatpush1.bf16.msra.mxu1 %v12317_v46  ;;  %9400 = vmatprep.subr.bf16.mxu0 %v12322_v58  ;;  %v6144_v46 = vsel %vm6080_vm11, %v13788_v20, %v10972_v37  ;;  %v12385_v58 = vld [vmem:[#allocation7 + $0x80c] ss:$16 sps:$4 sm:$0xff]   ;;  %v12401_v20 = vld [vmem:[#allocation7 + $0x868] ss:$16 sps:$4 sm:$0xff]  }
 0x65e   :  { %9728 = vmatprep.subr.bf16.mxu1 %v12325_v21  ;;  %v12380_v21 = vld [vmem:[#allocation7 + $0x800] ss:$16 sps:$4 sm:$0xff]   ;;  %v12445_v37 = vld [vmem:[#allocation7 + $0x94c] ss:$16 sps:$4 sm:$0xff]  }
 0x660   :  { %9401 = vmatpush1.bf16.msra.mxu0 %v12320_v50  ;;  %v6147_v50 = vsel %vm6083_vm12, %v13791_v34, %v10975_v39  ;;  %v12407_v34 = vld [vmem:[#allocation7 + $0x888] ss:$16 sps:$4 sm:$0xff]  }
 0x661   :  { %9729 = vmatpush1.bf16.msra.mxu1 %v12323_v43  ;;  %9402 = vmatprep.subr.bf16.mxu0 %v12328_v53  ;;  %v6160_v43 = vpack.c.bf16 %v6144_v46, %v6144_v46  ;;  %v12383_v53 = vld [vmem:[#allocation7 + $0x808] ss:$16 sps:$4 sm:$0xff]  }
 0x662   :  { %9730 = vmatprep.subr.bf16.mxu1 %v12331_v40  ;;  %v12388_v40 = vld [vmem:[#allocation7 + $0x824] ss:$16 sps:$4 sm:$0xff]   ;;  %v12443_v39 = vld [vmem:[#allocation7 + $0x948] ss:$16 sps:$4 sm:$0xff]  }
 0x663   :  { %v12449_v46 = vld [vmem:[#allocation7 + $0x968] ss:$16 sps:$4 sm:$0xff]  }
 0x664   :  { %9403 = vmatpush1.bf16.msra.mxu0 %v12326_v55  ;;  %v6163_v55 = vpack.c.bf16 %v6147_v50, %v6147_v50  ;;  %v12452_v50 = vld [vmem:[#allocation7 + $0x980] ss:$16 sps:$4 sm:$0xff]  }
 0x665   :  { %9731 = vmatpush1.bf16.msra.mxu1 %v12329_v56  ;;  %9404 = vmatprep.subr.bf16.mxu0 %v12334_v62  ;;  %v12391_v56 = vld [vmem:[#allocation7 + $0x82c] ss:$16 sps:$4 sm:$0xff]   ;;  %v12386_v62 = vld [vmem:[#allocation7 + $0x820] ss:$16 sps:$4 sm:$0xff]  }
 0x666   :  { %9732 = vmatprep.subr.bf16.mxu1 %v12337_v45  ;;  %v12389_v45 = vld [vmem:[#allocation7 + $0x828] ss:$16 sps:$4 sm:$0xff]  }
 0x668   :  { %9405 = vmatpush1.bf16.msra.mxu0 %v12332_v61  ;;  %v12394_v61 = vld [vmem:[#allocation7 + $0x844] ss:$16 sps:$4 sm:$0xff]  }
 0x669   :  { %9733 = vmatpush1.bf16.msra.mxu1 %v12335_v41  ;;  %9406 = vmatprep.subr.bf16.mxu0 %v12340_v1  ;;  %v12392_v41 = vld [vmem:[#allocation7 + $0x840] ss:$16 sps:$4 sm:$0xff]   ;;  %v12395_v1 = vld [vmem:[#allocation7 + $0x848] ss:$16 sps:$4 sm:$0xff]  }
 0x66a   :  { %9734 = vmatprep.subr.bf16.mxu1 %v12343_v19  ;;  %v12400_v19 = vld [vmem:[#allocation7 + $0x864] ss:$16 sps:$4 sm:$0xff]  }
 0x66c   :  { %9407 = vmatpush1.bf16.msra.mxu0 %v12338_v2  ;;  %v12398_v2 = vld [vmem:[#allocation7 + $0x860] ss:$16 sps:$4 sm:$0xff]  }
 0x66d   :  { %9735 = vmatpush1.bf16.msra.mxu1 %v12341_v27  ;;  %9408 = vmatprep.subr.bf16.mxu0 %v12346_v3  ;;  %v12406_v27 = vld [vmem:[#allocation7 + $0x884] ss:$16 sps:$4 sm:$0xff]   ;;  %v12409_v3 = vld [vmem:[#allocation7 + $0x88c] ss:$16 sps:$4 sm:$0xff]  }
 0x66e   :  { %9736 = vmatprep.subr.bf16.mxu1 %v12349_v16  ;;  %v12404_v16 = vld [vmem:[#allocation7 + $0x880] ss:$16 sps:$4 sm:$0xff]  }
 0x670   :  { %9409 = vmatpush1.bf16.msra.mxu0 %v12344_v48  ;;  %v12412_v48 = vld [vmem:[#allocation7 + $0x8a4] ss:$16 sps:$4 sm:$0xff]  }
 0x671   :  { %9737 = vmatpush1.bf16.msra.mxu1 %v12347_v6  ;;  %9410 = vmatprep.subr.bf16.mxu0 %v12352_v7  ;;  %v12410_v6 = vld [vmem:[#allocation7 + $0x8a0] ss:$16 sps:$4 sm:$0xff]   ;;  %v12413_v7 = vld [vmem:[#allocation7 + $0x8a8] ss:$16 sps:$4 sm:$0xff]  }
 0x672   :  { %9738 = vmatprep.subr.bf16.mxu1 %v12355_v57  ;;  %v12418_v57 = vld [vmem:[#allocation7 + $0x8c4] ss:$16 sps:$4 sm:$0xff]  }
 0x674   :  { %9411 = vmatpush1.bf16.msra.mxu0 %v12350_v9  ;;  %v12416_v9 = vld [vmem:[#allocation7 + $0x8c0] ss:$16 sps:$4 sm:$0xff]  }
 0x675   :  { %9739 = vmatpush1.bf16.msra.mxu1 %v12353_v10  ;;  %9412 = vmatprep.subr.bf16.mxu0 %v12358_v5  ;;  %v12419_v10 = vld [vmem:[#allocation7 + $0x8c8] ss:$16 sps:$4 sm:$0xff]   ;;  %v12424_v5 = vld [vmem:[#allocation7 + $0x8e4] ss:$16 sps:$4 sm:$0xff]  }
 0x676   :  { %9740 = vmatprep.subr.bf16.mxu1 %v12361_v31  ;;  %v12427_v31 = vld [vmem:[#allocation7 + $0x8ec] ss:$16 sps:$4 sm:$0xff]  }
 0x678   :  { %9413 = vmatpush1.bf16.msra.mxu0 %v12356_v11  ;;  %v12422_v11 = vld [vmem:[#allocation7 + $0x8e0] ss:$16 sps:$4 sm:$0xff]  }
 0x679   :  { %9741 = vmatpush1.bf16.msra.mxu1 %v12359_v12  ;;  %9414 = vmatprep.subr.bf16.mxu0 %v12364_v13  ;;  %v12425_v12 = vld [vmem:[#allocation7 + $0x8e8] ss:$16 sps:$4 sm:$0xff]   ;;  %v12430_v13 = vld [vmem:[#allocation7 + $0x904] ss:$16 sps:$4 sm:$0xff]  }
 0x67a   :  { %9742 = vmatprep.subr.bf16.mxu1 %v12367_v14  ;;  %v12433_v14 = vld [vmem:[#allocation7 + $0x90c] ss:$16 sps:$4 sm:$0xff]  }
 0x67c   :  { %9415 = vmatpush1.bf16.msra.mxu0 %v12362_v15  ;;  %v12428_v15 = vld [vmem:[#allocation7 + $0x900] ss:$16 sps:$4 sm:$0xff]  }
 0x67d   :  { %9743 = vmatpush1.bf16.msra.mxu1 %v12365_v17  ;;  %9416 = vmatprep.subr.bf16.mxu0 %v12370_v0  ;;  %v5537_v17 = vrot.slane %v13726_v60, %v13158_v23  ;;  %v12431_v0 = vld [vmem:[#allocation7 + $0x908] ss:$16 sps:$4 sm:$0xff]  }
 0x67e   :  { %9744 = vmatprep.subr.bf16.mxu1 %v12373_v18  ;;  %v12436_v18 = vld [vmem:[#allocation7 + $0x924] ss:$16 sps:$4 sm:$0xff]  }
 0x67f   :  { %v13802_v38 = vadd.f32 %v13732_v44, %v5537_v17  ;;  %v12446_v44 = vld [vmem:[#allocation7 + $0x960] ss:$16 sps:$4 sm:$0xff]  }
 0x680   :  { %9417 = vmatpush1.bf16.msra.mxu0 %v12368_v32  ;;  %v12434_v32 = vld [vmem:[#allocation7 + $0x920] ss:$16 sps:$4 sm:$0xff]  }
 0x681   :  { %9745 = vmatpush1.bf16.msra.mxu1 %v12371_v35  ;;  %9418 = vmatprep.subr.bf16.mxu0 %v12376_v54  ;;  %v12437_v35 = vld [vmem:[#allocation7 + $0x928] ss:$16 sps:$4 sm:$0xff]   ;;  %v12442_v54 = vld [vmem:[#allocation7 + $0x944] ss:$16 sps:$4 sm:$0xff]   ;;  %v6106_v60 = vmul.f32 1.442695, %v13802_v38 }
 0x682   :  { %9746 = vmatprep.subr.bf16.mxu1 %v12379_v49  ;;  %v12440_v49 = vld [vmem:[#allocation7 + $0x940] ss:$16 sps:$4 sm:$0xff]   ;;  %vm6082_vm13 = vcmp.gt.f32.partialorder %v13802_v38, 0.0 }
 0x683   :  { %12862 = vpow2.f32 %v6106_v60  ;;  %v12494_v17 = vld [vmem:[#allocation7 + $0xa60] ss:$16 sps:$4 sm:$0xff]   ;;  %v12514_v60 = vld [vmem:[#allocation7 + $0xac4] ss:$16 sps:$4 sm:$0xff]  }
 0x684   :  { %9419 = vmatpush1.bf16.msra.mxu0 %v12374_v24  ;;  %v12448_v24 = vld [vmem:[#allocation7 + $0x964] ss:$16 sps:$4 sm:$0xff]  }
 0x685   :  { %9747 = vmatpush1.bf16.msra.mxu1 %v12377_v42  ;;  %9429 = vmatprep.subr.bf16.mxu0 %v12382_v59  ;;  %v12451_v42 = vld [vmem:[#allocation7 + $0x96c] ss:$16 sps:$4 sm:$0xff]   ;;  %v6112_v59 = vmul.f32 1.442695, %v13738_v8 }
 0x686   :  { %9757 = vmatprep.subr.bf16.mxu1 %v12385_v58  ;;  %v12454_v58 = vld [vmem:[#allocation7 + $0x984] ss:$16 sps:$4 sm:$0xff]  }
 0x687   :  { %9421 = vmatmul.mubr.bf16.vlgmr.msra.gmra.mrb[52].mxu0 %v6160_v43  ;;  %12864 = vpow2.f32 %v6112_v59  ;;  %v12520_v59 = vld [vmem:[#allocation7 + $0xae4] ss:$16 sps:$4 sm:$0xff]  }
 0x688   :  { %9749 = vmatmul.mubr.bf16.vlgmr.msra.gmra.mrb[52].mxu1 %v6160_v43  ;;  %9430 = vmatpush1.bf16.msra.mxu0 %v12380_v21  ;;  %v12457_v21 = vld [vmem:[#allocation7 + $0x98c] ss:$16 sps:$4 sm:$0xff]   ;;  %v12455_v43 = vld [vmem:[#allocation7 + $0x988] ss:$16 sps:$4 sm:$0xff]  }
 0x689   :  { %9461 = vmatprep.mubr.bf16.mxu0 %v6163_v55  ;;  %9758 = vmatpush1.bf16.msra.mxu1 %v12383_v53  ;;  %v12460_v53 = vld [vmem:[#allocation7 + $0x9a4] ss:$16 sps:$4 sm:$0xff]  }
 0x68a   :  { %9789 = vmatprep.mubr.bf16.mxu1 %v6163_v55  ;;  %9431 = vmatprep.subr.bf16.mxu0 %v12388_v40  ;;  %v12463_v40 = vld [vmem:[#allocation7 + $0x9ac] ss:$16 sps:$4 sm:$0xff]   ;;  %v12458_v55 = vld [vmem:[#allocation7 + $0x9a0] ss:$16 sps:$4 sm:$0xff]  }
 0x68b   :  { %9759 = vmatprep.subr.bf16.mxu1 %v12391_v56  ;;  %v12461_v56 = vld [vmem:[#allocation7 + $0x9a8] ss:$16 sps:$4 sm:$0xff]  }
 0x68c   :  { %9432 = vmatpush1.bf16.msra.mxu0 %v12386_v62  ;;  %v12466_v62 = vld [vmem:[#allocation7 + $0x9c4] ss:$16 sps:$4 sm:$0xff]  }
 0x68d   :  { %9760 = vmatpush1.bf16.msra.mxu1 %v12389_v45  ;;  %9433 = vmatprep.subr.bf16.mxu0 %v12394_v61  ;;  %v12469_v45 = vld [vmem:[#allocation7 + $0x9cc] ss:$16 sps:$4 sm:$0xff]   ;;  %v12863_v61 = vpop.eup %12862 }
 0x68e   :  { %9761 = vmatprep.subr.bf16.mxu1 %v12397_v63  ;;  %v12464_v63 = vld [vmem:[#allocation7 + $0x9c0] ss:$16 sps:$4 sm:$0xff]  }
 0x690   :  { %9434 = vmatpush1.bf16.msra.mxu0 %v12392_v41 }
 0x691   :  { %9762 = vmatpush1.bf16.msra.mxu1 %v12395_v1  ;;  %9435 = vmatprep.subr.bf16.mxu0 %v12400_v19  ;;  %v12865_v41 = vpop.eup %12864  ;;  %v12467_v1 = vld [vmem:[#allocation7 + $0x9c8] ss:$16 sps:$4 sm:$0xff]   ;;  %v12472_v19 = vld [vmem:[#allocation7 + $0x9e4] ss:$16 sps:$4 sm:$0xff]  }
 0x692   :  { %9763 = vmatprep.subr.bf16.mxu1 %v12403_v47  ;;  %v10974_v47 = vadd.f32 -1.0, %v12863_v61  ;;  %v12541_v61 = vld [vmem:[#allocation7 + $0xb4c] ss:$16 sps:$4 sm:$0xff]  }
 0x694   :  { %9436 = vmatpush1.bf16.msra.mxu0 %v12398_v2  ;;  %v12475_v2 = vld [vmem:[#allocation7 + $0x9ec] ss:$16 sps:$4 sm:$0xff]  }
 0x695   :  { %9764 = vmatpush1.bf16.msra.mxu1 %v12401_v20  ;;  %9437 = vmatprep.subr.bf16.mxu0 %v12406_v27  ;;  %v10977_v20 = vadd.f32 -1.0, %v12865_v41  ;;  %v12470_v27 = vld [vmem:[#allocation7 + $0x9e0] ss:$16 sps:$4 sm:$0xff]   ;;  %v6110_v41 = vmul.f32 1.442695, %v13734_v33 }
 0x696   :  { %9765 = vmatprep.subr.bf16.mxu1 %v12409_v3  ;;  %v12473_v3 = vld [vmem:[#allocation7 + $0x9e8] ss:$16 sps:$4 sm:$0xff]  }
 0x697   :  { %12866 = vpow2.f32 %v6110_v41  ;;  %v12608_v41 = vld [vmem:[#allocation7 + $0xcc0] ss:$16 sps:$4 sm:$0xff]  }
 0x698   :  { %9438 = vmatpush1.bf16.msra.mxu0 %v12404_v16  ;;  %v12478_v16 = vld [vmem:[#allocation7 + $0xa04] ss:$16 sps:$4 sm:$0xff]  }
 0x699   :  { %9766 = vmatpush1.bf16.msra.mxu1 %v12407_v34  ;;  %9439 = vmatprep.subr.bf16.mxu0 %v12412_v48  ;;  %v6146_v34 = vsel %vm6082_vm13, %v13802_v38, %v10974_v47  ;;  %v12481_v48 = vld [vmem:[#allocation7 + $0xa0c] ss:$16 sps:$4 sm:$0xff]   ;;  %v12503_v38 = vld [vmem:[#allocation7 + $0xa88] ss:$16 sps:$4 sm:$0xff]  }
 0x69a   :  { %9767 = vmatprep.subr.bf16.mxu1 %v12415_v4  ;;  %v12476_v4 = vld [vmem:[#allocation7 + $0xa00] ss:$16 sps:$4 sm:$0xff]   ;;  %v12547_v47 = vld [vmem:[#allocation7 + $0xb6c] ss:$16 sps:$4 sm:$0xff]  }
 0x69c   :  { %9440 = vmatpush1.bf16.msra.mxu0 %v12410_v6  ;;  %v6149_v6 = vsel %vm6085_vm14, %v13738_v8, %v10977_v20  ;;  %v12488_v8 = vld [vmem:[#allocation7 + $0xa40] ss:$16 sps:$4 sm:$0xff]  }
 0x69d   :  { %9768 = vmatpush1.bf16.msra.mxu1 %v12413_v7  ;;  %9441 = vmatprep.subr.bf16.mxu0 %v12418_v57  ;;  %v6162_v7 = vpack.c.bf16 %v6146_v34, %v6146_v34  ;;  %v12479_v57 = vld [vmem:[#allocation7 + $0xa08] ss:$16 sps:$4 sm:$0xff]   ;;  %v12542_v20 = vld [vmem:[#allocation7 + $0xb60] ss:$16 sps:$4 sm:$0xff]  }
 0x69e   :  { %9769 = vmatprep.subr.bf16.mxu1 %v12421_v29  ;;  %v12484_v29 = vld [vmem:[#allocation7 + $0xa24] ss:$16 sps:$4 sm:$0xff]   ;;  %v12548_v34 = vld [vmem:[#allocation7 + $0xb80] ss:$16 sps:$4 sm:$0xff]  }
 0x6a0   :  { %9442 = vmatpush1.bf16.msra.mxu0 %v12416_v9  ;;  %v6165_v9 = vpack.c.bf16 %v6149_v6, %v6149_v6  ;;  %v12559_v6 = vld [vmem:[#allocation7 + $0xbac] ss:$16 sps:$4 sm:$0xff]  }
 0x6a1   :  { %9770 = vmatpush1.bf16.msra.mxu1 %v12419_v10  ;;  %9443 = vmatprep.subr.bf16.mxu0 %v12424_v5  ;;  %v12487_v10 = vld [vmem:[#allocation7 + $0xa2c] ss:$16 sps:$4 sm:$0xff]   ;;  %v12482_v5 = vld [vmem:[#allocation7 + $0xa20] ss:$16 sps:$4 sm:$0xff]  }
 0x6a2   :  { %9771 = vmatprep.subr.bf16.mxu1 %v12427_v31  ;;  %v12485_v31 = vld [vmem:[#allocation7 + $0xa28] ss:$16 sps:$4 sm:$0xff]  }
 0x6a4   :  { %9444 = vmatpush1.bf16.msra.mxu0 %v12422_v11  ;;  %v12490_v11 = vld [vmem:[#allocation7 + $0xa44] ss:$16 sps:$4 sm:$0xff]  }
 0x6a5   :  { %9772 = vmatpush1.bf16.msra.mxu1 %v12425_v12  ;;  %9445 = vmatprep.subr.bf16.mxu0 %v12430_v13  ;;  %v12493_v12 = vld [vmem:[#allocation7 + $0xa4c] ss:$16 sps:$4 sm:$0xff]   ;;  %v12491_v13 = vld [vmem:[#allocation7 + $0xa48] ss:$16 sps:$4 sm:$0xff]  }
 0x6a6   :  { %9773 = vmatprep.subr.bf16.mxu1 %v12433_v14  ;;  %v12496_v14 = vld [vmem:[#allocation7 + $0xa64] ss:$16 sps:$4 sm:$0xff]  }
 0x6a8   :  { %9446 = vmatpush1.bf16.msra.mxu0 %v12428_v15  ;;  %v12499_v15 = vld [vmem:[#allocation7 + $0xa6c] ss:$16 sps:$4 sm:$0xff]  }
 0x6a9   :  { %9774 = vmatpush1.bf16.msra.mxu1 %v12431_v0  ;;  %9447 = vmatprep.subr.bf16.mxu0 %v12436_v18  ;;  %v12497_v0 = vld [vmem:[#allocation7 + $0xa68] ss:$16 sps:$4 sm:$0xff]   ;;  %v12502_v18 = vld [vmem:[#allocation7 + $0xa84] ss:$16 sps:$4 sm:$0xff]  }
 0x6aa   :  { %9775 = vmatprep.subr.bf16.mxu1 %v12439_v28  ;;  %v12505_v28 = vld [vmem:[#allocation7 + $0xa8c] ss:$16 sps:$4 sm:$0xff]  }
 0x6ac   :  { %9448 = vmatpush1.bf16.msra.mxu0 %v12434_v32  ;;  %v12500_v32 = vld [vmem:[#allocation7 + $0xa80] ss:$16 sps:$4 sm:$0xff]  }
 0x6ad   :  { %9776 = vmatpush1.bf16.msra.mxu1 %v12437_v35  ;;  %9449 = vmatprep.subr.bf16.mxu0 %v12442_v54  ;;  %v12508_v35 = vld [vmem:[#allocation7 + $0xaa4] ss:$16 sps:$4 sm:$0xff]   ;;  %v12511_v54 = vld [vmem:[#allocation7 + $0xaac] ss:$16 sps:$4 sm:$0xff]  }
 0x6ae   :  { %9777 = vmatprep.subr.bf16.mxu1 %v12445_v37  ;;  %v12506_v37 = vld [vmem:[#allocation7 + $0xaa0] ss:$16 sps:$4 sm:$0xff]  }
 0x6b0   :  { %9450 = vmatpush1.bf16.msra.mxu0 %v12440_v49  ;;  %v12509_v49 = vld [vmem:[#allocation7 + $0xaa8] ss:$16 sps:$4 sm:$0xff]  }
 0x6b1   :  { %9778 = vmatpush1.bf16.msra.mxu1 %v12443_v39  ;;  %9451 = vmatprep.subr.bf16.mxu0 %v12448_v24  ;;  %v12517_v39 = vld [vmem:[#allocation7 + $0xacc] ss:$16 sps:$4 sm:$0xff]   ;;  %v12512_v24 = vld [vmem:[#allocation7 + $0xac0] ss:$16 sps:$4 sm:$0xff]  }
 0x6b2   :  { %9779 = vmatprep.subr.bf16.mxu1 %v12451_v42  ;;  %v12515_v42 = vld [vmem:[#allocation7 + $0xac8] ss:$16 sps:$4 sm:$0xff]  }
 0x6b4   :  { %9452 = vmatpush1.bf16.msra.mxu0 %v12446_v44  ;;  %v12523_v44 = vld [vmem:[#allocation7 + $0xaec] ss:$16 sps:$4 sm:$0xff]  }
 0x6b5   :  { %9780 = vmatpush1.bf16.msra.mxu1 %v12449_v46  ;;  %9453 = vmatprep.subr.bf16.mxu0 %v12454_v58  ;;  %v12518_v46 = vld [vmem:[#allocation7 + $0xae0] ss:$16 sps:$4 sm:$0xff]   ;;  %v12521_v58 = vld [vmem:[#allocation7 + $0xae8] ss:$16 sps:$4 sm:$0xff]  }
 0x6b6   :  { %9781 = vmatprep.subr.bf16.mxu1 %v12457_v21  ;;  %v12526_v21 = vld [vmem:[#allocation7 + $0xb04] ss:$16 sps:$4 sm:$0xff]  }
 0x6b8   :  { %9454 = vmatpush1.bf16.msra.mxu0 %v12452_v50  ;;  %v12529_v50 = vld [vmem:[#allocation7 + $0xb0c] ss:$16 sps:$4 sm:$0xff]  }
 0x6b9   :  { %9782 = vmatpush1.bf16.msra.mxu1 %v12455_v43  ;;  %9455 = vmatprep.subr.bf16.mxu0 %v12460_v53  ;;  %v12524_v43 = vld [vmem:[#allocation7 + $0xb00] ss:$16 sps:$4 sm:$0xff]   ;;  %v12527_v53 = vld [vmem:[#allocation7 + $0xb08] ss:$16 sps:$4 sm:$0xff]  }
 0x6ba   :  { %9783 = vmatprep.subr.bf16.mxu1 %v12463_v40  ;;  %v12532_v40 = vld [vmem:[#allocation7 + $0xb24] ss:$16 sps:$4 sm:$0xff]  }
 0x6bc   :  { %9456 = vmatpush1.bf16.msra.mxu0 %v12458_v55  ;;  %v12535_v55 = vld [vmem:[#allocation7 + $0xb2c] ss:$16 sps:$4 sm:$0xff]  }
 0x6bd   :  { %9784 = vmatpush1.bf16.msra.mxu1 %v12461_v56  ;;  %9457 = vmatprep.subr.bf16.mxu0 %v12466_v62  ;;  %v12530_v56 = vld [vmem:[#allocation7 + $0xb20] ss:$16 sps:$4 sm:$0xff]   ;;  %v12533_v62 = vld [vmem:[#allocation7 + $0xb28] ss:$16 sps:$4 sm:$0xff]  }
 0x6be   :  { %9785 = vmatprep.subr.bf16.mxu1 %v12469_v45  ;;  %v12538_v45 = vld [vmem:[#allocation7 + $0xb44] ss:$16 sps:$4 sm:$0xff]  }
 0x6c0   :  { %9458 = vmatpush1.bf16.msra.mxu0 %v12464_v63  ;;  %v12536_v63 = vld [vmem:[#allocation7 + $0xb40] ss:$16 sps:$4 sm:$0xff]  }
 0x6c1   :  { %9786 = vmatpush1.bf16.msra.mxu1 %v12467_v1  ;;  %9459 = vmatprep.subr.bf16.mxu0 %v12472_v19  ;;  %v12539_v1 = vld [vmem:[#allocation7 + $0xb48] ss:$16 sps:$4 sm:$0xff]   ;;  %v12544_v19 = vld [vmem:[#allocation7 + $0xb64] ss:$16 sps:$4 sm:$0xff]  }
 0x6c2   :  { %9787 = vmatprep.subr.bf16.mxu1 %v12475_v2  ;;  %v6116_v2 = vmul.f32 1.442695, %v13752_v51 }
 0x6c4   :  { %9460 = vmatpush1.bf16.msra.mxu0 %v12470_v27  ;;  %v12545_v27 = vld [vmem:[#allocation7 + $0xb68] ss:$16 sps:$4 sm:$0xff]   ;;  %12868 = vpow2.f32 %v6116_v2  ;;  %v12614_v2 = vld [vmem:[#allocation7 + $0xce0] ss:$16 sps:$4 sm:$0xff]  }
 0x6c5   :  { %9788 = vmatpush1.bf16.msra.mxu1 %v12473_v3  ;;  %9470 = vmatprep.subr.bf16.mxu0 %v12478_v16  ;;  %v12550_v3 = vld [vmem:[#allocation7 + $0xb84] ss:$16 sps:$4 sm:$0xff]   ;;  %v12553_v16 = vld [vmem:[#allocation7 + $0xb8c] ss:$16 sps:$4 sm:$0xff]  }
 0x6c6   :  { %9798 = vmatprep.subr.bf16.mxu1 %v12481_v48  ;;  %v12551_v48 = vld [vmem:[#allocation7 + $0xb88] ss:$16 sps:$4 sm:$0xff]  }
 0x6c7   :  { %9462 = vmatmul.mubr.bf16.vlgmr.msra.gmra.mrb[52].mxu0 %v6162_v7 }
 0x6c8   :  { %9790 = vmatmul.mubr.bf16.vlgmr.msra.gmra.mrb[52].mxu1 %v6162_v7  ;;  %9471 = vmatpush1.bf16.msra.mxu0 %v12476_v4  ;;  %v12556_v4 = vld [vmem:[#allocation7 + $0xba4] ss:$16 sps:$4 sm:$0xff]   ;;  %v12554_v7 = vld [vmem:[#allocation7 + $0xba0] ss:$16 sps:$4 sm:$0xff]  }
 0x6c9   :  { %9502 = vmatprep.mubr.bf16.mxu0 %v6165_v9  ;;  %9799 = vmatpush1.bf16.msra.mxu1 %v12479_v57  ;;  %v12557_v57 = vld [vmem:[#allocation7 + $0xba8] ss:$16 sps:$4 sm:$0xff]  }
 0x6ca   :  { %9830 = vmatprep.mubr.bf16.mxu1 %v6165_v9  ;;  %9472 = vmatprep.subr.bf16.mxu0 %v12484_v29  ;;  %v12562_v29 = vld [vmem:[#allocation7 + $0xbc4] ss:$16 sps:$4 sm:$0xff]   ;;  %v12565_v9 = vld [vmem:[#allocation7 + $0xbcc] ss:$16 sps:$4 sm:$0xff]  }
 0x6cb   :  { %9800 = vmatprep.subr.bf16.mxu1 %v12487_v10  ;;  %v12867_v10 = vpop.eup %12866 }
 0x6cc   :  { %9473 = vmatpush1.bf16.msra.mxu0 %v12482_v5  ;;  %v12560_v5 = vld [vmem:[#allocation7 + $0xbc0] ss:$16 sps:$4 sm:$0xff]  }
 0x6cd   :  { %9801 = vmatpush1.bf16.msra.mxu1 %v12485_v31  ;;  %9474 = vmatprep.subr.bf16.mxu0 %v12490_v11  ;;  %v12563_v11 = vld [vmem:[#allocation7 + $0xbc8] ss:$16 sps:$4 sm:$0xff]  }
 0x6ce   :  { %9802 = vmatprep.subr.bf16.mxu1 %v12493_v12  ;;  %v12869_v31 = vpop.eup %12868  ;;  %v12568_v12 = vld [vmem:[#allocation7 + $0xbe4] ss:$16 sps:$4 sm:$0xff]  }
 0x6d0   :  { %9475 = vmatpush1.bf16.msra.mxu0 %v12488_v8  ;;  %v10976_v8 = vadd.f32 -1.0, %v12867_v10  ;;  %v6114_v10 = vmul.f32 1.442695, %v13748_v30 }
 0x6d1   :  { %9803 = vmatpush1.bf16.msra.mxu1 %v12491_v13  ;;  %9476 = vmatprep.subr.bf16.mxu0 %v12496_v14  ;;  %v12571_v13 = vld [vmem:[#allocation7 + $0xbec] ss:$16 sps:$4 sm:$0xff]   ;;  %v10979_v14 = vadd.f32 -1.0, %v12869_v31  ;;  %v12640_v31 = vld [vmem:[#allocation7 + $0xd64] ss:$16 sps:$4 sm:$0xff]  }
 0x6d2   :  { %9804 = vmatprep.subr.bf16.mxu1 %v12499_v15  ;;  %v12566_v15 = vld [vmem:[#allocation7 + $0xbe0] ss:$16 sps:$4 sm:$0xff]   ;;  %12870 = vpow2.f32 %v6114_v10  ;;  %v12712_v10 = vld [vmem:[#allocation7 + $0xee4] ss:$16 sps:$4 sm:$0xff]  }
 0x6d4   :  { %9477 = vmatpush1.bf16.msra.mxu0 %v12494_v17  ;;  %v12569_v17 = vld [vmem:[#allocation7 + $0xbe8] ss:$16 sps:$4 sm:$0xff]  }
 0x6d5   :  { %9805 = vmatpush1.bf16.msra.mxu1 %v12497_v0  ;;  %9478 = vmatprep.subr.bf16.mxu0 %v12502_v18  ;;  %v12574_v0 = vld [vmem:[#allocation7 + $0xc04] ss:$16 sps:$4 sm:$0xff]   ;;  %v6148_v18 = vsel %vm6084_vm15, %v13734_v33, %v10976_v8  ;;  %v12578_v33 = vld [vmem:[#allocation7 + $0xc20] ss:$16 sps:$4 sm:$0xff]  }
 0x6d6   :  { %9806 = vmatprep.subr.bf16.mxu1 %v12505_v28  ;;  %v12577_v28 = vld [vmem:[#allocation7 + $0xc0c] ss:$16 sps:$4 sm:$0xff]   ;;  %v12638_v8 = vld [vmem:[#allocation7 + $0xd60] ss:$16 sps:$4 sm:$0xff]  }
 0x6d8   :  { %9479 = vmatpush1.bf16.msra.mxu0 %v12500_v32  ;;  %v12572_v32 = vld [vmem:[#allocation7 + $0xc00] ss:$16 sps:$4 sm:$0xff]  }
 0x6d9   :  { %9807 = vmatpush1.bf16.msra.mxu1 %v12503_v38  ;;  %9480 = vmatprep.subr.bf16.mxu0 %v12508_v35  ;;  %v6151_v38 = vsel %vm6087_vm0, %v13752_v51, %v10979_v14  ;;  %v6164_v35 = vpack.c.bf16 %v6148_v18, %v6148_v18  ;;  %v12584_v51 = vld [vmem:[#allocation7 + $0xc40] ss:$16 sps:$4 sm:$0xff]   ;;  %v12646_v14 = vld [vmem:[#allocation7 + $0xd84] ss:$16 sps:$4 sm:$0xff]  }
 0x6da   :  { %9808 = vmatprep.subr.bf16.mxu1 %v12511_v54  ;;  %v12575_v54 = vld [vmem:[#allocation7 + $0xc08] ss:$16 sps:$4 sm:$0xff]   ;;  %v12652_v18 = vld [vmem:[#allocation7 + $0xda4] ss:$16 sps:$4 sm:$0xff]  }
 0x6dc   :  { %9481 = vmatpush1.bf16.msra.mxu0 %v12506_v37  ;;  %v12580_v37 = vld [vmem:[#allocation7 + $0xc24] ss:$16 sps:$4 sm:$0xff]  }
 0x6dd   :  { %9809 = vmatpush1.bf16.msra.mxu1 %v12509_v49  ;;  %9482 = vmatprep.subr.bf16.mxu0 %v12514_v60  ;;  %v6167_v49 = vpack.c.bf16 %v6151_v38, %v6151_v38  ;;  %v12583_v60 = vld [vmem:[#allocation7 + $0xc2c] ss:$16 sps:$4 sm:$0xff]   ;;  %v12653_v38 = vld [vmem:[#allocation7 + $0xda8] ss:$16 sps:$4 sm:$0xff]  }
 0x6de   :  { %9810 = vmatprep.subr.bf16.mxu1 %v12517_v39  ;;  %v12581_v39 = vld [vmem:[#allocation7 + $0xc28] ss:$16 sps:$4 sm:$0xff]  }
 0x6e0   :  { %9483 = vmatpush1.bf16.msra.mxu0 %v12512_v24  ;;  %v12586_v24 = vld [vmem:[#allocation7 + $0xc44] ss:$16 sps:$4 sm:$0xff]  }
 0x6e1   :  { %9811 = vmatpush1.bf16.msra.mxu1 %v12515_v42  ;;  %9484 = vmatprep.subr.bf16.mxu0 %v12520_v59  ;;  %v12589_v42 = vld [vmem:[#allocation7 + $0xc4c] ss:$16 sps:$4 sm:$0xff]   ;;  %v12587_v59 = vld [vmem:[#allocation7 + $0xc48] ss:$16 sps:$4 sm:$0xff]  }
 0x6e2   :  { %9812 = vmatprep.subr.bf16.mxu1 %v12523_v44  ;;  %v12592_v44 = vld [vmem:[#allocation7 + $0xc64] ss:$16 sps:$4 sm:$0xff]  }
 0x6e4   :  { %9485 = vmatpush1.bf16.msra.mxu0 %v12518_v46  ;;  %v12595_v46 = vld [vmem:[#allocation7 + $0xc6c] ss:$16 sps:$4 sm:$0xff]  }
 0x6e5   :  { %9813 = vmatpush1.bf16.msra.mxu1 %v12521_v58  ;;  %9486 = vmatprep.subr.bf16.mxu0 %v12526_v21  ;;  %v12590_v58 = vld [vmem:[#allocation7 + $0xc60] ss:$16 sps:$4 sm:$0xff]   ;;  %v12593_v21 = vld [vmem:[#allocation7 + $0xc68] ss:$16 sps:$4 sm:$0xff]  }
 0x6e6   :  { %9814 = vmatprep.subr.bf16.mxu1 %v12529_v50  ;;  %v12598_v50 = vld [vmem:[#allocation7 + $0xc84] ss:$16 sps:$4 sm:$0xff]  }
 0x6e8   :  { %9487 = vmatpush1.bf16.msra.mxu0 %v12524_v43  ;;  %v12601_v43 = vld [vmem:[#allocation7 + $0xc8c] ss:$16 sps:$4 sm:$0xff]  }
 0x6e9   :  { %9815 = vmatpush1.bf16.msra.mxu1 %v12527_v53  ;;  %9488 = vmatprep.subr.bf16.mxu0 %v12532_v40  ;;  %v12596_v53 = vld [vmem:[#allocation7 + $0xc80] ss:$16 sps:$4 sm:$0xff]   ;;  %v12599_v40 = vld [vmem:[#allocation7 + $0xc88] ss:$16 sps:$4 sm:$0xff]  }
 0x6ea   :  { %9816 = vmatprep.subr.bf16.mxu1 %v12535_v55  ;;  %v12604_v55 = vld [vmem:[#allocation7 + $0xca4] ss:$16 sps:$4 sm:$0xff]  }
 0x6ec   :  { %9489 = vmatpush1.bf16.msra.mxu0 %v12530_v56  ;;  %v12607_v56 = vld [vmem:[#allocation7 + $0xcac] ss:$16 sps:$4 sm:$0xff]  }
 0x6ed   :  { %9817 = vmatpush1.bf16.msra.mxu1 %v12533_v62  ;;  %9490 = vmatprep.subr.bf16.mxu0 %v12538_v45  ;;  %v12602_v62 = vld [vmem:[#allocation7 + $0xca0] ss:$16 sps:$4 sm:$0xff]   ;;  %v12605_v45 = vld [vmem:[#allocation7 + $0xca8] ss:$16 sps:$4 sm:$0xff]  }
 0x6ee   :  { %9818 = vmatprep.subr.bf16.mxu1 %v12541_v61  ;;  %v12610_v61 = vld [vmem:[#allocation7 + $0xcc4] ss:$16 sps:$4 sm:$0xff]  }
 0x6f0   :  { %9491 = vmatpush1.bf16.msra.mxu0 %v12536_v63  ;;  %v12613_v63 = vld [vmem:[#allocation7 + $0xccc] ss:$16 sps:$4 sm:$0xff]  }
 0x6f1   :  { %9819 = vmatpush1.bf16.msra.mxu1 %v12539_v1  ;;  %9492 = vmatprep.subr.bf16.mxu0 %v12544_v19  ;;  %v12611_v1 = vld [vmem:[#allocation7 + $0xcc8] ss:$16 sps:$4 sm:$0xff]   ;;  %v12616_v19 = vld [vmem:[#allocation7 + $0xce4] ss:$16 sps:$4 sm:$0xff]  }
 0x6f2   :  { %9820 = vmatprep.subr.bf16.mxu1 %v12547_v47  ;;  %v12619_v47 = vld [vmem:[#allocation7 + $0xcec] ss:$16 sps:$4 sm:$0xff]  }
 0x6f4   :  { %9493 = vmatpush1.bf16.msra.mxu0 %v12542_v20  ;;  %v12617_v20 = vld [vmem:[#allocation7 + $0xce8] ss:$16 sps:$4 sm:$0xff]  }
 0x6f5   :  { %9821 = vmatpush1.bf16.msra.mxu1 %v12545_v27  ;;  %9494 = vmatprep.subr.bf16.mxu0 %v12550_v3  ;;  %v12622_v27 = vld [vmem:[#allocation7 + $0xd04] ss:$16 sps:$4 sm:$0xff]   ;;  %v12625_v3 = vld [vmem:[#allocation7 + $0xd0c] ss:$16 sps:$4 sm:$0xff]  }
 0x6f6   :  { %9822 = vmatprep.subr.bf16.mxu1 %v12553_v16  ;;  %v12620_v16 = vld [vmem:[#allocation7 + $0xd00] ss:$16 sps:$4 sm:$0xff]  }
 0x6f8   :  { %9495 = vmatpush1.bf16.msra.mxu0 %v12548_v34  ;;  %v12623_v34 = vld [vmem:[#allocation7 + $0xd08] ss:$16 sps:$4 sm:$0xff]  }
 0x6f9   :  { %9823 = vmatpush1.bf16.msra.mxu1 %v12551_v48  ;;  %9496 = vmatprep.subr.bf16.mxu0 %v12556_v4  ;;  %v12628_v48 = vld [vmem:[#allocation7 + $0xd24] ss:$16 sps:$4 sm:$0xff]   ;;  %v12631_v4 = vld [vmem:[#allocation7 + $0xd2c] ss:$16 sps:$4 sm:$0xff]  }
 0x6fa   :  { %9824 = vmatprep.subr.bf16.mxu1 %v12559_v6  ;;  %v12626_v6 = vld [vmem:[#allocation7 + $0xd20] ss:$16 sps:$4 sm:$0xff]  }
 0x6fc   :  { %9497 = vmatpush1.bf16.msra.mxu0 %v12554_v7  ;;  %v12629_v7 = vld [vmem:[#allocation7 + $0xd28] ss:$16 sps:$4 sm:$0xff]  }
 0x6fd   :  { %9825 = vmatpush1.bf16.msra.mxu1 %v12557_v57  ;;  %9498 = vmatprep.subr.bf16.mxu0 %v12562_v29  ;;  %v12634_v57 = vld [vmem:[#allocation7 + $0xd44] ss:$16 sps:$4 sm:$0xff]   ;;  %v12637_v29 = vld [vmem:[#allocation7 + $0xd4c] ss:$16 sps:$4 sm:$0xff]  }
 0x6fe   :  { %9826 = vmatprep.subr.bf16.mxu1 %v12565_v9  ;;  %v12632_v9 = vld [vmem:[#allocation7 + $0xd40] ss:$16 sps:$4 sm:$0xff]  }
 0x700   :  { %9499 = vmatpush1.bf16.msra.mxu0 %v12560_v5  ;;  %v12635_v5 = vld [vmem:[#allocation7 + $0xd48] ss:$16 sps:$4 sm:$0xff]  }
 0x701   :  { %9827 = vmatpush1.bf16.msra.mxu1 %v12563_v11  ;;  %9500 = vmatprep.subr.bf16.mxu0 %v12568_v12  ;;  %v12643_v11 = vld [vmem:[#allocation7 + $0xd6c] ss:$16 sps:$4 sm:$0xff]   ;;  %v6120_v12 = vmul.f32 1.442695, %v13754_v52 }
 0x702   :  { %9828 = vmatprep.subr.bf16.mxu1 %v12571_v13  ;;  %v12641_v13 = vld [vmem:[#allocation7 + $0xd68] ss:$16 sps:$4 sm:$0xff]  }
 0x703   :  { %12872 = vpow2.f32 %v6120_v12  ;;  %v12718_v12 = vld [vmem:[#allocation7 + $0xf04] ss:$16 sps:$4 sm:$0xff]  }
 0x704   :  { %9501 = vmatpush1.bf16.msra.mxu0 %v12566_v15  ;;  %v12649_v15 = vld [vmem:[#allocation7 + $0xd8c] ss:$16 sps:$4 sm:$0xff]  }
 0x705   :  { %9829 = vmatpush1.bf16.msra.mxu1 %v12569_v17  ;;  %9511 = vmatprep.subr.bf16.mxu0 %v12574_v0  ;;  %v12644_v17 = vld [vmem:[#allocation7 + $0xd80] ss:$16 sps:$4 sm:$0xff]   ;;  %v12647_v0 = vld [vmem:[#allocation7 + $0xd88] ss:$16 sps:$4 sm:$0xff]  }
 0x706   :  { %9839 = vmatprep.subr.bf16.mxu1 %v12577_v28  ;;  %v12655_v28 = vld [vmem:[#allocation7 + $0xdac] ss:$16 sps:$4 sm:$0xff]  }
 0x707   :  { %9503 = vmatmul.mubr.bf16.vlgmr.msra.gmra.mrb[52].mxu0 %v6164_v35 }
 0x708   :  { %9831 = vmatmul.mubr.bf16.vlgmr.msra.gmra.mrb[52].mxu1 %v6164_v35  ;;  %9512 = vmatpush1.bf16.msra.mxu0 %v12572_v32  ;;  %v12650_v32 = vld [vmem:[#allocation7 + $0xda0] ss:$16 sps:$4 sm:$0xff]   ;;  %v12658_v35 = vld [vmem:[#allocation7 + $0xdc4] ss:$16 sps:$4 sm:$0xff]  }
 0x709   :  { %9543 = vmatprep.mubr.bf16.mxu0 %v6167_v49  ;;  %9840 = vmatpush1.bf16.msra.mxu1 %v12575_v54  ;;  %v12661_v54 = vld [vmem:[#allocation7 + $0xdcc] ss:$16 sps:$4 sm:$0xff]  }
 0x70a   :  { %9871 = vmatprep.mubr.bf16.mxu1 %v6167_v49  ;;  %9513 = vmatprep.subr.bf16.mxu0 %v12580_v37  ;;  %v12871_v37 = vpop.eup %12870  ;;  %v12656_v49 = vld [vmem:[#allocation7 + $0xdc0] ss:$16 sps:$4 sm:$0xff]  }
 0x70b   :  { %9841 = vmatprep.subr.bf16.mxu1 %v12583_v60 }
 0x70c   :  { %9514 = vmatpush1.bf16.msra.mxu0 %v12578_v33  ;;  %v12659_v33 = vld [vmem:[#allocation7 + $0xdc8] ss:$16 sps:$4 sm:$0xff]  }
 0x70d   :  { %9842 = vmatpush1.bf16.msra.mxu1 %v12581_v39  ;;  %9515 = vmatprep.subr.bf16.mxu0 %v12586_v24  ;;  %v12873_v60 = vpop.eup %12872  ;;  %v12664_v39 = vld [vmem:[#allocation7 + $0xde4] ss:$16 sps:$4 sm:$0xff]   ;;  %v10978_v24 = vadd.f32 -1.0, %v12871_v37 }
 0x70e   :  { %9843 = vmatprep.subr.bf16.mxu1 %v12589_v42  ;;  %v12667_v42 = vld [vmem:[#allocation7 + $0xdec] ss:$16 sps:$4 sm:$0xff]   ;;  %v12736_v37 = vld [vmem:[#allocation7 + $0xf64] ss:$16 sps:$4 sm:$0xff]  }
 0x710   :  { %9516 = vmatpush1.bf16.msra.mxu0 %v12584_v51  ;;  %v10981_v51 = vadd.f32 -1.0, %v12873_v60  ;;  %v12734_v60 = vld [vmem:[#allocation7 + $0xf60] ss:$16 sps:$4 sm:$0xff]  }
 0x711   :  { %9844 = vmatpush1.bf16.msra.mxu1 %v12587_v59  ;;  %9517 = vmatprep.subr.bf16.mxu0 %v12592_v44  ;;  %v12662_v59 = vld [vmem:[#allocation7 + $0xde0] ss:$16 sps:$4 sm:$0xff]   ;;  %v12665_v44 = vld [vmem:[#allocation7 + $0xde8] ss:$16 sps:$4 sm:$0xff]  }
 0x712   :  { %9845 = vmatprep.subr.bf16.mxu1 %v12595_v46  ;;  %v12670_v46 = vld [vmem:[#allocation7 + $0xe04] ss:$16 sps:$4 sm:$0xff]  }
 0x714   :  { %9518 = vmatpush1.bf16.msra.mxu0 %v12590_v58  ;;  %v6150_v58 = vsel %vm6086_vm2, %v13748_v30, %v10978_v24  ;;  %v12674_v30 = vld [vmem:[#allocation7 + $0xe20] ss:$16 sps:$4 sm:$0xff]   ;;  %v12745_v24 = vld [vmem:[#allocation7 + $0xf8c] ss:$16 sps:$4 sm:$0xff]  }
 0x715   :  { %9846 = vmatpush1.bf16.msra.mxu1 %v12593_v21  ;;  %9519 = vmatprep.subr.bf16.mxu0 %v12598_v50  ;;  %v12673_v21 = vld [vmem:[#allocation7 + $0xe0c] ss:$16 sps:$4 sm:$0xff]   ;;  %v12668_v50 = vld [vmem:[#allocation7 + $0xe00] ss:$16 sps:$4 sm:$0xff]  }
 0x716   :  { %9847 = vmatprep.subr.bf16.mxu1 %v12601_v43  ;;  %v6153_v43 = vsel %vm6089_vm3, %v13754_v52, %v10981_v51  ;;  %v12680_v52 = vld [vmem:[#allocation7 + $0xe40] ss:$16 sps:$4 sm:$0xff]   ;;  %v12743_v51 = vld [vmem:[#allocation7 + $0xf88] ss:$16 sps:$4 sm:$0xff]  }
 0x718   :  { %9520 = vmatpush1.bf16.msra.mxu0 %v12596_v53  ;;  %v6166_v53 = vpack.c.bf16 %v6150_v58, %v6150_v58  ;;  %v12749_v58 = vld [vmem:[#allocation7 + $0xfa8] ss:$16 sps:$4 sm:$0xff]  }
 0x719   :  { %9848 = vmatpush1.bf16.msra.mxu1 %v12599_v40  ;;  %9521 = vmatprep.subr.bf16.mxu0 %v12604_v55  ;;  %v12671_v40 = vld [vmem:[#allocation7 + $0xe08] ss:$16 sps:$4 sm:$0xff]   ;;  %v12676_v55 = vld [vmem:[#allocation7 + $0xe24] ss:$16 sps:$4 sm:$0xff]  }
 0x71a   :  { %9849 = vmatprep.subr.bf16.mxu1 %v12607_v56  ;;  %v6169_v56 = vpack.c.bf16 %v6153_v43, %v6153_v43 }
 0x71c   :  { %9522 = vmatpush1.bf16.msra.mxu0 %v12602_v62  ;;  %v12679_v62 = vld [vmem:[#allocation7 + $0xe2c] ss:$16 sps:$4 sm:$0xff]  }
 0x71d   :  { %9850 = vmatpush1.bf16.msra.mxu1 %v12605_v45  ;;  %9523 = vmatprep.subr.bf16.mxu0 %v12610_v61  ;;  %v12677_v45 = vld [vmem:[#allocation7 + $0xe28] ss:$16 sps:$4 sm:$0xff]   ;;  %v12682_v61 = vld [vmem:[#allocation7 + $0xe44] ss:$16 sps:$4 sm:$0xff]  }
 0x71e   :  { %9851 = vmatprep.subr.bf16.mxu1 %v12613_v63  ;;  %v12685_v63 = vld [vmem:[#allocation7 + $0xe4c] ss:$16 sps:$4 sm:$0xff]  }
 0x720   :  { %9524 = vmatpush1.bf16.msra.mxu0 %v12608_v41  ;;  %v12683_v41 = vld [vmem:[#allocation7 + $0xe48] ss:$16 sps:$4 sm:$0xff]  }
 0x721   :  { %9852 = vmatpush1.bf16.msra.mxu1 %v12611_v1  ;;  %9525 = vmatprep.subr.bf16.mxu0 %v12616_v19  ;;  %v12688_v1 = vld [vmem:[#allocation7 + $0xe64] ss:$16 sps:$4 sm:$0xff]   ;;  %v12691_v19 = vld [vmem:[#allocation7 + $0xe6c] ss:$16 sps:$4 sm:$0xff]  }
 0x722   :  { %9853 = vmatprep.subr.bf16.mxu1 %v12619_v47  ;;  %v12686_v47 = vld [vmem:[#allocation7 + $0xe60] ss:$16 sps:$4 sm:$0xff]  }
 0x724   :  { %9526 = vmatpush1.bf16.msra.mxu0 %v12614_v2  ;;  %v12689_v2 = vld [vmem:[#allocation7 + $0xe68] ss:$16 sps:$4 sm:$0xff]  }
 0x725   :  { %9854 = vmatpush1.bf16.msra.mxu1 %v12617_v20  ;;  %9527 = vmatprep.subr.bf16.mxu0 %v12622_v27  ;;  %v12694_v20 = vld [vmem:[#allocation7 + $0xe84] ss:$16 sps:$4 sm:$0xff]   ;;  %v12697_v27 = vld [vmem:[#allocation7 + $0xe8c] ss:$16 sps:$4 sm:$0xff]  }
 0x726   :  { %9855 = vmatprep.subr.bf16.mxu1 %v12625_v3  ;;  %v12692_v3 = vld [vmem:[#allocation7 + $0xe80] ss:$16 sps:$4 sm:$0xff]  }
 0x728   :  { %9528 = vmatpush1.bf16.msra.mxu0 %v12620_v16  ;;  %v12695_v16 = vld [vmem:[#allocation7 + $0xe88] ss:$16 sps:$4 sm:$0xff]  }
 0x729   :  { %9856 = vmatpush1.bf16.msra.mxu1 %v12623_v34  ;;  %9529 = vmatprep.subr.bf16.mxu0 %v12628_v48  ;;  %v12700_v34 = vld [vmem:[#allocation7 + $0xea4] ss:$16 sps:$4 sm:$0xff]   ;;  %v12703_v48 = vld [vmem:[#allocation7 + $0xeac] ss:$16 sps:$4 sm:$0xff]  }
 0x72a   :  { %9857 = vmatprep.subr.bf16.mxu1 %v12631_v4  ;;  %v12698_v4 = vld [vmem:[#allocation7 + $0xea0] ss:$16 sps:$4 sm:$0xff]  }
 0x72c   :  { %9530 = vmatpush1.bf16.msra.mxu0 %v12626_v6  ;;  %v12701_v6 = vld [vmem:[#allocation7 + $0xea8] ss:$16 sps:$4 sm:$0xff]  }
 0x72d   :  { %9858 = vmatpush1.bf16.msra.mxu1 %v12629_v7  ;;  %9531 = vmatprep.subr.bf16.mxu0 %v12634_v57  ;;  %v12706_v7 = vld [vmem:[#allocation7 + $0xec4] ss:$16 sps:$4 sm:$0xff]   ;;  %v12709_v57 = vld [vmem:[#allocation7 + $0xecc] ss:$16 sps:$4 sm:$0xff]  }
 0x72e   :  { %9859 = vmatprep.subr.bf16.mxu1 %v12637_v29  ;;  %v12704_v29 = vld [vmem:[#allocation7 + $0xec0] ss:$16 sps:$4 sm:$0xff]  }
 0x730   :  { %9532 = vmatpush1.bf16.msra.mxu0 %v12632_v9  ;;  %v12707_v9 = vld [vmem:[#allocation7 + $0xec8] ss:$16 sps:$4 sm:$0xff]  }
 0x731   :  { %9860 = vmatpush1.bf16.msra.mxu1 %v12635_v5  ;;  %9533 = vmatprep.subr.bf16.mxu0 %v12640_v31  ;;  %v12715_v5 = vld [vmem:[#allocation7 + $0xeec] ss:$16 sps:$4 sm:$0xff]   ;;  %v12710_v31 = vld [vmem:[#allocation7 + $0xee0] ss:$16 sps:$4 sm:$0xff]  }
 0x732   :  { %9861 = vmatprep.subr.bf16.mxu1 %v12643_v11  ;;  %v12713_v11 = vld [vmem:[#allocation7 + $0xee8] ss:$16 sps:$4 sm:$0xff]  }
 0x734   :  { %9534 = vmatpush1.bf16.msra.mxu0 %v12638_v8  ;;  %v12721_v8 = vld [vmem:[#allocation7 + $0xf0c] ss:$16 sps:$4 sm:$0xff]  }
 0x735   :  { %9862 = vmatpush1.bf16.msra.mxu1 %v12641_v13  ;;  %9535 = vmatprep.subr.bf16.mxu0 %v12646_v14  ;;  %v12716_v13 = vld [vmem:[#allocation7 + $0xf00] ss:$16 sps:$4 sm:$0xff]   ;;  %v12719_v14 = vld [vmem:[#allocation7 + $0xf08] ss:$16 sps:$4 sm:$0xff]  }
 0x736   :  { %9863 = vmatprep.subr.bf16.mxu1 %v12649_v15  ;;  %v12724_v15 = vld [vmem:[#allocation7 + $0xf24] ss:$16 sps:$4 sm:$0xff]  }
 0x738   :  { %9536 = vmatpush1.bf16.msra.mxu0 %v12644_v17  ;;  %v12727_v17 = vld [vmem:[#allocation7 + $0xf2c] ss:$16 sps:$4 sm:$0xff]  }
 0x739   :  { %9864 = vmatpush1.bf16.msra.mxu1 %v12647_v0  ;;  %9537 = vmatprep.subr.bf16.mxu0 %v12652_v18  ;;  %v12722_v0 = vld [vmem:[#allocation7 + $0xf20] ss:$16 sps:$4 sm:$0xff]   ;;  %v12725_v18 = vld [vmem:[#allocation7 + $0xf28] ss:$16 sps:$4 sm:$0xff]  }
 0x73a   :  { %9865 = vmatprep.subr.bf16.mxu1 %v12655_v28  ;;  %v12730_v28 = vld [vmem:[#allocation7 + $0xf44] ss:$16 sps:$4 sm:$0xff]  }
 0x73c   :  { %9538 = vmatpush1.bf16.msra.mxu0 %v12650_v32  ;;  %v12733_v32 = vld [vmem:[#allocation7 + $0xf4c] ss:$16 sps:$4 sm:$0xff]  }
 0x73d   :  { %9866 = vmatpush1.bf16.msra.mxu1 %v12653_v38  ;;  %9539 = vmatprep.subr.bf16.mxu0 %v12658_v35  ;;  %v12728_v38 = vld [vmem:[#allocation7 + $0xf40] ss:$16 sps:$4 sm:$0xff]   ;;  %v6118_v35 = vmul.f32 1.442695, %v13750_v22 }
 0x73e   :  { %9867 = vmatprep.subr.bf16.mxu1 %v12661_v54  ;;  %v12731_v54 = vld [vmem:[#allocation7 + $0xf48] ss:$16 sps:$4 sm:$0xff]  }
 0x73f   :  { %12874 = vpow2.f32 %v6118_v35 }
 0x740   :  { %9540 = vmatpush1.bf16.msra.mxu0 %v12656_v49  ;;  %v12739_v49 = vld [vmem:[#allocation7 + $0xf6c] ss:$16 sps:$4 sm:$0xff]  }
 0x741   :  { %9868 = vmatpush1.bf16.msra.mxu1 %v12659_v33  ;;  %9541 = vmatprep.subr.bf16.mxu0 %v12664_v39  ;;  %v12737_v33 = vld [vmem:[#allocation7 + $0xf68] ss:$16 sps:$4 sm:$0xff]   ;;  %v12742_v39 = vld [vmem:[#allocation7 + $0xf84] ss:$16 sps:$4 sm:$0xff]  }
 0x742   :  { %9869 = vmatprep.subr.bf16.mxu1 %v12667_v42  ;;  %v12740_v42 = vld [vmem:[#allocation7 + $0xf80] ss:$16 sps:$4 sm:$0xff]  }
 0x744   :  { %9542 = vmatpush1.bf16.msra.mxu0 %v12662_v59  ;;  %v12748_v59 = vld [vmem:[#allocation7 + $0xfa4] ss:$16 sps:$4 sm:$0xff]  }
 0x745   :  { %9870 = vmatpush1.bf16.msra.mxu1 %v12665_v44  ;;  %9552 = vmatprep.subr.bf16.mxu0 %v12670_v46  ;;  %v12751_v44 = vld [vmem:[#allocation7 + $0xfac] ss:$16 sps:$4 sm:$0xff]   ;;  %v12746_v46 = vld [vmem:[#allocation7 + $0xfa0] ss:$16 sps:$4 sm:$0xff]  }
 0x746   :  { %9880 = vmatprep.subr.bf16.mxu1 %v12673_v21  ;;  %v12754_v21 = vld [vmem:[#allocation7 + $0xfc4] ss:$16 sps:$4 sm:$0xff]  }
 0x747   :  { %9544 = vmatmul.mubr.bf16.vlgmr.msra.gmra.mrb[52].mxu0 %v6166_v53 }
 0x748   :  { %9872 = vmatmul.mubr.bf16.vlgmr.msra.gmra.mrb[52].mxu1 %v6166_v53  ;;  %9553 = vmatpush1.bf16.msra.mxu0 %v12668_v50  ;;  %v12757_v50 = vld [vmem:[#allocation7 + $0xfcc] ss:$16 sps:$4 sm:$0xff]   ;;  %v12752_v53 = vld [vmem:[#allocation7 + $0xfc0] ss:$16 sps:$4 sm:$0xff]  }
 0x749   :  { %9584 = vmatprep.mubr.bf16.mxu0 %v6169_v56  ;;  %9881 = vmatpush1.bf16.msra.mxu1 %v12671_v40  ;;  %v12875_v43 = vpop.eup %12874  ;;  %v12755_v40 = vld [vmem:[#allocation7 + $0xfc8] ss:$16 sps:$4 sm:$0xff]  }
 0x74a   :  { %9912 = vmatprep.mubr.bf16.mxu1 %v6169_v56  ;;  %9554 = vmatprep.subr.bf16.mxu0 %v12676_v55  ;;  %v12760_v55 = vld [vmem:[#allocation7 + $0xfe4] ss:$16 sps:$4 sm:$0xff]   ;;  %v10980_v56 = vadd.f32 -1.0, %v12875_v43 }
 0x74b   :  { %9882 = vmatprep.subr.bf16.mxu1 %v12679_v62  ;;  %v12763_v62 = vld [vmem:[#allocation7 + $0xfec] ss:$16 sps:$4 sm:$0xff]  }
 0x74c   :  { %9555 = vmatpush1.bf16.msra.mxu0 %v12674_v30  ;;  %v12758_v30 = vld [vmem:[#allocation7 + $0xfe0] ss:$16 sps:$4 sm:$0xff]  }
 0x74d   :  { %9883 = vmatpush1.bf16.msra.mxu1 %v12677_v45  ;;  %9556 = vmatprep.subr.bf16.mxu0 %v12682_v61  ;;  %v12761_v45 = vld [vmem:[#allocation7 + $0xfe8] ss:$16 sps:$4 sm:$0xff]   ;;  %v12764_v61 = vld [vmem:[%s13935_s6 + $0x40] sm:$0xff]  }
 0x74e   :  { %9884 = vmatprep.subr.bf16.mxu1 %v12685_v63  ;;  %v6152_v63 = vsel %vm6088_vm4, %v13750_v22, %v10980_v56  ;;  %v12768_v22 = vld [vmem:[%s13935_s6 + $0x48] sm:$0xff]  }
 0x750   :  { %9557 = vmatpush1.bf16.msra.mxu0 %v12680_v52  ;;  %v12765_v52 = vld [vmem:[%s13935_s6 + $0xc0] sm:$0xff]  }
 0x751   :  { %9885 = vmatpush1.bf16.msra.mxu1 %v12683_v41  ;;  %9558 = vmatprep.subr.bf16.mxu0 %v12688_v1  ;;  %v12766_v41 = vld [vmem:[%s13935_s6] sm:$0xff]   ;;  %v6168_v1 = vpack.c.bf16 %v6152_v63, %v6152_v63 }
 0x752   :  { %9886 = vmatprep.subr.bf16.mxu1 %v12691_v19  ;;  %v12767_v19 = vld [vmem:[%s13935_s6 + $0x80] sm:$0xff]  }
 0x754   :  { %9559 = vmatpush1.bf16.msra.mxu0 %v12686_v47  ;;  %v12769_v47 = vld [vmem:[%s13935_s6 + $0xc8] sm:$0xff]  }
 0x755   :  { %9887 = vmatpush1.bf16.msra.mxu1 %v12689_v2  ;;  %9560 = vmatprep.subr.bf16.mxu0 %v12694_v20  ;;  %v12770_v2 = vld [vmem:[%s13935_s6 + $0x8] sm:$0xff]  }
 0x756   :  { %9888 = vmatprep.subr.bf16.mxu1 %v12697_v27  ;;  %v12771_v20 = vld [vmem:[%s13935_s6 + $0x88] sm:$0xff]   ;;  %v12772_v27 = vld [vmem:[%s13935_s6 + $0x50] sm:$0xff]  }
 0x758   :  { %9561 = vmatpush1.bf16.msra.mxu0 %v12692_v3  ;;  %v12773_v3 = vld [vmem:[%s13935_s6 + $0xd0] sm:$0xff]  }
 0x759   :  { %9889 = vmatpush1.bf16.msra.mxu1 %v12695_v16  ;;  %9562 = vmatprep.subr.bf16.mxu0 %v12700_v34  ;;  %v12774_v16 = vld [vmem:[%s13935_s6 + $0x10] sm:$0xff]  }
 0x75a   :  { %9890 = vmatprep.subr.bf16.mxu1 %v12703_v48  ;;  %v12775_v34 = vld [vmem:[%s13935_s6 + $0x90] sm:$0xff]   ;;  %v12776_v48 = vld [vmem:[%s13935_s6 + $0x58] sm:$0xff]  }
 0x75c   :  { %9563 = vmatpush1.bf16.msra.mxu0 %v12698_v4  ;;  %v12777_v4 = vld [vmem:[%s13935_s6 + $0xd8] sm:$0xff]  }
 0x75d   :  { %9891 = vmatpush1.bf16.msra.mxu1 %v12701_v6  ;;  %9564 = vmatprep.subr.bf16.mxu0 %v12706_v7  ;;  %v12778_v6 = vld [vmem:[%s13935_s6 + $0x18] sm:$0xff]  }
 0x75e   :  { %9892 = vmatprep.subr.bf16.mxu1 %v12709_v57  ;;  %v12779_v7 = vld [vmem:[%s13935_s6 + $0x98] sm:$0xff]   ;;  %v12780_v57 = vld [vmem:[%s13935_s6 + $0x60] sm:$0xff]  }
 0x760   :  { %9565 = vmatpush1.bf16.msra.mxu0 %v12704_v29  ;;  %v12781_v29 = vld [vmem:[%s13935_s6 + $0xe0] sm:$0xff]  }
 0x761   :  { %9893 = vmatpush1.bf16.msra.mxu1 %v12707_v9  ;;  %9566 = vmatprep.subr.bf16.mxu0 %v12712_v10  ;;  %v12782_v9 = vld [vmem:[%s13935_s6 + $0x20] sm:$0xff]  }
 0x762   :  { %9894 = vmatprep.subr.bf16.mxu1 %v12715_v5  ;;  %v12783_v10 = vld [vmem:[%s13935_s6 + $0xa0] sm:$0xff]   ;;  %v12784_v5 = vld [vmem:[%s13935_s6 + $0x68] sm:$0xff]  }
 0x764   :  { %9567 = vmatpush1.bf16.msra.mxu0 %v12710_v31  ;;  %v12785_v31 = vld [vmem:[%s13935_s6 + $0xe8] sm:$0xff]  }
 0x765   :  { %9895 = vmatpush1.bf16.msra.mxu1 %v12713_v11  ;;  %9568 = vmatprep.subr.bf16.mxu0 %v12718_v12  ;;  %v12786_v11 = vld [vmem:[%s13935_s6 + $0x28] sm:$0xff]  }
 0x766   :  { %9896 = vmatprep.subr.bf16.mxu1 %v12721_v8  ;;  %v12787_v12 = vld [vmem:[%s13935_s6 + $0xa8] sm:$0xff]   ;;  %v12788_v8 = vld [vmem:[%s13935_s6 + $0x70] sm:$0xff]  }
 0x768   :  { %9569 = vmatpush1.bf16.msra.mxu0 %v12716_v13  ;;  %v12789_v13 = vld [vmem:[%s13935_s6 + $0xf0] sm:$0xff]  }
 0x769   :  { %9897 = vmatpush1.bf16.msra.mxu1 %v12719_v14  ;;  %9570 = vmatprep.subr.bf16.mxu0 %v12724_v15  ;;  %v12790_v14 = vld [vmem:[%s13935_s6 + $0x30] sm:$0xff]  }
 0x76a   :  { %9898 = vmatprep.subr.bf16.mxu1 %v12727_v17  ;;  %v12791_v15 = vld [vmem:[%s13935_s6 + $0xb0] sm:$0xff]   ;;  %v12792_v17 = vld [vmem:[%s13935_s6 + $0x78] sm:$0xff]  }
 0x76c   :  { %9571 = vmatpush1.bf16.msra.mxu0 %v12722_v0  ;;  %v12793_v0 = vld [vmem:[%s13935_s6 + $0xf8] sm:$0xff]  }
 0x76d   :  { %9899 = vmatpush1.bf16.msra.mxu1 %v12725_v18  ;;  %9572 = vmatprep.subr.bf16.mxu0 %v12730_v28  ;;  %v12794_v18 = vld [vmem:[%s13935_s6 + $0x38] sm:$0xff]  }
 0x76e   :  { %9900 = vmatprep.subr.bf16.mxu1 %v12733_v32  ;;  %v12795_v28 = vld [vmem:[%s13935_s6 + $0xb8] sm:$0xff]  }
 0x76f   :  { %v6683_v32 = vld [vmem:[#allocation9 + $0x4] ss:$8 sm:$0xf] }
 0x770   :  { %9573 = vmatpush1.bf16.msra.mxu0 %v12728_v38  ;;  %v6688_v38 = vrot.slane %v6683_v32, %v13158_v23  ;;  %v6696_v35 = vrot.slane %v6683_v32, %v13189_v36 }
 0x771   :  { %9901 = vmatpush1.bf16.msra.mxu1 %v12731_v54  ;;  %9574 = vmatprep.subr.bf16.mxu0 %v12736_v37  ;;  %v6692_v54 = vrot.slane %v6683_v32, %v13163_v25  ;;  %v6700_v37 = vrot.slane %v6683_v32, %v13166_v26 }
 0x772   :  { %9902 = vmatprep.subr.bf16.mxu1 %v12739_v49 }
 0x774   :  { %9575 = vmatpush1.bf16.msra.mxu0 %v12734_v60 }
 0x775   :  { %9903 = vmatpush1.bf16.msra.mxu1 %v12737_v33  ;;  %9576 = vmatprep.subr.bf16.mxu0 %v12742_v39 }
 0x776   :  { %9904 = vmatprep.subr.bf16.mxu1 %v12745_v24 }
 0x778   :  { %9577 = vmatpush1.bf16.msra.mxu0 %v12740_v42 }
 0x779   :  { %9905 = vmatpush1.bf16.msra.mxu1 %v12743_v51  ;;  %9578 = vmatprep.subr.bf16.mxu0 %v12748_v59 }
 0x77a   :  { %9906 = vmatprep.subr.bf16.mxu1 %v12751_v44 }
 0x77c   :  { %9579 = vmatpush1.bf16.msra.mxu0 %v12746_v46 }
 0x77d   :  { %9907 = vmatpush1.bf16.msra.mxu1 %v12749_v58  ;;  %9580 = vmatprep.subr.bf16.mxu0 %v12754_v21 }
 0x77e   :  { %9908 = vmatprep.subr.bf16.mxu1 %v12757_v50 }
 0x780   :  { %9581 = vmatpush1.bf16.msra.mxu0 %v12752_v53 }
 0x781   :  { %9909 = vmatpush1.bf16.msra.mxu1 %v12755_v40  ;;  %9582 = vmatprep.subr.bf16.mxu0 %v12760_v55 }
 0x782   :  { %9910 = vmatprep.subr.bf16.mxu1 %v12763_v62  ;;  %v9993_v62 = vld [vmem:[#allocation9 + $0x5] ss:$0 sm:$0xff] }
 0x784   :  { %9583 = vmatpush1.bf16.msra.mxu0 %v12758_v30 }
 0x785   :  { %9911 = vmatpush1.bf16.msra.mxu1 %v12761_v45  ;;  %11702 = vmatprep.subr.bf16.mxu0 %v12764_v61 }
 0x786   :  { %11724 = vmatprep.subr.bf16.mxu1 %v12765_v52 }
 0x787   :  { %9585 = vmatmul.mubr.bf16.vlgmr.msra.gmra.mrb[52].mxu0 %v6168_v1 }
 0x788   :  { %9913 = vmatmul.mubr.bf16.vlgmr.msra.gmra.mrb[52].mxu1 %v6168_v1  ;;  %11703 = vmatpush3.bf16.msra.mxu0 %v12766_v41 }
 0x789   :  { %11725 = vmatpush3.bf16.msra.mxu1 %v12767_v19  ;;  %11704 = vmatprep.subr.bf16.mxu0 %v12768_v22 }
 0x78a   :  { %11726 = vmatprep.subr.bf16.mxu1 %v12769_v47 }
 0x78c   :  { %11705 = vmatpush3.bf16.msra.mxu0 %v12770_v2 }
 0x78d   :  { %11727 = vmatpush3.bf16.msra.mxu1 %v12771_v20  ;;  %11706 = vmatprep.subr.bf16.mxu0 %v12772_v27 }
 0x78e   :  { %11728 = vmatprep.subr.bf16.mxu1 %v12773_v3 }
 0x790   :  { %11707 = vmatpush3.bf16.msra.mxu0 %v12774_v16 }
 0x791   :  { %11729 = vmatpush3.bf16.msra.mxu1 %v12775_v34  ;;  %11708 = vmatprep.subr.bf16.mxu0 %v12776_v48 }
 0x792   :  { %11730 = vmatprep.subr.bf16.mxu1 %v12777_v4 }
 0x794   :  { %11709 = vmatpush3.bf16.msra.mxu0 %v12778_v6 }
 0x795   :  { %11731 = vmatpush3.bf16.msra.mxu1 %v12779_v7  ;;  %11710 = vmatprep.subr.bf16.mxu0 %v12780_v57 }
 0x796   :  { %11732 = vmatprep.subr.bf16.mxu1 %v12781_v29 }
 0x798   :  { %11711 = vmatpush3.bf16.msra.mxu0 %v12782_v9 }
 0x799   :  { %11733 = vmatpush3.bf16.msra.mxu1 %v12783_v10  ;;  %11712 = vmatprep.subr.bf16.mxu0 %v12784_v5 }
 0x79a   :  { %11734 = vmatprep.subr.bf16.mxu1 %v12785_v31 }
 0x79c   :  { %11713 = vmatpush3.bf16.msra.mxu0 %v12786_v11 }
 0x79d   :  { %11735 = vmatpush3.bf16.msra.mxu1 %v12787_v12  ;;  %11714 = vmatprep.subr.bf16.mxu0 %v12788_v8 }
 0x79e   :  { %11736 = vmatprep.subr.bf16.mxu1 %v12789_v13 }
 0x7a0   :  { %11715 = vmatpush3.bf16.msra.mxu0 %v12790_v14 }
 0x7a1   :  { %11737 = vmatpush3.bf16.msra.mxu1 %v12791_v15  ;;  %11716 = vmatprep.subr.bf16.mxu0 %v12792_v17 }
 0x7a2   :  { %11738 = vmatprep.subr.bf16.mxu1 %v12793_v0 }
 0x7a4   :  { %11717 = vmatpush3.bf16.msra.mxu0 %v12794_v18 }
 0x7a5   :  { %11739 = vmatpush3.bf16.msra.mxu1 %v12795_v28 }
 0x85a   :  { %v9586_v49 = vpop.f32.mrb[52].mxu0 }
 0x85b   :  { %v11762_v60 = vadd.f32 %v9586_v49, %v6688_v38  ;;  %v9914_v33 = vpop.f32.mrb[52].mxu1  ;;  %v9588_v39 = vpop.f32.mrb[53].mxu0 }
 0x85c   :  { %v11764_v24 = vadd.f32 %v9914_v33, %v6696_v35  ;;  %v11763_v42 = vadd.f32 %v9588_v39, %v6692_v54  ;;  %v9916_v51 = vpop.f32.mrb[53].mxu1  ;;  %v9590_v59 = vpop.f32.mrb[54].mxu0 }
 0x85d   :  { %12876 = vtanh.f32 %v11762_v60  ;;  %v11765_v44 = vadd.f32 %v9916_v51, %v6700_v37  ;;  %v9918_v46 = vpop.f32.mrb[54].mxu1  ;;  %v9591_v58 = vpop.f32.mrb[55].mxu0 }
 0x85e   :  { %12878 = vtanh.f32 %v11764_v24  ;;  %v9919_v23 = vpop.f32.mrb[55].mxu1 }
 0x85f   :  { %12880 = vtanh.f32 %v11763_v42 }
 0x860   :  { %12882 = vtanh.f32 %v11765_v44 }
 0x867   :  { %v12877_v36 = vpop.eup %12876 }
 0x868   :  { %v12879_v25 = vpop.eup %12878  ;;  %v9925_v43 = vpack.c.bf16 %v12877_v36, %v12877_v36 }
 0x869   :  { %v12881_v21 = vpop.eup %12880  ;;  %v9927_v40 = vpack.c.bf16 %v12879_v25, %v12879_v25 }
 0x86a   :  { %v12883_v26 = vpop.eup %12882  ;;  %v9926_v50 = vpack.c.bf16 %v12881_v21, %v12881_v21 }
 0x86b   :  { %v9928_v53 = vpack.c.bf16 %v12883_v26, %v12883_v26 }
 0x86c   :  { %10218 = vmatprep.mubr.bf16.mxu0 %v9926_v50 }
 0x86d   :  { %10258 = vmatprep.mubr.bf16.mxu1 %v9928_v53  ;;  %10219 = vmatmul.mubr.bf16.vlgmr.msra.gmra.mrb[56].mxu0 %v9925_v43 }
 0x86e   :  { %10259 = vmatmul.mubr.bf16.vlgmr.msra.gmra.mrb[56].mxu1 %v9927_v40 }
 0x940   :  { %v11718_v55 = vpop.f32.mrb[56].mxu0 }
 0x941   :  { %v11740_v56 = vpop.f32.mrb[56].mxu1  ;;  %v11719_v30 = vpop.f32.mrb[57].mxu0 }
 0x942   :  { %v11720_v45 = vadd.f32 %v11719_v30, %v11718_v55  ;;  %v11741_v61 = vpop.f32.mrb[57].mxu1  ;;  %v11721_v63 = vpop.f32.mrb[58].mxu0 }
 0x943   :  { %v11742_v52 = vadd.f32 %v11741_v61, %v11740_v56  ;;  %v11743_v41 = vpop.f32.mrb[58].mxu1  ;;  %v11722_v1 = vpop.f32.mrb[59].mxu0 }
 0x944   :  { %v10221_v19 = vadd.f32 %v11720_v45, %v9993_v62  ;;  %v11744_v22 = vpop.f32.mrb[59].mxu1 }
 0x946   :  { %v10261_v47 = vadd.f32 %v11742_v52, %v10221_v19 }
 0x948   :  { %10266 = vst.msk [vmem:[%s13937_s8] sm:$0xff] %vm130_vm1, %v10261_v47 }
 0x949   :  { %10271 = vsyncpa [#allocation3], 1 }
 0x94a   :  { %10272 = vsyncpa [#allocation5], 1 }
 0x94b   :  { %10273 = vsyncpa [#allocation8], 1 }

</bundles_post_ra>
